<compile_context>
chip_gen: v7x
topology: tpu7x:2x2x1
jax: 0.10.0
libtpu: 0.0.40
codegen_flags: <defaults>
</compile_context>

<pallas_src>
import functools

import jax
import jax.numpy as jnp
from jax import lax
from jax.experimental import pallas as pl
from jax.experimental.pallas import tpu as pltpu


# --------------------------------------------------------------------------
# Tile selection
# --------------------------------------------------------------------------
def _pick_tile_h(H, Wp, budget_rows=2048):
    """Largest divisor of H keeping the (TH+2)*Wp accumulator modest; prefer >=2 tiles."""
    cap = max(1, min(H, budget_rows // max(Wp, 1)))
    th = 1
    for cand in range(cap, 0, -1):
        if H % cand == 0:
            th = cand
            break
    # Expose at least two H-tiles when possible so the second grid axis can be
    # sharded across TensorCores (v7x megacore) even when N is small.
    if th == H and H >= 2:
        for cand in range(H // 2, 0, -1):
            if H % cand == 0:
                th = cand
                break
    return th


# --------------------------------------------------------------------------
# Fused Pallas kernel: (conv3x3 + folded-BN + SiLU) x 2 (+ optional residual)
# --------------------------------------------------------------------------
def _make_fused_bottleneck_kernel(H, W, TH, add):
    Wp = W + 2                 # padded width (SAME pad for 3x3)
    HIN = (TH + 4) * Wp        # padded cv1 input rows staged per tile
    HW1 = (TH + 2) * Wp        # cv1 output rows per tile (1-row halo each side)
    HW2 = TH * Wp              # cv2 output rows per tile

    def kernel(x_ref, w1_ref, b1_ref, w2_ref, b2_ref, out_ref, p1_ref, p2_ref):
        c1 = w1_ref.shape[2]
        cm = w1_ref.shape[3]
        c2 = w2_ref.shape[3]

        h0 = pl.multiple_of(pl.program_id(1) * TH, TH)   # first output row of tile

        # ---- stage 0: zero scratch (cv2's zero padding + flat-offset tails) ----
        p2_ref[...] = jnp.zeros(p2_ref.shape, p2_ref.dtype)
        p1_ref[HIN:, :] = jnp.zeros((p1_ref.shape[0] - HIN, c1), p1_ref.dtype)

        # ---- stage 1: stage this tile's padded input window into a flat bf16
        # buffer.  One contiguous copy; every conv tap below is then a plain
        # stride-1 offset load (no per-tap strided VMEM copies).
        xwin = x_ref[0, pl.ds(h0, TH + 4), :, :]               # (TH+4, Wp, c1) f32
        p1_ref[0:HIN, :] = xwin.astype(jnp.bfloat16).reshape(HIN, c1)

        # ---- stage 2: cv1 = 9 shifted MXU matmuls (bf16 operands, f32 acc) ----
        acc1 = jnp.zeros((HW1, cm), jnp.float32)
        for kh in range(3):
            for kw in range(3):
                off = kh * Wp + kw
                acc1 += jnp.dot(p1_ref[off:off + HW1, :], w1_ref[kh, kw],
                                preferred_element_type=jnp.float32)
        y1 = acc1 + b1_ref[0]                 # folded-BN bias
        y1 = y1 * jax.nn.sigmoid(y1)          # SiLU (f32 epilogue, sigmoid on EUP)
        y1 = y1.reshape(TH + 2, Wp, cm)

        # ---- stage 3: write cv1 activation (row i <-> conv1 output row h0-1+i)
        # into cv2's zero-padded flat VMEM input.  Valid columns go shifted by +1
        # into the pre-zeroed buffer; halo rows falling outside [0, H) must stay
        # zero (they are conv2's zero padding).
        for j in range(TH + 2):
            p2_ref[j * Wp + 1: j * Wp + 1 + W, :] = y1[j, 0:W, :].astype(jnp.bfloat16)

        @pl.when(h0 == 0)
        def _zero_top_halo():                 # conv1 output row -1 -> zero pad
            p2_ref[1:1 + W, :] = jnp.zeros((W, cm), jnp.bfloat16)

        @pl.when(h0 + TH == H)
        def _zero_bottom_halo():              # conv1 output row H -> zero pad
            p2_ref[(TH + 1) * Wp + 1:(TH + 1) * Wp + 1 + W, :] = (
                jnp.zeros((W, cm), jnp.bfloat16))

        # ---- stage 4: cv2, same 9-tap flat-offset structure ----
        acc2 = jnp.zeros((HW2, c2), jnp.float32)
        for kh in range(3):
            for kw in range(3):
                off = kh * Wp + kw
                acc2 += jnp.dot(p2_ref[off:off + HW2, :], w2_ref[kh, kw],
                                preferred_element_type=jnp.float32)
        y2 = acc2 + b2_ref[0]
        y2 = y2 * jax.nn.sigmoid(y2)
        y2 = y2.reshape(TH, Wp, c2)[:, 0:W, :]        # crop pad columns once

        if add:
            xres = x_ref[0, pl.ds(h0 + 2, TH), :, :]   # (TH, Wp, c1) f32
            y2 = y2 + xres[:, 1:W + 1, :]              # residual add in f32

        out_ref[0] = y2.astype(out_ref.dtype)

    return kernel


def bottleneck_pallas(x, w1f, b1f, w2f, b2f, *, add):
    """Fused Bottleneck forward.  x: (N,H,W,C1) f32; w*: HWIO f32 (BN folded)."""
    N, H, W, C1 = x.shape
    KH1, KW1, wc1, CM = w1f.shape
    KH2, KW2, wcm, C2 = w2f.shape
    assert (KH1, KW1, KH2, KW2) == (3, 3, 3, 3), "only 3x3 convs supported"
    assert wc1 == C1 and wcm == CM
    if add:
        assert C1 == C2

    Wp = W + 2
    TH = _pick_tile_h(H, Wp)

    # Single pad for the whole fused block: +-1 column (cv1 SAME pad) and +-2
    # rows (cv1 SAME pad + 1-row halo so every tile's input window is in range).
    # cv2's pad lives entirely in the zero-initialized VMEM scratch, so there is
    # no second pad and no HBM round trip for the intermediate activation.
    xpad = jnp.pad(x, ((0, 0), (2, 2), (1, 1), (0, 0)))

    # MXU operands in bf16 (cast once here for the weights); biases stay f32.
    w1b = w1f.astype(jnp.bfloat16)
    w2b = w2f.astype(jnp.bfloat16)

    kernel = _make_fused_bottleneck_kernel(H, W, TH, add)

    # TODO(synk): for large channel counts, pad Cout to a multiple of 128 (with
    # zero bias on pad lanes) for lane-dense stores, and add a Cout grid axis.
    return pl.pallas_call(
        kernel,
        grid=(N, H // TH),
        in_specs=[
            pl.BlockSpec((1, H + 4, Wp, C1), lambda n, h: (n, 0, 0, 0)),  # padded x (f32)
            pl.BlockSpec((3, 3, C1, CM), lambda n, h: (0, 0, 0, 0)),      # w1 (bf16)
            pl.BlockSpec((1, CM), lambda n, h: (0, 0)),                   # b1 (f32)
            pl.BlockSpec((3, 3, CM, C2), lambda n, h: (0, 0, 0, 0)),      # w2 (bf16)
            pl.BlockSpec((1, C2), lambda n, h: (0, 0)),                   # b2 (f32)
        ],
        out_specs=pl.BlockSpec((1, TH, W, C2), lambda n, h: (n, h, 0, 0)),
        out_shape=jax.ShapeDtypeStruct((N, H, W, C2), jnp.float32),
        scratch_shapes=[
            pltpu.VMEM(((TH + 4) * Wp + 8, C1), jnp.bfloat16),  # padded cv1 input tile
            pltpu.VMEM(((TH + 2) * Wp + 8, CM), jnp.bfloat16),  # padded cv1 out / cv2 in
        ],
        compiler_params=pltpu.CompilerParams(
            dimension_semantics=("parallel", "parallel"),
            vmem_limit_bytes=32 * 1024 * 1024,
        ),
    )(xpad, w1b, b1f.reshape(1, CM), w2b, b2f.reshape(1, C2))


# --------------------------------------------------------------------------
# Glue: BN folding + parameter init + jitted forward
# --------------------------------------------------------------------------
def fold_bn(w, gamma, beta, mean, var, eps=1e-3):
    """Fold inference-mode BatchNorm into a bias-free conv (HWIO weights)."""
    scale = gamma / jnp.sqrt(var + eps)          # (Cout,)
    return w * scale, beta - mean * scale


def init_bottleneck_params(key, c1, c2, k=(3, 3), e=0.5):
    c_ = int(c2 * e)
    ks = jax.random.split(key, 10)

    def conv_params(k0, k1, k2, k3, k4, cin, cout, ksz):
        w = jax.random.normal(k0, (ksz, ksz, cin, cout), jnp.float32) * 0.1
        gamma = 1.0 + 0.1 * jax.random.normal(k1, (cout,), jnp.float32)
        beta = 0.1 * jax.random.normal(k2, (cout,), jnp.float32)
        mean = 0.1 * jax.random.normal(k3, (cout,), jnp.float32)
        var = jnp.abs(jax.random.normal(k4, (cout,), jnp.float32)) + 0.5
        return w, gamma, beta, mean, var

    p1 = conv_params(*ks[0:5], c1, c_, k[0])
    p2 = conv_params(*ks[5:10], c_, c2, k[1])
    return p1, p2, c_


@functools.partial(jax.jit, static_argnames=("shortcut",))
def bottleneck_forward(x, w1f, b1f, w2f, b2f, shortcut=True):
    add = bool(shortcut) and (x.shape[-1] == w2f.shape[-1])
    return bottleneck_pallas(x, w1f, b1f, w2f, b2f, add=add)


# --------------------------------------------------------------------------
# Pure-JAX reference (lax.conv), matching the kernel's bf16/f32 precision recipe
# --------------------------------------------------------------------------
def _ref_conv_bn_silu(x, w, b):
    y = lax.conv_general_dilated(
        x.astype(jnp.bfloat16), w.astype(jnp.bfloat16),
        window_strides=(1, 1), padding="SAME",
        dimension_numbers=("NHWC", "HWIO", "NHWC"),
        preferred_element_type=jnp.float32)
    y = y + b
    return y * jax.nn.sigmoid(y)


def _ref_bottleneck(x, w1f, b1f, w2f, b2f, shortcut=True):
    add = shortcut and (x.shape[-1] == w2f.shape[-1])
    y = _ref_conv_bn_silu(_ref_conv_bn_silu(x, w1f, b1f), w2f, b2f)
    return x + y if add else y


# --------------------------------------------------------------------------
if __name__ == "__main__":
    key = jax.random.PRNGKey(0)
    N, C1, C2, H, W = 2, 4, 4, 16, 16        # small; shortcut active (c1 == c2)

    kx, kp = jax.random.split(key)
    x = jax.random.normal(kx, (N, H, W, C1), jnp.float32)   # layout: NHWC

    (w1, g1, be1, m1, v1), (w2, g2, be2, m2, v2), _ = \
        init_bottleneck_params(kp, C1, C2, k=(3, 3), e=0.5)

    w1f, b1f = fold_bn(w1, g1, be1, m1, v1)
    w2f, b2f = fold_bn(w2, g2, be2, m2, v2)

    out = bottleneck_forward(x, w1f, b1f, w2f, b2f, shortcut=True)
    out = jax.block_until_ready(out)

    ref = _ref_bottleneck(x, w1f, b1f, w2f, b2f, shortcut=True)
    assert out.shape == (N, H, W, C2)
    assert jnp.allclose(out, ref, atol=2e-2, rtol=2e-2), (
        float(jnp.max(jnp.abs(out - ref))))

    print("KERNEL_OK")
</pallas_src>

<mosaic_0001>
module attributes {stable_mosaic.version = 11 : i64} {
  func.func @kernel(%arg0: i32, %arg1: i32, %arg2: memref<1x20x18x4xf32, #tpu.memory_space<vmem>>, %arg3: memref<3x3x4x2xbf16, #tpu.memory_space<vmem>>, %arg4: memref<1x2xf32, #tpu.memory_space<vmem>>, %arg5: memref<3x3x2x4xbf16, #tpu.memory_space<vmem>>, %arg6: memref<1x4xf32, #tpu.memory_space<vmem>>, %arg7: memref<1x8x16x4xf32, #tpu.memory_space<vmem>>, %arg8: memref<224x4xbf16, #tpu.memory_space<vmem>>, %arg9: memref<188x2xbf16, #tpu.memory_space<vmem>>) attributes {dimension_semantics = [#tpu.dimension_semantics<parallel>, #tpu.dimension_semantics<parallel>], iteration_bounds = array<i64: 2, 2>, scalar_prefetch = 0 : i64, scratch_operands = 2 : i64, tpu.core_type = #tpu.core_type<tc>, window_params = [{transform_indices = @transform_0, window_bounds = array<i64: 1, 20, 18, 4>}, {pipeline_mode = #tpu.pipeline_mode<synchronous>, transform_indices = @transform_1, window_bounds = array<i64: 3, 3, 4, 2>}, {pipeline_mode = #tpu.pipeline_mode<synchronous>, transform_indices = @transform_2, window_bounds = array<i64: 1, 2>}, {pipeline_mode = #tpu.pipeline_mode<synchronous>, transform_indices = @transform_3, window_bounds = array<i64: 3, 3, 2, 4>}, {pipeline_mode = #tpu.pipeline_mode<synchronous>, transform_indices = @transform_4, window_bounds = array<i64: 1, 4>}, {transform_indices = @transform_5, window_bounds = array<i64: 1, 8, 16, 4>}]} {
    %c8_i32 = arith.constant 8 : i32
    %0 = arith.muli %arg1, %c8_i32 : i32
    %1 = tpu.assume_multiple %0, 8 : i32
    %cst = arith.constant 0.000000e+00 : bf16
    %2 = vector.broadcast %cst : bf16 to vector<188x2xbf16>
    %c0 = arith.constant 0 : index
    %c0_0 = arith.constant 0 : index
    %3 = vector.load %arg9[%c0, %c0_0] : memref<188x2xbf16, #tpu.memory_space<vmem>>, vector<188x2xbf16>
    tpu.vector_store %arg9[%c0, %c0_0], %2 {strides = array<i32>} : memref<188x2xbf16, #tpu.memory_space<vmem>>, vector<188x2xbf16>,
    %cst_1 = arith.constant 0.000000e+00 : bf16
    %4 = vector.broadcast %cst_1 : bf16 to vector<8x4xbf16>
    %c216 = arith.constant 216 : index
    %c0_2 = arith.constant 0 : index
    %5 = vector.load %arg8[%c216, %c0_2] : memref<224x4xbf16, #tpu.memory_space<vmem>>, vector<8x4xbf16>
    tpu.vector_store %arg8[%c216, %c0_2], %4 {strides = array<i32>} : memref<224x4xbf16, #tpu.memory_space<vmem>>, vector<8x4xbf16>,
    %c0_3 = arith.constant 0 : index
    %6 = arith.index_cast %1 : i32 to index
    %c0_4 = arith.constant 0 : index
    %c0_5 = arith.constant 0 : index
    %7 = vector.load %arg2[%c0_3, %6, %c0_4, %c0_5] : memref<1x20x18x4xf32, #tpu.memory_space<vmem>>, vector<1x12x18x4xf32>
    %8 = vector.shape_cast %7 : vector<1x12x18x4xf32> to vector<12x18x4xf32>
    %9 = arith.truncf %8 : vector<12x18x4xf32> to vector<12x18x4xbf16>
    %10 = vector.shape_cast %9 : vector<12x18x4xbf16> to vector<216x4xbf16>
    %c0_6 = arith.constant 0 : index
    %c0_7 = arith.constant 0 : index
    %11 = vector.load %arg8[%c0_6, %c0_7] : memref<224x4xbf16, #tpu.memory_space<vmem>>, vector<216x4xbf16>
    tpu.vector_store %arg8[%c0_6, %c0_7], %10 {strides = array<i32>} : memref<224x4xbf16, #tpu.memory_space<vmem>>, vector<216x4xbf16>,
    %cst_8 = arith.constant 0.000000e+00 : f32
    %12 = vector.broadcast %cst_8 : f32 to vector<180x2xf32>
    %c0_9 = arith.constant 0 : index
    %c0_10 = arith.constant 0 : index
    %13 = vector.load %arg8[%c0_9, %c0_10] : memref<224x4xbf16, #tpu.memory_space<vmem>>, vector<180x4xbf16>
    %c0_11 = arith.constant 0 : index
    %c0_12 = arith.constant 0 : index
    %c0_13 = arith.constant 0 : index
    %c0_14 = arith.constant 0 : index
    %14 = vector.load %arg3[%c0_11, %c0_12, %c0_13, %c0_14] : memref<3x3x4x2xbf16, #tpu.memory_space<vmem>>, vector<1x1x4x2xbf16>
    %15 = vector.shape_cast %14 : vector<1x1x4x2xbf16> to vector<4x2xbf16>
    %cst_15 = arith.constant dense<0.000000e+00> : vector<180x2xf32>
    %16 = tpu.matmul %13, %15, %cst_15 {dimension_numbers = #tpu.dot_dimension_numbers<[1], [0], [0], [1], [0, 0, 1, 1], [], []>} : vector<180x4xbf16>, vector<4x2xbf16>, vector<180x2xf32> -> vector<180x2xf32>
    %17 = arith.addf %12, %16 : vector<180x2xf32>
    %c1 = arith.constant 1 : index
    %c0_16 = arith.constant 0 : index
    %18 = vector.load %arg8[%c1, %c0_16] : memref<224x4xbf16, #tpu.memory_space<vmem>>, vector<180x4xbf16>
    %c0_17 = arith.constant 0 : index
    %c1_18 = arith.constant 1 : index
    %c0_19 = arith.constant 0 : index
    %c0_20 = arith.constant 0 : index
    %19 = vector.load %arg3[%c0_17, %c1_18, %c0_19, %c0_20] : memref<3x3x4x2xbf16, #tpu.memory_space<vmem>>, vector<1x1x4x2xbf16>
    %20 = vector.shape_cast %19 : vector<1x1x4x2xbf16> to vector<4x2xbf16>
    %cst_21 = arith.constant dense<0.000000e+00> : vector<180x2xf32>
    %21 = tpu.matmul %18, %20, %cst_21 {dimension_numbers = #tpu.dot_dimension_numbers<[1], [0], [0], [1], [0, 0, 1, 1], [], []>} : vector<180x4xbf16>, vector<4x2xbf16>, vector<180x2xf32> -> vector<180x2xf32>
    %22 = arith.addf %17, %21 : vector<180x2xf32>
    %c2 = arith.constant 2 : index
    %c0_22 = arith.constant 0 : index
    %23 = vector.load %arg8[%c2, %c0_22] : memref<224x4xbf16, #tpu.memory_space<vmem>>, vector<180x4xbf16>
    %c0_23 = arith.constant 0 : index
    %c2_24 = arith.constant 2 : index
    %c0_25 = arith.constant 0 : index
    %c0_26 = arith.constant 0 : index
    %24 = vector.load %arg3[%c0_23, %c2_24, %c0_25, %c0_26] : memref<3x3x4x2xbf16, #tpu.memory_space<vmem>>, vector<1x1x4x2xbf16>
    %25 = vector.shape_cast %24 : vector<1x1x4x2xbf16> to vector<4x2xbf16>
    %cst_27 = arith.constant dense<0.000000e+00> : vector<180x2xf32>
    %26 = tpu.matmul %23, %25, %cst_27 {dimension_numbers = #tpu.dot_dimension_numbers<[1], [0], [0], [1], [0, 0, 1, 1], [], []>} : vector<180x4xbf16>, vector<4x2xbf16>, vector<180x2xf32> -> vector<180x2xf32>
    %27 = arith.addf %22, %26 : vector<180x2xf32>
    %c18 = arith.constant 18 : index
    %c0_28 = arith.constant 0 : index
    %28 = vector.load %arg8[%c18, %c0_28] : memref<224x4xbf16, #tpu.memory_space<vmem>>, vector<180x4xbf16>
    %c1_29 = arith.constant 1 : index
    %c0_30 = arith.constant 0 : index
    %c0_31 = arith.constant 0 : index
    %c0_32 = arith.constant 0 : index
    %29 = vector.load %arg3[%c1_29, %c0_30, %c0_31, %c0_32] : memref<3x3x4x2xbf16, #tpu.memory_space<vmem>>, vector<1x1x4x2xbf16>
    %30 = vector.shape_cast %29 : vector<1x1x4x2xbf16> to vector<4x2xbf16>
    %cst_33 = arith.constant dense<0.000000e+00> : vector<180x2xf32>
    %31 = tpu.matmul %28, %30, %cst_33 {dimension_numbers = #tpu.dot_dimension_numbers<[1], [0], [0], [1], [0, 0, 1, 1], [], []>} : vector<180x4xbf16>, vector<4x2xbf16>, vector<180x2xf32> -> vector<180x2xf32>
    %32 = arith.addf %27, %31 : vector<180x2xf32>
    %c19 = arith.constant 19 : index
    %c0_34 = arith.constant 0 : index
    %33 = vector.load %arg8[%c19, %c0_34] : memref<224x4xbf16, #tpu.memory_space<vmem>>, vector<180x4xbf16>
    %c1_35 = arith.constant 1 : index
    %c1_36 = arith.constant 1 : index
    %c0_37 = arith.constant 0 : index
    %c0_38 = arith.constant 0 : index
    %34 = vector.load %arg3[%c1_35, %c1_36, %c0_37, %c0_38] : memref<3x3x4x2xbf16, #tpu.memory_space<vmem>>, vector<1x1x4x2xbf16>
    %35 = vector.shape_cast %34 : vector<1x1x4x2xbf16> to vector<4x2xbf16>
    %cst_39 = arith.constant dense<0.000000e+00> : vector<180x2xf32>
    %36 = tpu.matmul %33, %35, %cst_39 {dimension_numbers = #tpu.dot_dimension_numbers<[1], [0], [0], [1], [0, 0, 1, 1], [], []>} : vector<180x4xbf16>, vector<4x2xbf16>, vector<180x2xf32> -> vector<180x2xf32>
    %37 = arith.addf %32, %36 : vector<180x2xf32>
    %c20 = arith.constant 20 : index
    %c0_40 = arith.constant 0 : index
    %38 = vector.load %arg8[%c20, %c0_40] : memref<224x4xbf16, #tpu.memory_space<vmem>>, vector<180x4xbf16>
    %c1_41 = arith.constant 1 : index
    %c2_42 = arith.constant 2 : index
    %c0_43 = arith.constant 0 : index
    %c0_44 = arith.constant 0 : index
    %39 = vector.load %arg3[%c1_41, %c2_42, %c0_43, %c0_44] : memref<3x3x4x2xbf16, #tpu.memory_space<vmem>>, vector<1x1x4x2xbf16>
    %40 = vector.shape_cast %39 : vector<1x1x4x2xbf16> to vector<4x2xbf16>
    %cst_45 = arith.constant dense<0.000000e+00> : vector<180x2xf32>
    %41 = tpu.matmul %38, %40, %cst_45 {dimension_numbers = #tpu.dot_dimension_numbers<[1], [0], [0], [1], [0, 0, 1, 1], [], []>} : vector<180x4xbf16>, vector<4x2xbf16>, vector<180x2xf32> -> vector<180x2xf32>
    %42 = arith.addf %37, %41 : vector<180x2xf32>
    %c36 = arith.constant 36 : index
    %c0_46 = arith.constant 0 : index
    %43 = vector.load %arg8[%c36, %c0_46] : memref<224x4xbf16, #tpu.memory_space<vmem>>, vector<180x4xbf16>
    %c2_47 = arith.constant 2 : index
    %c0_48 = arith.constant 0 : index
    %c0_49 = arith.constant 0 : index
    %c0_50 = arith.constant 0 : index
    %44 = vector.load %arg3[%c2_47, %c0_48, %c0_49, %c0_50] : memref<3x3x4x2xbf16, #tpu.memory_space<vmem>>, vector<1x1x4x2xbf16>
    %45 = vector.shape_cast %44 : vector<1x1x4x2xbf16> to vector<4x2xbf16>
    %cst_51 = arith.constant dense<0.000000e+00> : vector<180x2xf32>
    %46 = tpu.matmul %43, %45, %cst_51 {dimension_numbers = #tpu.dot_dimension_numbers<[1], [0], [0], [1], [0, 0, 1, 1], [], []>} : vector<180x4xbf16>, vector<4x2xbf16>, vector<180x2xf32> -> vector<180x2xf32>
    %47 = arith.addf %42, %46 : vector<180x2xf32>
    %c37 = arith.constant 37 : index
    %c0_52 = arith.constant 0 : index
    %48 = vector.load %arg8[%c37, %c0_52] : memref<224x4xbf16, #tpu.memory_space<vmem>>, vector<180x4xbf16>
    %c2_53 = arith.constant 2 : index
    %c1_54 = arith.constant 1 : index
    %c0_55 = arith.constant 0 : index
    %c0_56 = arith.constant 0 : index
    %49 = vector.load %arg3[%c2_53, %c1_54, %c0_55, %c0_56] : memref<3x3x4x2xbf16, #tpu.memory_space<vmem>>, vector<1x1x4x2xbf16>
    %50 = vector.shape_cast %49 : vector<1x1x4x2xbf16> to vector<4x2xbf16>
    %cst_57 = arith.constant dense<0.000000e+00> : vector<180x2xf32>
    %51 = tpu.matmul %48, %50, %cst_57 {dimension_numbers = #tpu.dot_dimension_numbers<[1], [0], [0], [1], [0, 0, 1, 1], [], []>} : vector<180x4xbf16>, vector<4x2xbf16>, vector<180x2xf32> -> vector<180x2xf32>
    %52 = arith.addf %47, %51 : vector<180x2xf32>
    %c38 = arith.constant 38 : index
    %c0_58 = arith.constant 0 : index
    %53 = vector.load %arg8[%c38, %c0_58] : memref<224x4xbf16, #tpu.memory_space<vmem>>, vector<180x4xbf16>
    %c2_59 = arith.constant 2 : index
    %c2_60 = arith.constant 2 : index
    %c0_61 = arith.constant 0 : index
    %c0_62 = arith.constant 0 : index
    %54 = vector.load %arg3[%c2_59, %c2_60, %c0_61, %c0_62] : memref<3x3x4x2xbf16, #tpu.memory_space<vmem>>, vector<1x1x4x2xbf16>
    %55 = vector.shape_cast %54 : vector<1x1x4x2xbf16> to vector<4x2xbf16>
    %cst_63 = arith.constant dense<0.000000e+00> : vector<180x2xf32>
    %56 = tpu.matmul %53, %55, %cst_63 {dimension_numbers = #tpu.dot_dimension_numbers<[1], [0], [0], [1], [0, 0, 1, 1], [], []>} : vector<180x4xbf16>, vector<4x2xbf16>, vector<180x2xf32> -> vector<180x2xf32>
    %57 = arith.addf %52, %56 : vector<180x2xf32>
    %c0_64 = arith.constant 0 : index
    %c0_65 = arith.constant 0 : index
    %58 = vector.load %arg4[%c0_64, %c0_65] : memref<1x2xf32, #tpu.memory_space<vmem>>, vector<1x2xf32>
    %59 = vector.shape_cast %58 : vector<1x2xf32> to vector<2xf32>
    %60 = vector.shape_cast %59 : vector<2xf32> to vector<1x2xf32>
    %61 = vector.broadcast %60 : vector<1x2xf32> to vector<180x2xf32>
    %62 = arith.addf %57, %61 : vector<180x2xf32>
    %63 = arith.negf %62 : vector<180x2xf32>
    %64 = math.exp %63 : vector<180x2xf32>
    %cst_66 = arith.constant 1.000000e+00 : f32
    %65 = vector.broadcast %cst_66 : f32 to vector<180x2xf32>
    %66 = arith.addf %65, %64 : vector<180x2xf32>
    %67 = arith.divf %65, %66 : vector<180x2xf32>
    %68 = arith.mulf %62, %67 : vector<180x2xf32>
    %69 = vector.shape_cast %68 : vector<180x2xf32> to vector<10x18x2xf32>
    %70 = vector.extract_strided_slice %69 {offsets = [0, 0, 0], sizes = [1, 16, 2], strides = [1, 1, 1]} : vector<10x18x2xf32> to vector<1x16x2xf32>
    %71 = vector.shape_cast %70 : vector<1x16x2xf32> to vector<16x2xf32>
    %72 = arith.truncf %71 : vector<16x2xf32> to vector<16x2xbf16>
    %c1_67 = arith.constant 1 : index
    %c0_68 = arith.constant 0 : index
    %73 = vector.load %arg9[%c1_67, %c0_68] : memref<188x2xbf16, #tpu.memory_space<vmem>>, vector<16x2xbf16>
    tpu.vector_store %arg9[%c1_67, %c0_68], %72 {strides = array<i32>} : memref<188x2xbf16, #tpu.memory_space<vmem>>, vector<16x2xbf16>,
    %74 = vector.extract_strided_slice %69 {offsets = [1, 0, 0], sizes = [1, 16, 2], strides = [1, 1, 1]} : vector<10x18x2xf32> to vector<1x16x2xf32>
    %75 = vector.shape_cast %74 : vector<1x16x2xf32> to vector<16x2xf32>
    %76 = arith.truncf %75 : vector<16x2xf32> to vector<16x2xbf16>
    %c19_69 = arith.constant 19 : index
    %c0_70 = arith.constant 0 : index
    %77 = vector.load %arg9[%c19_69, %c0_70] : memref<188x2xbf16, #tpu.memory_space<vmem>>, vector<16x2xbf16>
    tpu.vector_store %arg9[%c19_69, %c0_70], %76 {strides = array<i32>} : memref<188x2xbf16, #tpu.memory_space<vmem>>, vector<16x2xbf16>,
    %78 = vector.extract_strided_slice %69 {offsets = [2, 0, 0], sizes = [1, 16, 2], strides = [1, 1, 1]} : vector<10x18x2xf32> to vector<1x16x2xf32>
    %79 = vector.shape_cast %78 : vector<1x16x2xf32> to vector<16x2xf32>
    %80 = arith.truncf %79 : vector<16x2xf32> to vector<16x2xbf16>
    %c37_71 = arith.constant 37 : index
    %c0_72 = arith.constant 0 : index
    %81 = vector.load %arg9[%c37_71, %c0_72] : memref<188x2xbf16, #tpu.memory_space<vmem>>, vector<16x2xbf16>
    tpu.vector_store %arg9[%c37_71, %c0_72], %80 {strides = array<i32>} : memref<188x2xbf16, #tpu.memory_space<vmem>>, vector<16x2xbf16>,
    %82 = vector.extract_strided_slice %69 {offsets = [3, 0, 0], sizes = [1, 16, 2], strides = [1, 1, 1]} : vector<10x18x2xf32> to vector<1x16x2xf32>
    %83 = vector.shape_cast %82 : vector<1x16x2xf32> to vector<16x2xf32>
    %84 = arith.truncf %83 : vector<16x2xf32> to vector<16x2xbf16>
    %c55 = arith.constant 55 : index
    %c0_73 = arith.constant 0 : index
    %85 = vector.load %arg9[%c55, %c0_73] : memref<188x2xbf16, #tpu.memory_space<vmem>>, vector<16x2xbf16>
    tpu.vector_store %arg9[%c55, %c0_73], %84 {strides = array<i32>} : memref<188x2xbf16, #tpu.memory_space<vmem>>, vector<16x2xbf16>,
    %86 = vector.extract_strided_slice %69 {offsets = [4, 0, 0], sizes = [1, 16, 2], strides = [1, 1, 1]} : vector<10x18x2xf32> to vector<1x16x2xf32>
    %87 = vector.shape_cast %86 : vector<1x16x2xf32> to vector<16x2xf32>
    %88 = arith.truncf %87 : vector<16x2xf32> to vector<16x2xbf16>
    %c73 = arith.constant 73 : index
    %c0_74 = arith.constant 0 : index
    %89 = vector.load %arg9[%c73, %c0_74] : memref<188x2xbf16, #tpu.memory_space<vmem>>, vector<16x2xbf16>
    tpu.vector_store %arg9[%c73, %c0_74], %88 {strides = array<i32>} : memref<188x2xbf16, #tpu.memory_space<vmem>>, vector<16x2xbf16>,
    %90 = vector.extract_strided_slice %69 {offsets = [5, 0, 0], sizes = [1, 16, 2], strides = [1, 1, 1]} : vector<10x18x2xf32> to vector<1x16x2xf32>
    %91 = vector.shape_cast %90 : vector<1x16x2xf32> to vector<16x2xf32>
    %92 = arith.truncf %91 : vector<16x2xf32> to vector<16x2xbf16>
    %c91 = arith.constant 91 : index
    %c0_75 = arith.constant 0 : index
    %93 = vector.load %arg9[%c91, %c0_75] : memref<188x2xbf16, #tpu.memory_space<vmem>>, vector<16x2xbf16>
    tpu.vector_store %arg9[%c91, %c0_75], %92 {strides = array<i32>} : memref<188x2xbf16, #tpu.memory_space<vmem>>, vector<16x2xbf16>,
    %94 = vector.extract_strided_slice %69 {offsets = [6, 0, 0], sizes = [1, 16, 2], strides = [1, 1, 1]} : vector<10x18x2xf32> to vector<1x16x2xf32>
    %95 = vector.shape_cast %94 : vector<1x16x2xf32> to vector<16x2xf32>
    %96 = arith.truncf %95 : vector<16x2xf32> to vector<16x2xbf16>
    %c109 = arith.constant 109 : index
    %c0_76 = arith.constant 0 : index
    %97 = vector.load %arg9[%c109, %c0_76] : memref<188x2xbf16, #tpu.memory_space<vmem>>, vector<16x2xbf16>
    tpu.vector_store %arg9[%c109, %c0_76], %96 {strides = array<i32>} : memref<188x2xbf16, #tpu.memory_space<vmem>>, vector<16x2xbf16>,
    %98 = vector.extract_strided_slice %69 {offsets = [7, 0, 0], sizes = [1, 16, 2], strides = [1, 1, 1]} : vector<10x18x2xf32> to vector<1x16x2xf32>
    %99 = vector.shape_cast %98 : vector<1x16x2xf32> to vector<16x2xf32>
    %100 = arith.truncf %99 : vector<16x2xf32> to vector<16x2xbf16>
    %c127 = arith.constant 127 : index
    %c0_77 = arith.constant 0 : index
    %101 = vector.load %arg9[%c127, %c0_77] : memref<188x2xbf16, #tpu.memory_space<vmem>>, vector<16x2xbf16>
    tpu.vector_store %arg9[%c127, %c0_77], %100 {strides = array<i32>} : memref<188x2xbf16, #tpu.memory_space<vmem>>, vector<16x2xbf16>,
    %102 = vector.extract_strided_slice %69 {offsets = [8, 0, 0], sizes = [1, 16, 2], strides = [1, 1, 1]} : vector<10x18x2xf32> to vector<1x16x2xf32>
    %103 = vector.shape_cast %102 : vector<1x16x2xf32> to vector<16x2xf32>
    %104 = arith.truncf %103 : vector<16x2xf32> to vector<16x2xbf16>
    %c145 = arith.constant 145 : index
    %c0_78 = arith.constant 0 : index
    %105 = vector.load %arg9[%c145, %c0_78] : memref<188x2xbf16, #tpu.memory_space<vmem>>, vector<16x2xbf16>
    tpu.vector_store %arg9[%c145, %c0_78], %104 {strides = array<i32>} : memref<188x2xbf16, #tpu.memory_space<vmem>>, vector<16x2xbf16>,
    %106 = vector.extract_strided_slice %69 {offsets = [9, 0, 0], sizes = [1, 16, 2], strides = [1, 1, 1]} : vector<10x18x2xf32> to vector<1x16x2xf32>
    %107 = vector.shape_cast %106 : vector<1x16x2xf32> to vector<16x2xf32>
    %108 = arith.truncf %107 : vector<16x2xf32> to vector<16x2xbf16>
    %c163 = arith.constant 163 : index
    %c0_79 = arith.constant 0 : index
    %109 = vector.load %arg9[%c163, %c0_79] : memref<188x2xbf16, #tpu.memory_space<vmem>>, vector<16x2xbf16>
    tpu.vector_store %arg9[%c163, %c0_79], %108 {strides = array<i32>} : memref<188x2xbf16, #tpu.memory_space<vmem>>, vector<16x2xbf16>,
    %c0_i32 = arith.constant 0 : i32
    %110 = arith.cmpi eq, %1, %c0_i32 : i32
    %111 = arith.extui %110 : i1 to i32
    %c0_i32_80 = arith.constant 0 : i32
    %112 = arith.cmpi ne, %111, %c0_i32_80 : i32
    scf.if %112 {
      %cst_157 = arith.constant 0.000000e+00 : bf16
      %185 = vector.broadcast %cst_157 : bf16 to vector<16x2xbf16>
      %c1_158 = arith.constant 1 : index
      %c0_159 = arith.constant 0 : index
      %186 = vector.load %arg9[%c1_158, %c0_159] : memref<188x2xbf16, #tpu.memory_space<vmem>>, vector<16x2xbf16>
      tpu.vector_store %arg9[%c1_158, %c0_159], %185 {strides = array<i32>} : memref<188x2xbf16, #tpu.memory_space<vmem>>, vector<16x2xbf16>,
    } else {
    }
    %c8_i32_81 = arith.constant 8 : i32
    %113 = arith.addi %1, %c8_i32_81 : i32
    %c16_i32 = arith.constant 16 : i32
    %114 = arith.cmpi eq, %113, %c16_i32 : i32
    %115 = arith.extui %114 : i1 to i32
    %c0_i32_82 = arith.constant 0 : i32
    %116 = arith.cmpi ne, %115, %c0_i32_82 : i32
    scf.if %116 {
      %cst_157 = arith.constant 0.000000e+00 : bf16
      %185 = vector.broadcast %cst_157 : bf16 to vector<16x2xbf16>
      %c163_158 = arith.constant 163 : index
      %c0_159 = arith.constant 0 : index
      %186 = vector.load %arg9[%c163_158, %c0_159] : memref<188x2xbf16, #tpu.memory_space<vmem>>, vector<16x2xbf16>
      tpu.vector_store %arg9[%c163_158, %c0_159], %185 {strides = array<i32>} : memref<188x2xbf16, #tpu.memory_space<vmem>>, vector<16x2xbf16>,
    } else {
    }
    %cst_83 = arith.constant 0.000000e+00 : f32
    %117 = vector.broadcast %cst_83 : f32 to vector<144x4xf32>
    %c0_84 = arith.constant 0 : index
    %c0_85 = arith.constant 0 : index
    %118 = vector.load %arg9[%c0_84, %c0_85] : memref<188x2xbf16, #tpu.memory_space<vmem>>, vector<144x2xbf16>
    %c0_86 = arith.constant 0 : index
    %c0_87 = arith.constant 0 : index
    %c0_88 = arith.constant 0 : index
    %c0_89 = arith.constant 0 : index
    %119 = vector.load %arg5[%c0_86, %c0_87, %c0_88, %c0_89] : memref<3x3x2x4xbf16, #tpu.memory_space<vmem>>, vector<1x1x2x4xbf16>
    %120 = vector.shape_cast %119 : vector<1x1x2x4xbf16> to vector<2x4xbf16>
    %cst_90 = arith.constant dense<0.000000e+00> : vector<144x4xf32>
    %121 = tpu.matmul %118, %120, %cst_90 {dimension_numbers = #tpu.dot_dimension_numbers<[1], [0], [0], [1], [0, 0, 1, 1], [], []>} : vector<144x2xbf16>, vector<2x4xbf16>, vector<144x4xf32> -> vector<144x4xf32>
    %122 = arith.addf %117, %121 : vector<144x4xf32>
    %c1_91 = arith.constant 1 : index
    %c0_92 = arith.constant 0 : index
    %123 = vector.load %arg9[%c1_91, %c0_92] : memref<188x2xbf16, #tpu.memory_space<vmem>>, vector<144x2xbf16>
    %c0_93 = arith.constant 0 : index
    %c1_94 = arith.constant 1 : index
    %c0_95 = arith.constant 0 : index
    %c0_96 = arith.constant 0 : index
    %124 = vector.load %arg5[%c0_93, %c1_94, %c0_95, %c0_96] : memref<3x3x2x4xbf16, #tpu.memory_space<vmem>>, vector<1x1x2x4xbf16>
    %125 = vector.shape_cast %124 : vector<1x1x2x4xbf16> to vector<2x4xbf16>
    %cst_97 = arith.constant dense<0.000000e+00> : vector<144x4xf32>
    %126 = tpu.matmul %123, %125, %cst_97 {dimension_numbers = #tpu.dot_dimension_numbers<[1], [0], [0], [1], [0, 0, 1, 1], [], []>} : vector<144x2xbf16>, vector<2x4xbf16>, vector<144x4xf32> -> vector<144x4xf32>
    %127 = arith.addf %122, %126 : vector<144x4xf32>
    %c2_98 = arith.constant 2 : index
    %c0_99 = arith.constant 0 : index
    %128 = vector.load %arg9[%c2_98, %c0_99] : memref<188x2xbf16, #tpu.memory_space<vmem>>, vector<144x2xbf16>
    %c0_100 = arith.constant 0 : index
    %c2_101 = arith.constant 2 : index
    %c0_102 = arith.constant 0 : index
    %c0_103 = arith.constant 0 : index
    %129 = vector.load %arg5[%c0_100, %c2_101, %c0_102, %c0_103] : memref<3x3x2x4xbf16, #tpu.memory_space<vmem>>, vector<1x1x2x4xbf16>
    %130 = vector.shape_cast %129 : vector<1x1x2x4xbf16> to vector<2x4xbf16>
    %cst_104 = arith.constant dense<0.000000e+00> : vector<144x4xf32>
    %131 = tpu.matmul %128, %130, %cst_104 {dimension_numbers = #tpu.dot_dimension_numbers<[1], [0], [0], [1], [0, 0, 1, 1], [], []>} : vector<144x2xbf16>, vector<2x4xbf16>, vector<144x4xf32> -> vector<144x4xf32>
    %132 = arith.addf %127, %131 : vector<144x4xf32>
    %c18_105 = arith.constant 18 : index
    %c0_106 = arith.constant 0 : index
    %133 = vector.load %arg9[%c18_105, %c0_106] : memref<188x2xbf16, #tpu.memory_space<vmem>>, vector<144x2xbf16>
    %c1_107 = arith.constant 1 : index
    %c0_108 = arith.constant 0 : index
    %c0_109 = arith.constant 0 : index
    %c0_110 = arith.constant 0 : index
    %134 = vector.load %arg5[%c1_107, %c0_108, %c0_109, %c0_110] : memref<3x3x2x4xbf16, #tpu.memory_space<vmem>>, vector<1x1x2x4xbf16>
    %135 = vector.shape_cast %134 : vector<1x1x2x4xbf16> to vector<2x4xbf16>
    %cst_111 = arith.constant dense<0.000000e+00> : vector<144x4xf32>
    %136 = tpu.matmul %133, %135, %cst_111 {dimension_numbers = #tpu.dot_dimension_numbers<[1], [0], [0], [1], [0, 0, 1, 1], [], []>} : vector<144x2xbf16>, vector<2x4xbf16>, vector<144x4xf32> -> vector<144x4xf32>
    %137 = arith.addf %132, %136 : vector<144x4xf32>
    %c19_112 = arith.constant 19 : index
    %c0_113 = arith.constant 0 : index
    %138 = vector.load %arg9[%c19_112, %c0_113] : memref<188x2xbf16, #tpu.memory_space<vmem>>, vector<144x2xbf16>
    %c1_114 = arith.constant 1 : index
    %c1_115 = arith.constant 1 : index
    %c0_116 = arith.constant 0 : index
    %c0_117 = arith.constant 0 : index
    %139 = vector.load %arg5[%c1_114, %c1_115, %c0_116, %c0_117] : memref<3x3x2x4xbf16, #tpu.memory_space<vmem>>, vector<1x1x2x4xbf16>
    %140 = vector.shape_cast %139 : vector<1x1x2x4xbf16> to vector<2x4xbf16>
    %cst_118 = arith.constant dense<0.000000e+00> : vector<144x4xf32>
    %141 = tpu.matmul %138, %140, %cst_118 {dimension_numbers = #tpu.dot_dimension_numbers<[1], [0], [0], [1], [0, 0, 1, 1], [], []>} : vector<144x2xbf16>, vector<2x4xbf16>, vector<144x4xf32> -> vector<144x4xf32>
    %142 = arith.addf %137, %141 : vector<144x4xf32>
    %c20_119 = arith.constant 20 : index
    %c0_120 = arith.constant 0 : index
    %143 = vector.load %arg9[%c20_119, %c0_120] : memref<188x2xbf16, #tpu.memory_space<vmem>>, vector<144x2xbf16>
    %c1_121 = arith.constant 1 : index
    %c2_122 = arith.constant 2 : index
    %c0_123 = arith.constant 0 : index
    %c0_124 = arith.constant 0 : index
    %144 = vector.load %arg5[%c1_121, %c2_122, %c0_123, %c0_124] : memref<3x3x2x4xbf16, #tpu.memory_space<vmem>>, vector<1x1x2x4xbf16>
    %145 = vector.shape_cast %144 : vector<1x1x2x4xbf16> to vector<2x4xbf16>
    %cst_125 = arith.constant dense<0.000000e+00> : vector<144x4xf32>
    %146 = tpu.matmul %143, %145, %cst_125 {dimension_numbers = #tpu.dot_dimension_numbers<[1], [0], [0], [1], [0, 0, 1, 1], [], []>} : vector<144x2xbf16>, vector<2x4xbf16>, vector<144x4xf32> -> vector<144x4xf32>
    %147 = arith.addf %142, %146 : vector<144x4xf32>
    %c36_126 = arith.constant 36 : index
    %c0_127 = arith.constant 0 : index
    %148 = vector.load %arg9[%c36_126, %c0_127] : memref<188x2xbf16, #tpu.memory_space<vmem>>, vector<144x2xbf16>
    %c2_128 = arith.constant 2 : index
    %c0_129 = arith.constant 0 : index
    %c0_130 = arith.constant 0 : index
    %c0_131 = arith.constant 0 : index
    %149 = vector.load %arg5[%c2_128, %c0_129, %c0_130, %c0_131] : memref<3x3x2x4xbf16, #tpu.memory_space<vmem>>, vector<1x1x2x4xbf16>
    %150 = vector.shape_cast %149 : vector<1x1x2x4xbf16> to vector<2x4xbf16>
    %cst_132 = arith.constant dense<0.000000e+00> : vector<144x4xf32>
    %151 = tpu.matmul %148, %150, %cst_132 {dimension_numbers = #tpu.dot_dimension_numbers<[1], [0], [0], [1], [0, 0, 1, 1], [], []>} : vector<144x2xbf16>, vector<2x4xbf16>, vector<144x4xf32> -> vector<144x4xf32>
    %152 = arith.addf %147, %151 : vector<144x4xf32>
    %c37_133 = arith.constant 37 : index
    %c0_134 = arith.constant 0 : index
    %153 = vector.load %arg9[%c37_133, %c0_134] : memref<188x2xbf16, #tpu.memory_space<vmem>>, vector<144x2xbf16>
    %c2_135 = arith.constant 2 : index
    %c1_136 = arith.constant 1 : index
    %c0_137 = arith.constant 0 : index
    %c0_138 = arith.constant 0 : index
    %154 = vector.load %arg5[%c2_135, %c1_136, %c0_137, %c0_138] : memref<3x3x2x4xbf16, #tpu.memory_space<vmem>>, vector<1x1x2x4xbf16>
    %155 = vector.shape_cast %154 : vector<1x1x2x4xbf16> to vector<2x4xbf16>
    %cst_139 = arith.constant dense<0.000000e+00> : vector<144x4xf32>
    %156 = tpu.matmul %153, %155, %cst_139 {dimension_numbers = #tpu.dot_dimension_numbers<[1], [0], [0], [1], [0, 0, 1, 1], [], []>} : vector<144x2xbf16>, vector<2x4xbf16>, vector<144x4xf32> -> vector<144x4xf32>
    %157 = arith.addf %152, %156 : vector<144x4xf32>
    %c38_140 = arith.constant 38 : index
    %c0_141 = arith.constant 0 : index
    %158 = vector.load %arg9[%c38_140, %c0_141] : memref<188x2xbf16, #tpu.memory_space<vmem>>, vector<144x2xbf16>
    %c2_142 = arith.constant 2 : index
    %c2_143 = arith.constant 2 : index
    %c0_144 = arith.constant 0 : index
    %c0_145 = arith.constant 0 : index
    %159 = vector.load %arg5[%c2_142, %c2_143, %c0_144, %c0_145] : memref<3x3x2x4xbf16, #tpu.memory_space<vmem>>, vector<1x1x2x4xbf16>
    %160 = vector.shape_cast %159 : vector<1x1x2x4xbf16> to vector<2x4xbf16>
    %cst_146 = arith.constant dense<0.000000e+00> : vector<144x4xf32>
    %161 = tpu.matmul %158, %160, %cst_146 {dimension_numbers = #tpu.dot_dimension_numbers<[1], [0], [0], [1], [0, 0, 1, 1], [], []>} : vector<144x2xbf16>, vector<2x4xbf16>, vector<144x4xf32> -> vector<144x4xf32>
    %162 = arith.addf %157, %161 : vector<144x4xf32>
    %c0_147 = arith.constant 0 : index
    %c0_148 = arith.constant 0 : index
    %163 = vector.load %arg6[%c0_147, %c0_148] : memref<1x4xf32, #tpu.memory_space<vmem>>, vector<1x4xf32>
    %164 = vector.shape_cast %163 : vector<1x4xf32> to vector<4xf32>
    %165 = vector.shape_cast %164 : vector<4xf32> to vector<1x4xf32>
    %166 = vector.broadcast %165 : vector<1x4xf32> to vector<144x4xf32>
    %167 = arith.addf %162, %166 : vector<144x4xf32>
    %168 = arith.negf %167 : vector<144x4xf32>
    %169 = math.exp %168 : vector<144x4xf32>
    %cst_149 = arith.constant 1.000000e+00 : f32
    %170 = vector.broadcast %cst_149 : f32 to vector<144x4xf32>
    %171 = arith.addf %170, %169 : vector<144x4xf32>
    %172 = arith.divf %170, %171 : vector<144x4xf32>
    %173 = arith.mulf %167, %172 : vector<144x4xf32>
    %174 = vector.shape_cast %173 : vector<144x4xf32> to vector<8x18x4xf32>
    %175 = vector.extract_strided_slice %174 {offsets = [0, 0, 0], sizes = [8, 16, 4], strides = [1, 1, 1]} : vector<8x18x4xf32> to vector<8x16x4xf32>
    %c2_i32 = arith.constant 2 : i32
    %176 = arith.addi %1, %c2_i32 : i32
    %c0_150 = arith.constant 0 : index
    %177 = arith.index_cast %176 : i32 to index
    %c0_151 = arith.constant 0 : index
    %c0_152 = arith.constant 0 : index
    %178 = vector.load %arg2[%c0_150, %177, %c0_151, %c0_152] : memref<1x20x18x4xf32, #tpu.memory_space<vmem>>, vector<1x8x18x4xf32>
    %179 = vector.shape_cast %178 : vector<1x8x18x4xf32> to vector<8x18x4xf32>
    %180 = vector.extract_strided_slice %179 {offsets = [0, 1, 0], sizes = [8, 16, 4], strides = [1, 1, 1]} : vector<8x18x4xf32> to vector<8x16x4xf32>
    %181 = arith.addf %175, %180 : vector<8x16x4xf32>
    %c0_153 = arith.constant 0 : index
    %c0_154 = arith.constant 0 : index
    %c0_155 = arith.constant 0 : index
    %c0_156 = arith.constant 0 : index
    %182 = vector.load %arg7[%c0_153, %c0_154, %c0_155, %c0_156] : memref<1x8x16x4xf32, #tpu.memory_space<vmem>>, vector<1x8x16x4xf32>
    %183 = vector.shape_cast %182 : vector<1x8x16x4xf32> to vector<8x16x4xf32>
    %184 = vector.shape_cast %181 : vector<8x16x4xf32> to vector<1x8x16x4xf32>
    tpu.vector_store %arg7[%c0_153, %c0_154, %c0_155, %c0_156], %184 {strides = array<i32>} : memref<1x8x16x4xf32, #tpu.memory_space<vmem>>, vector<1x8x16x4xf32>,
    return
  }
  func.func @transform_0(%arg0: i32, %arg1: i32) -> (i32, i32, i32, i32) {
    %c0_i32 = arith.constant 0 : i32
    %c0_i32_0 = arith.constant 0 : i32
    %c0_i32_1 = arith.constant 0 : i32
    %c0_i32_2 = arith.constant 0 : i32
    return %arg0, %c0_i32, %c0_i32_0, %c0_i32_1 : i32, i32, i32, i32
  }
  func.func @transform_1(%arg0: i32, %arg1: i32) -> (i32, i32, i32, i32) {
    %c0_i32 = arith.constant 0 : i32
    %c0_i32_0 = arith.constant 0 : i32
    %c0_i32_1 = arith.constant 0 : i32
    %c0_i32_2 = arith.constant 0 : i32
    %c0_i32_3 = arith.constant 0 : i32
    return %c0_i32, %c0_i32_0, %c0_i32_1, %c0_i32_2 : i32, i32, i32, i32
  }
  func.func @transform_2(%arg0: i32, %arg1: i32) -> (i32, i32) {
    %c0_i32 = arith.constant 0 : i32
    %c0_i32_0 = arith.constant 0 : i32
    %c0_i32_1 = arith.constant 0 : i32
    return %c0_i32, %c0_i32_0 : i32, i32
  }
  func.func @transform_3(%arg0: i32, %arg1: i32) -> (i32, i32, i32, i32) {
    %c0_i32 = arith.constant 0 : i32
    %c0_i32_0 = arith.constant 0 : i32
    %c0_i32_1 = arith.constant 0 : i32
    %c0_i32_2 = arith.constant 0 : i32
    %c0_i32_3 = arith.constant 0 : i32
    return %c0_i32, %c0_i32_0, %c0_i32_1, %c0_i32_2 : i32, i32, i32, i32
  }
  func.func @transform_4(%arg0: i32, %arg1: i32) -> (i32, i32) {
    %c0_i32 = arith.constant 0 : i32
    %c0_i32_0 = arith.constant 0 : i32
    %c0_i32_1 = arith.constant 0 : i32
    return %c0_i32, %c0_i32_0 : i32, i32
  }
  func.func @transform_5(%arg0: i32, %arg1: i32) -> (i32, i32, i32, i32) {
    %c0_i32 = arith.constant 0 : i32
    %c0_i32_0 = arith.constant 0 : i32
    %c0_i32_1 = arith.constant 0 : i32
    return %arg0, %arg1, %c0_i32, %c0_i32_0 : i32, i32, i32, i32
  }
}

</mosaic_0001>

<bundles_post_ra>
// kernel: bottleneck_forward.1
= control target key start
LH: loop header
LB: loop body
LE: loop exit
PB: predicated region body
PF: predicated region fallthrough
CT: control target
= control target key end

     0   :  { %s10673_s18 = smov 0   ;;  %s10675_s19 = smov 0   ;;  %s13994_s0 = inlined_call_operand.vmem [shape: f32[2,20,18,4], index: 0, kind: input, shape index: {}]   ;;  %s13995_s1 = inlined_call_operand.vmem [shape: bf16[3,3,4,2], index: 1, kind: input, shape index: {}]   ;;  %s13996_s2 = inlined_call_operand.vmem [shape: f32[1,2], index: 2, kind: input, shape index: {}]   ;;  %s13997_s3 = inlined_call_operand.vmem [shape: bf16[3,3,2,4], index: 3, kind: input, shape index: {}]   ;;  %s13998_s4 = inlined_call_operand.vmem [shape: f32[1,4], index: 4, kind: input, shape index: {}]   ;;  %s13999_s5 = inlined_call_operand.vmem [shape: f32[2,16,16,4], index: 5, kind: output, shape index: {}]  }
   0x1   :  { %s10677_s20 = smov 0   ;;  %s10679_s21 = smov 0  }
   0x2   :  { %s10681_s22 = smov 0  }
   0x3 LB: > { %s24_s23 = sadd.s32 1, %s10626_s20  ;;  %s27_s24 = sadd.s32 1, %s10630_s21  ;;  %s10634_s22 = sphi %s10681_s22, %s15_s22   ;;  %s10630_s21 = sphi %s10679_s21, %s14331_s21   ;;  %s10626_s20 = sphi %s10677_s20, %s14330_s20   ;;  %s10622_s19 = sphi %s10675_s19, %s14329_s19   ;;  %s10618_s18 = sphi %s10673_s18, %s14328_s18  }
   0x4   : > { %p25_p0 = scmp.ge.s32.totalorder %s24_s23, 2  ;;  %p8982_p1 = scmp.ge.s32.totalorder %s10634_s22, 1 }
   0x5   : > { %p201_p2 = scmp.lt.s32.totalorder %s10634_s22, 5 }
   0x6   : > { %s14333_s23 = smov (%p25_p0, %s24_s23), 0  ;;  %s14335_s24 = smov (!%p25_p0, %s27_s24), %s10630_s21 }
   0x7   : > { %p202_p3 = pnand %p8982_p1, %p201_p2  ;;  %p29_p4 = scmp.ge.s32.totalorder %s14335_s24, 2 }
   0x9   : > { %s14337_s24 = smov (%p29_p4, %s14335_s24), 0  ;;  %205 = sbr.rel (%p202_p3) target bundleno = 1613 (0x64d), region = 40 }
  0x10   : > { %v9014_v0 = vld [vmem:[%s13995_s1 + $0x2] sm:$0x3]  ;;  %vm1961_vm0 = vcmask 1041408   ;;  %p234_p5 = scmp.lt.s32.totalorder %s10622_s19, 1  ;;  %s10709_s27 = sshll.u32 %s10618_s18, 3  ;;  %v370_v1 = vlaneseq  ;;  %vm14000_vm1 = vcmask 31744  }
  0x11   : > { %10328 = vmatprep.subr.msk.bf16.mxu0 %vm1961_vm0, %v9014_v0  ;;  %v1963_v2 = vsel %vm1961_vm0, %v9014_v0, 0  ;;  %p242_p6 = scmp.lt.s32.totalorder %s10709_s27, 15  ;;  %s8989_s28 = smul.u32 192, %s10618_s18  ;;  %10329 = vmatprep.subr.msk.bf16.mxu1 %vm1961_vm0, %v9014_v0  ;;  %v10636_v3 = vmov 1966171168   ;;  %vm14005_vm3 = vcmask 1046528  }
  0x12   : > { %9591 = vmatpush3.bf16.msra.mxu0 %v1963_v2  ;;  %s14339_s19 = smov (!%p234_p5, %s10622_s19), 1  ;;  %v368_v4 = vunpack.c.l.s4 %v10636_v3  ;;  %v1825_v5 = vld [vmem:[%s13995_s1] sm:$0x3]  ;;  %10167 = vmatpush3.bf16.msra.mxu1 %v1963_v2  ;;  %v10720_v6 = vshrl.u32 %v370_v1, 7  ;;  %vm14006_vm2 = vsmask.f32 7424 }
  0x13   : > { %s243_s6 = scalar_select %p242_p6, %s10709_s27, 15  ;;  %10330 = vmatprep.subr.msk.bf16.mxu0 %vm1961_vm0, %v1825_v5  ;;  %v10745_v23 = vsel %vm1961_vm0, %v1825_v5, 0  ;;  %vm14003_vm4 = vsmask.f32 6400  ;;  %vm1811_vm5 = vcmask 27648   ;;  %vm14004_vm6 = vcmask 1045504  }
  0x14   : > { %s10338_s7 = smul.u32 480, %s14339_s19  ;;  %s8986_s8 = sshll.u32 %s14339_s19, 5  ;;  %v369_v7 = vunpack.c.0.s8 %v368_v4  ;;  %vm278_vm7 = vcmask 31748   ;;  %vm14001_vm8 = vsmask.f32 5376  ;;  %vm14002_vm9 = vcmask 1044480  }
  0x15   : > { %s8985_s9 = sshll.u32 %s243_s6, 1  ;;  %vm14007_vm10 = vcmask 11264   ;;  %vm276_vm11 = vcmask 9216   ;;  %vm4731_vm12 = vcmask 11265   ;;  %vm4732_vm13 = vsmask.f32 7942 }
  0x16   : > { %s238_s12 = scalar_lea.vmem %s13994_s0, %s10338_s7  ;;  %s246_s13 = sadd.s32 %s8986_s8, %s8985_s9  ;;  %v10729_v8 = vsub.s32 %v369_v7, %v10720_v6  ;;  %vm4653_vm14 = vsmask.f32 7938  ;;  %vm4629_vm15 = vsmask.f32 256 }
  0x17   : > { %s8987_s14 = sshll.u32 %s246_s13, 3  ;;  %s10726_s15 = scalar_lea.vmem %s238_s12, %s8989_s28 }
  0x18   : > { %s10734_s18 = scalar_lea.vmem %s13999_s5, %s8987_s14  ;;  %v282_v9 = vld [vmem:[%s10726_s15] sm:$0xff]  ;;  %v283_v10 = vld [vmem:[%s10726_s15 + $0x8] sm:$0xff]  ;;  %v284_v11 = vld [vmem:[%s10726_s15 + $0x10] sm:$0x3]  ;;  %p9174_p7 = scmp.ne.s32.totalorder %s10709_s27, 0 }
  0x19   : > { %v285_v12 = vld [vmem:[%s10726_s15 + $0x18] sm:$0xff]  ;;  %v286_v13 = vld [vmem:[%s10726_s15 + $0x20] sm:$0xff]  ;;  %v318_v14 = vpack.c.bf16 %v283_v10, %v282_v9  ;;  %v319_v15 = vpack.c.bf16 %v284_v11, %v284_v11  ;;  %v8990_v16 = vpack.c.bf16 %v283_v10, %v283_v10  ;;  %v287_v17 = vld [vmem:[%s10726_s15 + $0x28] sm:$0x3] }
  0x1a   : > { %v320_v18 = vpack.c.bf16 %v286_v13, %v285_v12  ;;  %v8991_v19 = vpack.c.bf16 %v286_v13, %v286_v13  ;;  %v288_v20 = vld [vmem:[%s10726_s15 + $0x30] sm:$0xff]  ;;  %v289_v21 = vld [vmem:[%s10726_s15 + $0x38] sm:$0xff]  ;;  %v321_v22 = vpack.c.bf16 %v287_v17, %v287_v17  ;;  %v290_v10 = vld [vmem:[%s10726_s15 + $0x40] sm:$0x3] }
  0x1b   : > { %v373_v24 = vrot.slane %v318_v14, %v10729_v8  ;;  %v380_v25 = vrot.slane %v8990_v16, %v10729_v8  ;;  %v421_v26 = vrot.slane %v319_v15, %v10729_v8  ;;  %v322_v27 = vpack.c.bf16 %v289_v21, %v288_v20  ;;  %v291_v15 = vld [vmem:[%s10726_s15 + $0x48] sm:$0xff]  ;;  %v292_v16 = vld [vmem:[%s10726_s15 + $0x50] sm:$0xff] }
  0x1c   : > { %v436_v28 = vrot.slane %v320_v18, %v10729_v8  ;;  %v443_v29 = vrot.slane %v8991_v19, %v10729_v8  ;;  %v484_v30 = vrot.slane %v321_v22, %v10729_v8  ;;  %v8992_v31 = vpack.c.bf16 %v289_v21, %v289_v21 }
  0x1d   : > { %v381_v32 = vcombine.high %v373_v24, %v373_v24  ;;  %v382_v33 = vcombine.high %v380_v25, %v380_v25  ;;  %v389_v34 = vrot.slane %v373_v24, %v10729_v8  ;;  %v396_v35 = vrot.slane %v380_v25, %v10729_v8 }
  0x1e   : > { %v428_v36 = vrot.slane %v421_v26, %v10729_v8  ;;  %v444_v37 = vcombine.high %v436_v28, %v436_v28  ;;  %v445_v38 = vcombine.high %v443_v29, %v443_v29  ;;  %v452_v39 = vrot.slane %v436_v28, %v10729_v8 }
  0x1f   : > { %v403_v40 = vrot.slane %v381_v32, %v10729_v8  ;;  %v410_v41 = vrot.slane %v382_v33, %v10729_v8  ;;  %v459_v42 = vrot.slane %v443_v29, %v10729_v8  ;;  %v491_v43 = vrot.slane %v484_v30, %v10729_v8 }
  0x20   : > { %v466_v44 = vrot.slane %v444_v37, %v10729_v8  ;;  %v473_v45 = vrot.slane %v445_v38, %v10729_v8  ;;  %v474_v46 = vcombine.high %v452_v39, %v452_v39  ;;  %v1171_v47 = vcombine.low %v428_v36, %v452_v39  ;;  %v293_v38 = vld [vmem:[%s10726_s15 + $0x58] sm:$0x3] }
  0x21   : > { %v475_v48 = vcombine.high %v459_v42, %v459_v42  ;;  %v1122_v49 = vcombine.low %v389_v34, %v403_v40  ;;  %v9002_v50 = vcombine.high %v389_v34, %v403_v40  ;;  %v1124_v51 = vcombine.low %v396_v35, %v410_v41 }
  0x22   : > { %v476_v52 = vcombine.high %v466_v44, %v466_v44  ;;  %v477_v53 = vcombine.high %v473_v45, %v473_v45  ;;  %v9003_v54 = vcombine.high %v396_v35, %v410_v41  ;;  %v1172_v55 = vcombine.low %v466_v44, %v474_v46 }
  0x23   : > { %v1132_v56 = vrot.slane %v1122_v49, %v10729_v8  ;;  %v1139_v57 = vrot.slane %v9002_v50, %v10729_v8  ;;  %v1146_v58 = vrot.slane %v1124_v51, %v10729_v8  ;;  %v1174_v59 = vcombine.low %v473_v45, %v475_v48  ;;  %v10799_v48 = vld [vmem:[%s10726_s15 + $0x68] sm:$0xff] }
  0x24   : > { %v1153_v60 = vrot.slane %v9003_v54, %v10729_v8  ;;  %v1173_v61 = vcombine.low %v476_v52, %v459_v42  ;;  %v1181_v62 = vrot.slane %v1171_v47, %v10729_v8  ;;  %v1188_v63 = vrot.slane %v1172_v55, %v10729_v8  ;;  %v294_v47 = vld [vmem:[%s10726_s15 + $0x60] sm:$0xff] }
  0x25   : > { %v1154_v0 = vcombine.low %v1132_v56, %v1139_v57  ;;  %v1202_v1 = vrot.slane %v1174_v59, %v10729_v8  ;;  %v499_v2 = vrot.slane %v322_v27, %v10729_v8  ;;  %v506_v3 = vrot.slane %v8992_v31, %v10729_v8 }
  0x26   : > { %v1155_v4 = vcombine.low %v1146_v58, %v1153_v60  ;;  %v1195_v5 = vrot.slane %v1173_v61, %v10729_v8  ;;  %v1203_v7 = vcombine.low %v1181_v62, %v1188_v63  ;;  %v1220_v9 = vcombine.low %v477_v53, %v491_v43 }
  0x27   : > { %v1162_v11 = vrot.slane %v1154_v0, %v10729_v8  ;;  %v507_v12 = vcombine.high %v499_v2, %v499_v2  ;;  %v508_v13 = vcombine.high %v506_v3, %v506_v3  ;;  %v515_v14 = vrot.slane %v499_v2, %v10729_v8 }
  0x28   : > { %v1169_v17 = vrot.slane %v1155_v4, %v10729_v8  ;;  %v1204_v18 = vcombine.low %v1195_v5, %v1202_v1  ;;  %v1211_v19 = vrot.slane %v1203_v7, %v10729_v8  ;;  %v522_v20 = vrot.slane %v506_v3, %v10729_v8 }
  0x29   : > { %v529_v21 = vrot.slane %v507_v12, %v10729_v8  ;;  %v536_v22 = vrot.slane %v508_v13, %v10729_v8  ;;  %v1230_v24 = vrot.slane %v1220_v9, %v10729_v8  ;;  %v323_v25 = vpack.c.bf16 %v290_v10, %v290_v10 }
  0x2a   : > { %v1170_v26 = vcombine.low %v1162_v11, %v1169_v17  ;;  %v1218_v27 = vrot.slane %v1204_v18, %v10729_v8  ;;  %v324_v28 = vpack.c.bf16 %v292_v16, %v291_v15  ;;  %v8993_v29 = vpack.c.bf16 %v292_v16, %v292_v16  ;;  %v296_v17 = vld [vmem:[%s10726_s15 + $0x70] sm:$0x3] }
  0x2b   : > { %v1221_v30 = vcombine.low %v515_v14, %v529_v21  ;;  %v9004_v31 = vcombine.high %v515_v14, %v529_v21  ;;  %v1223_v32 = vcombine.low %v522_v20, %v536_v22  ;;  %v547_v33 = vrot.slane %v323_v25, %v10729_v8 }
  0x2c   : > { %v1219_v34 = vcombine.low %v1211_v19, %v1218_v27  ;;  %1798 = vst.msk [vmem:[#allocation2] sm:$0xff] %vm14000_vm1, %v1170_v26  ;;  %v562_v35 = vrot.slane %v324_v28, %v10729_v8  ;;  %v569_v36 = vrot.slane %v8993_v29, %v10729_v8  ;;  %v9005_v37 = vcombine.high %v522_v20, %v536_v22  ;;  %v297_v22 = vld [vmem:[%s10726_s15 + $0x78] sm:$0xff] }
  0x2d   : > { %v1237_v39 = vrot.slane %v1221_v30, %v10729_v8  ;;  %v1244_v40 = vrot.slane %v9004_v31, %v10729_v8  ;;  %v1251_v41 = vrot.slane %v1223_v32, %v10729_v8  ;;  %v554_v42 = vrot.slane %v547_v33, %v10729_v8 }
  0x2e   : > { %1799 = vst.msk [vmem:[#allocation2 + $0x8] sm:$0xff] %vm14000_vm1, %v1219_v34  ;;  %v570_v43 = vcombine.high %v562_v35, %v562_v35  ;;  %v571_v44 = vcombine.high %v569_v36, %v569_v36  ;;  %v578_v45 = vrot.slane %v562_v35, %v10729_v8  ;;  %v585_v46 = vrot.slane %v569_v36, %v10729_v8 }
  0x2f   : > { %v1252_v49 = vcombine.low %v1230_v24, %v1237_v39  ;;  %v1253_v50 = vcombine.low %v1244_v40, %v1251_v41  ;;  %v1279_v51 = vrot.slane %v9005_v37, %v10729_v8  ;;  %v325_v52 = vpack.c.bf16 %v293_v38, %v293_v38  ;;  %v298_v24 = vld [vmem:[%s10726_s15 + $0x80] sm:$0xff]  ;;  %v299_v37 = vld [vmem:[%s10726_s15 + $0x88] sm:$0x3] }
  0x30   : > { %v592_v53 = vrot.slane %v570_v43, %v10729_v8  ;;  %v600_v54 = vcombine.high %v578_v45, %v578_v45  ;;  %v601_v55 = vcombine.high %v585_v46, %v585_v46  ;;  %v1270_v56 = vcombine.low %v554_v42, %v578_v45 }
  0x31   : > { %v1260_v57 = vrot.slane %v1252_v49, %v10729_v8  ;;  %v1267_v58 = vrot.slane %v1253_v50, %v10729_v8  ;;  %v326_v59 = vpack.c.bf16 %v10799_v48, %v294_v47  ;;  %v599_v60 = vrot.slane %v571_v44, %v10729_v8 }
  0x32   : > { %v602_v61 = vcombine.high %v592_v53, %v592_v53  ;;  %v1271_v62 = vcombine.low %v592_v53, %v600_v54  ;;  %v1286_v63 = vrot.slane %v1270_v56, %v10729_v8  ;;  %v610_v0 = vrot.slane %v325_v52, %v10729_v8  ;;  %v10845_v52 = vld [vmem:[%s10726_s15 + $0x98] sm:$0xff] }
  0x33   : > { %v10809_v1 = vld [vmem:[#allocation2] sm:$0xff]  ;;  %v1268_v2 = vcombine.low %v1260_v57, %v1267_v58  ;;  %v603_v3 = vcombine.high %v599_v60, %v599_v60  ;;  %v625_v4 = vrot.slane %v326_v59, %v10729_v8  ;;  %v1318_v5 = vcombine.low %v599_v60, %v601_v55 }
  0x34   : > { %v1831_v7 = vshrl.u32 %v10809_v1, 16  ;;  %v1833_v9 = vshll.u32 %v10809_v1, 16  ;;  %v1272_v10 = vcombine.low %v602_v61, %v585_v46  ;;  %v1293_v11 = vrot.slane %v1271_v62, %v10729_v8 }
  0x35   : > { %v10815_v12 = vld [vmem:[#allocation2 + $0x8] sm:$0xff]  ;;  %1800 = vst.msk [vmem:[#allocation2 + $0x10] sm:$0xff] %vm14000_vm1, %v1268_v2  ;;  %v1301_v13 = vcombine.low %v1279_v51, %v1286_v63  ;;  %v617_v14 = vrot.slane %v610_v0, %v10729_v8  ;;  %v633_v15 = vcombine.high %v625_v4, %v625_v4  ;;  %v641_v16 = vrot.slane %v625_v4, %v10729_v8  ;;  %v300_v51 = vld [vmem:[%s10726_s15 + $0x90] sm:$0xff] }
  0x36   : > { %v1835_v18 = vrot.slane %v1833_v9, 1  ;;  %v1838_v19 = vshll.u32 %v10815_v12, 16  ;;  %v1842_v20 = vshrl.u32 %v10815_v12, 16  ;;  %v1300_v21 = vrot.slane %v1272_v10, %v10729_v8  ;;  %v9039_v9 = vld [vmem:[%s13995_s1 + $0x4] sm:$0x3] }
  0x37   : > { %v1309_v25 = vrot.slane %v1301_v13, %v10729_v8  ;;  %v655_v26 = vrot.slane %v633_v15, %v10729_v8  ;;  %v1319_v27 = vcombine.low %v603_v3, %v617_v14  ;;  %v1328_v28 = vrot.slane %v1318_v5, %v10729_v8 }
  0x38   : > { %v1836_v29 = vor.u32 %v1835_v18, %v1831_v7  ;;  %v1840_v30 = vrot.slane %v1838_v19, 1  ;;  %v1302_v31 = vcombine.low %v1293_v11, %v1300_v21  ;;  %v327_v32 = vpack.c.bf16 %v296_v17, %v296_v17  ;;  %v302_v18 = vld [vmem:[%s10726_s15 + $0xa0] sm:$0x3] }
  0x39   : > { %v1320_v33 = vcombine.low %v641_v16, %v655_v26  ;;  %v9006_v34 = vcombine.high %v641_v16, %v655_v26  ;;  %v1335_v35 = vrot.slane %v1319_v27, %v10729_v8  ;;  %v328_v36 = vpack.c.bf16 %v298_v24, %v297_v22 }
  0x3a   : > { %v1841_v38 = vsel %vm14006_vm2, %v1836_v29, %v1840_v30  ;;  %v1844_v39 = vor.u32 %v1842_v20, %v1840_v30  ;;  %v1316_v40 = vrot.slane %v1302_v31, %v10729_v8  ;;  %v8994_v41 = vpack.c.bf16 %v10799_v48, %v10799_v48 }
  0x3b   : > { %9592 = vmatprep.mubr.msk.bf16.mxu0 %vm14000_vm1, %v1841_v38  ;;  %v1342_v42 = vrot.slane %v1320_v33, %v10729_v8  ;;  %v1349_v43 = vrot.slane %v9006_v34, %v10729_v8  ;;  %v1350_v44 = vcombine.low %v1328_v28, %v1335_v35  ;;  %v673_v45 = vrot.slane %v327_v32, %v10729_v8  ;;  %v303_v34 = vld [vmem:[%s10726_s15 + $0xa8] sm:$0xff]  ;;  %v10889_v35 = vld [vmem:[%s10726_s15 + $0xb0] sm:$0xff] }
  0x3c   : > { %v10839_v46 = vld [vmem:[#allocation2 + $0x10] sm:$0xff]  ;;  %v1317_v47 = vcombine.low %v1309_v25, %v1316_v40  ;;  %v632_v49 = vrot.slane %v8994_v41, %v10729_v8  ;;  %v688_v50 = vrot.slane %v328_v36, %v10729_v8  ;;  %v329_v48 = vpack.c.bf16 %v299_v37, %v299_v37 }
  0x3d   : > { %v1846_v53 = vshll.u32 %v10839_v46, 16  ;;  %v1850_v54 = vshrl.u32 %v10839_v46, 16  ;;  %v1351_v55 = vcombine.low %v1342_v42, %v1349_v43  ;;  %v1358_v56 = vrot.slane %v1350_v44, %v10729_v8 }
  0x3e   : > { %1801 = vst.msk [vmem:[#allocation2 + $0x18] sm:$0xff] %vm14000_vm1, %v1317_v47  ;;  %v634_v57 = vcombine.high %v632_v49, %v632_v49  ;;  %v648_v58 = vrot.slane %v632_v49, %v10729_v8  ;;  %v680_v59 = vrot.slane %v673_v45, %v10729_v8  ;;  %v696_v60 = vcombine.high %v688_v50, %v688_v50 }
  0x3f   : > { %v1848_v61 = vrot.slane %v1846_v53, 1  ;;  %v1365_v62 = vrot.slane %v1351_v55, %v10729_v8  ;;  %v704_v63 = vrot.slane %v688_v50, %v10729_v8  ;;  %v330_v0 = vpack.c.bf16 %v10845_v52, %v300_v51 }
  0x40   : > { %v662_v2 = vrot.slane %v634_v57, %v10729_v8  ;;  %v718_v3 = vrot.slane %v696_v60, %v10729_v8  ;;  %v8995_v4 = vpack.c.bf16 %v298_v24, %v298_v24  ;;  %v736_v5 = vrot.slane %v329_v48, %v10729_v8 }
  0x41   : > { %v1849_v7 = vsel %vm14006_vm2, %v1844_v39, %v1848_v61  ;;  %v1852_v10 = vor.u32 %v1850_v54, %v1848_v61  ;;  %v1366_v11 = vcombine.low %v1358_v56, %v1365_v62  ;;  %v726_v13 = vcombine.high %v704_v63, %v704_v63  ;;  %v305_v61 = vld [vmem:[%s10726_s15 + $0xb8] sm:$0x3] }
  0x42   : > { %9593 = vmatmul.mubr.msk.bf16.vlgmr.msra.gmra.mrb[0].mxu0 %vm14000_vm1, %v1849_v7  ;;  %v1367_v14 = vcombine.low %v648_v58, %v662_v2  ;;  %v9007_v15 = vcombine.high %v648_v58, %v662_v2  ;;  %v1369_v16 = vcombine.low %v680_v59, %v704_v63  ;;  %v695_v17 = vrot.slane %v8995_v4, %v10729_v8 }
  0x43   : > { %9617 = vmatpush3.bf16.msra.mxu0 %v10745_v23  ;;  %9618 = vmatprep.mubr.msk.bf16.mxu0 %vm14000_vm1, %v10809_v1  ;;  %1802 = vst.msk [vmem:[#allocation2 + $0x20] sm:$0xff] %vm14000_vm1, %v1366_v11  ;;  %v1370_v19 = vcombine.low %v718_v3, %v726_v13  ;;  %v728_v20 = vcombine.high %v718_v3, %v718_v3  ;;  %v2325_v50 = vsel %vm1961_vm0, %v9039_v9, 0  ;;  %v10926_v13 = vld [vmem:[%s13995_s1 + $0x6] sm:$0x3] }
  0x44   : > { %v743_v21 = vrot.slane %v736_v5, %v10729_v8  ;;  %10331 = vmatprep.subr.msk.bf16.mxu0 %vm1961_vm0, %v9039_v9  ;;  %v1377_v22 = vrot.slane %v1367_v14, %v10729_v8  ;;  %v1384_v24 = vrot.slane %v9007_v15, %v10729_v8  ;;  %v1391_v25 = vrot.slane %v1369_v16, %v10729_v8 }
  0x45   : > { %v697_v23 = vcombine.high %v695_v17, %v695_v17  ;;  %v10879_v26 = vld [vmem:[#allocation2 + $0x18] sm:$0xff]  ;;  %v1398_v1 = vrot.slane %v1370_v19, %v10729_v8  ;;  %v711_v27 = vrot.slane %v695_v17, %v10729_v8  ;;  %v751_v28 = vrot.slane %v330_v0, %v10729_v8 }
  0x46   : > { %v331_v29 = vpack.c.bf16 %v302_v18, %v302_v18  ;;  %v1854_v30 = vshll.u32 %v10879_v26, 16  ;;  %v1858_v31 = vshrl.u32 %v10879_v26, 16  ;;  %v1399_v32 = vcombine.low %v1377_v22, %v1384_v24 }
  0x47   : > { %v725_v33 = vrot.slane %v697_v23, %v10729_v8  ;;  %v1400_v36 = vcombine.low %v1391_v25, %v1398_v1  ;;  %v727_v37 = vcombine.high %v711_v27, %v711_v27  ;;  %v759_v38 = vcombine.high %v751_v28, %v751_v28  ;;  %v306_v23 = vld [vmem:[%s10726_s15 + $0xc0] sm:$0xff]  ;;  %v307_v1 = vld [vmem:[%s10726_s15 + $0xc8] sm:$0xff] }
  0x48   : > { %v767_v39 = vrot.slane %v751_v28, %v10729_v8  ;;  %v1856_v40 = vrot.slane %v1854_v30, 1  ;;  %v1407_v41 = vrot.slane %v1399_v32, %v10729_v8  ;;  %v1416_v43 = vcombine.low %v728_v20, %v711_v27 }
  0x49   : > { %v729_v42 = vcombine.high %v725_v33, %v725_v33  ;;  %v1414_v44 = vrot.slane %v1400_v36, %v10729_v8  ;;  %v781_v45 = vrot.slane %v759_v38, %v10729_v8  ;;  %v1417_v47 = vcombine.low %v725_v33, %v727_v37 }
  0x4a   : > { %v332_v49 = vpack.c.bf16 %v10889_v35, %v303_v34  ;;  %v1857_v51 = vsel %vm14006_vm2, %v1852_v10, %v1856_v40  ;;  %v10900_v48 = vld [vmem:[#allocation2 + $0x20] sm:$0xff]  ;;  %v1426_v56 = vrot.slane %v1416_v43, %v10729_v8  ;;  %v1860_v57 = vor.u32 %v1858_v31, %v1856_v40 }
  0x4b   : > { %v1418_v55 = vcombine.low %v729_v42, %v743_v21  ;;  %9596 = vmatprep.mubr.msk.bf16.mxu1 %vm14000_vm1, %v1857_v51  ;;  %v1862_v58 = vshll.u32 %v10900_v48, 16  ;;  %v1415_v59 = vcombine.low %v1407_v41, %v1414_v44  ;;  %v1419_v60 = vcombine.low %v767_v39, %v781_v45 }
  0x4c   : > { %v1433_v62 = vrot.slane %v1417_v47, %v10729_v8  ;;  %v8996_v0 = vpack.c.bf16 %v10845_v52, %v10845_v52  ;;  %v799_v2 = vrot.slane %v331_v29, %v10729_v8  ;;  %v1866_v4 = vshrl.u32 %v10900_v48, 16 }
  0x4d   : > { %v1440_v63 = vrot.slane %v1418_v55, %v10729_v8  ;;  %v1864_v3 = vrot.slane %v1862_v58, 1  ;;  %1803 = vst.msk [vmem:[#allocation2 + $0x28] sm:$0xff] %vm14000_vm1, %v1415_v59  ;;  %v1447_v5 = vrot.slane %v1419_v60, %v10729_v8  ;;  %v814_v7 = vrot.slane %v332_v49, %v10729_v8 }
  0x4e   : > { %9619 = vmatmul.mubr.msk.bf16.vlgmr.msra.gmra.mrb[0].mxu0 %vm14000_vm1, %v10815_v12  ;;  %v1448_v9 = vcombine.low %v1426_v56, %v1433_v62  ;;  %v758_v10 = vrot.slane %v8996_v0, %v10729_v8  ;;  %v806_v52 = vrot.slane %v799_v2, %v10729_v8  ;;  %v333_v11 = vpack.c.bf16 %v305_v61, %v305_v61  ;;  %v308_v0 = vld [vmem:[%s10726_s15 + $0xd0] sm:$0x3] }
  0x4f   : > { %9643 = vmatpush3.bf16.msra.mxu0 %v2325_v50  ;;  %9622 = vmatprep.mubr.msk.bf16.mxu0 %vm14000_vm1, %v10839_v46  ;;  %v1865_v14 = vsel %vm14006_vm2, %v1860_v57, %v1864_v3  ;;  %v1449_v15 = vcombine.low %v1440_v63, %v1447_v5  ;;  %v9008_v16 = vcombine.high %v767_v39, %v781_v45 }
  0x50   : > { %9597 = vmatmul.mubr.msk.bf16.vlgmr.msra.gmra.mrb[0].mxu1 %vm14000_vm1, %v1865_v14  ;;  %v1456_v17 = vrot.slane %v1448_v9, %v10729_v8  ;;  %v760_v18 = vcombine.high %v758_v10, %v758_v10  ;;  %v774_v19 = vrot.slane %v758_v10, %v10729_v8  ;;  %v830_v20 = vrot.slane %v814_v7, %v10729_v8 }
  0x51   : > { %v1868_v21 = vor.u32 %v1866_v4, %v1864_v3  ;;  %v1463_v22 = vrot.slane %v1449_v15, %v10729_v8  ;;  %v8997_v24 = vpack.c.bf16 %v10889_v35, %v10889_v35  ;;  %v822_v25 = vcombine.high %v814_v7, %v814_v7  ;;  %10332 = vmatprep.subr.msk.bf16.mxu0 %vm1961_vm0, %v10926_v13 }
  0x52   : > { %v788_v27 = vrot.slane %v760_v18, %v10729_v8  ;;  %v1468_v28 = vcombine.low %v806_v52, %v830_v20  ;;  %v852_v29 = vcombine.high %v830_v20, %v830_v20  ;;  %v862_v32 = vrot.slane %v333_v11, %v10729_v8  ;;  %v310_v18 = vld [vmem:[%s10726_s15 + $0xe0] sm:$0xff] }
  0x53   : > { %v1464_v33 = vcombine.low %v1456_v17, %v1463_v22  ;;  %v1475_v34 = vrot.slane %v9008_v16, %v10729_v8  ;;  %v821_v36 = vrot.slane %v8997_v24, %v10729_v8  ;;  %v844_v37 = vrot.slane %v822_v25, %v10729_v8  ;;  %v309_v17 = vld [vmem:[%s10726_s15 + $0xd8] sm:$0xff] }
  0x54   : > { %v10949_v35 = vld [vmem:[#allocation2 + $0x28] sm:$0xff]  ;;  %v1466_v38 = vcombine.low %v774_v19, %v788_v27  ;;  %v9009_v39 = vcombine.high %v774_v19, %v788_v27  ;;  %v1496_v40 = vrot.slane %v1468_v28, %v10729_v8  ;;  %v334_v41 = vpack.c.bf16 %v307_v1, %v306_v23 }
  0x55   : > { %v1870_v42 = vshll.u32 %v10949_v35, 16  ;;  %1804 = vst.msk [vmem:[#allocation2 + $0x30] sm:$0xff] %vm14000_vm1, %v1464_v33  ;;  %v823_v43 = vcombine.high %v821_v36, %v821_v36  ;;  %v837_v44 = vrot.slane %v821_v36, %v10729_v8  ;;  %v869_v45 = vrot.slane %v862_v32, %v10729_v8 }
  0x56   : > { %9623 = vmatmul.mubr.msk.bf16.gmra.mrb[4].mxu0 %vm14000_vm1, %v10879_v26  ;;  %v1482_v47 = vrot.slane %v1466_v38, %v10729_v8  ;;  %v1489_v49 = vrot.slane %v9009_v39, %v10729_v8  ;;  %v854_v50 = vcombine.high %v844_v37, %v844_v37  ;;  %v1514_v51 = vcombine.low %v844_v37, %v852_v29 }
  0x57   : > { %v1872_v55 = vrot.slane %v1870_v42, 1  ;;  %9626 = vmatprep.mubr.msk.bf16.mxu0 %vm14000_vm1, %v10900_v48  ;;  %v851_v56 = vrot.slane %v823_v43, %v10729_v8  ;;  %v853_v57 = vcombine.high %v837_v44, %v837_v44  ;;  %v8998_v59 = vpack.c.bf16 %v307_v1, %v307_v1 }
  0x58   : > { %v1497_v60 = vcombine.low %v1475_v34, %v1482_v47  ;;  %v1498_v61 = vcombine.low %v1489_v49, %v1496_v40  ;;  %v1515_v62 = vcombine.low %v854_v50, %v837_v44  ;;  %v1524_v63 = vrot.slane %v1514_v51, %v10729_v8  ;;  %v311_v51 = vld [vmem:[%s10726_s15 + $0xe8] sm:$0x3] }
  0x59   : > { %v1873_v2 = vsel %vm14006_vm2, %v1868_v21, %v1872_v55  ;;  %v1874_v3 = vshrl.u32 %v10949_v35, 16  ;;  %v855_v5 = vcombine.high %v851_v56, %v851_v56  ;;  %v1516_v7 = vcombine.low %v851_v56, %v853_v57 }
  0x5a   : > { %9600 = vmatprep.mubr.msk.bf16.mxu1 %vm14000_vm1, %v1873_v2  ;;  %v1505_v9 = vrot.slane %v1497_v60, %v10729_v8  ;;  %v1512_v10 = vrot.slane %v1498_v61, %v10729_v8  ;;  %v1531_v52 = vrot.slane %v1515_v62, %v10729_v8  ;;  %v877_v11 = vrot.slane %v334_v41, %v10729_v8  ;;  %v313_v2 = vld [vmem:[%s10726_s15 + $0xf8] sm:$0xff] }
  0x5b   : > { %v1517_v14 = vcombine.low %v855_v5, %v869_v45  ;;  %v1538_v15 = vrot.slane %v1516_v7, %v10729_v8  ;;  %v884_v16 = vrot.slane %v8998_v59, %v10729_v8  ;;  %v335_v19 = vpack.c.bf16 %v308_v0, %v308_v0  ;;  %v312_v0 = vld [vmem:[%s10726_s15 + $0xf0] sm:$0xff] }
  0x5c   : > { %v10978_v20 = vld [vmem:[#allocation2 + $0x30] sm:$0xff]  ;;  %v1513_v21 = vcombine.low %v1505_v9, %v1512_v10  ;;  %v1546_v22 = vcombine.low %v1524_v63, %v1531_v52  ;;  %v885_v24 = vcombine.high %v877_v11, %v877_v11  ;;  %v893_v25 = vrot.slane %v877_v11, %v10729_v8 }
  0x5d   : > { %v1876_v23 = vor.u32 %v1874_v3, %v1872_v55  ;;  %v10984_v1 = vshll.u32 %v10978_v20, 16  ;;  %v1545_v27 = vrot.slane %v1517_v14, %v10729_v8  ;;  %v886_v28 = vcombine.high %v884_v16, %v884_v16 }
  0x5e   : > { %9627 = vmatmul.mubr.msk.bf16.gmra.mrb[8].mxu0 %vm14000_vm1, %v10949_v35  ;;  %1805 = vst.msk [vmem:[#allocation2 + $0x38] sm:$0xff] %vm14000_vm1, %v1513_v21  ;;  %v1554_v29 = vrot.slane %v1546_v22, %v10729_v8  ;;  %v900_v32 = vrot.slane %v884_v16, %v10729_v8  ;;  %v907_v33 = vrot.slane %v885_v24, %v10729_v8  ;;  %v11001_v47 = vshrl.u32 %v10978_v20, 16 }
  0x5f   : > { %v336_v34 = vpack.c.bf16 %v310_v18, %v309_v17  ;;  %v1880_v36 = vrot.slane %v10984_v1, 1  ;;  %9630 = vmatprep.mubr.msk.bf16.mxu0 %vm14000_vm1, %v10978_v20  ;;  %v1547_v37 = vcombine.low %v1538_v15, %v1545_v27  ;;  %v914_v38 = vrot.slane %v886_v28, %v10729_v8 }
  0x60   : > { %v925_v39 = vrot.slane %v335_v19, %v10729_v8  ;;  %v1563_v40 = vcombine.low %v893_v25, %v907_v33  ;;  %v9010_v41 = vcombine.high %v893_v25, %v907_v33  ;;  %v8999_v43 = vpack.c.bf16 %v310_v18, %v310_v18 }
  0x61   : > { %v940_v44 = vrot.slane %v336_v34, %v10729_v8  ;;  %v1881_v45 = vsel %vm14006_vm2, %v1876_v23, %v1880_v36  ;;  %v1561_v49 = vrot.slane %v1547_v37, %v10729_v8  ;;  %v1565_v50 = vcombine.low %v900_v32, %v914_v38 }
  0x62   : > { %9601 = vmatmul.mubr.msk.bf16.gmra.mrb[4].mxu1 %vm14000_vm1, %v1881_v45  ;;  %v9011_v55 = vcombine.high %v900_v32, %v914_v38  ;;  %v1573_v56 = vrot.slane %v1563_v40, %v10729_v8  ;;  %v1580_v57 = vrot.slane %v9010_v41, %v10729_v8  ;;  %v932_v59 = vrot.slane %v925_v39, %v10729_v8 }
  0x63   : > { %v1562_v60 = vcombine.low %v1554_v29, %v1561_v49  ;;  %v1587_v61 = vrot.slane %v1565_v50, %v10729_v8  ;;  %v947_v62 = vrot.slane %v8999_v43, %v10729_v8  ;;  %v948_v63 = vcombine.high %v940_v44, %v940_v44 }
  0x64   : > { %v1594_v5 = vrot.slane %v9011_v55, %v10729_v8  ;;  %v1595_v7 = vcombine.low %v1573_v56, %v1580_v57  ;;  %v956_v9 = vrot.slane %v940_v44, %v10729_v8  ;;  %v337_v10 = vpack.c.bf16 %v311_v51, %v311_v51 }
  0x65   : > { %v11015_v52 = vld [vmem:[#allocation2 + $0x38] sm:$0xff]  ;;  %v1884_v11 = vor.u32 %v11001_v47, %v1880_v36  ;;  %1806 = vst.msk [vmem:[#allocation2 + $0x40] sm:$0xff] %vm14000_vm1, %v1562_v60  ;;  %v949_v14 = vcombine.high %v947_v62, %v947_v62  ;;  %v963_v15 = vrot.slane %v947_v62, %v10729_v8  ;;  %v970_v16 = vrot.slane %v948_v63, %v10729_v8 }
  0x66   : > { %v11022_v17 = vshll.u32 %v11015_v52, 16  ;;  %9631 = vmatmul.mubr.msk.bf16.gmra.mrb[12].mxu0 %vm14000_vm1, %v11015_v52  ;;  %v1596_v18 = vcombine.low %v1587_v61, %v1594_v5  ;;  %v1603_v19 = vrot.slane %v1595_v7, %v10729_v8  ;;  %v338_v21 = vpack.c.bf16 %v313_v2, %v312_v0 }
  0x67   : > { %v977_v22 = vrot.slane %v949_v14, %v10729_v8  ;;  %v978_v24 = vcombine.high %v956_v9, %v956_v9  ;;  %v979_v25 = vcombine.high %v963_v15, %v963_v15  ;;  %v980_v23 = vcombine.high %v970_v16, %v970_v16 }
  0x68   : > { %v1888_v27 = vrot.slane %v11022_v17, 1  ;;  %v1610_v28 = vrot.slane %v1596_v18, %v10729_v8  ;;  %v1612_v29 = vcombine.low %v932_v59, %v956_v9  ;;  %v988_v32 = vrot.slane %v337_v10, %v10729_v8 }
  0x69   : > { %v11032_v33 = vshrl.u32 %v11015_v52, 16  ;;  %v1613_v34 = vcombine.low %v970_v16, %v978_v24  ;;  %v1614_v36 = vcombine.low %v980_v23, %v963_v15  ;;  %v1615_v37 = vcombine.low %v977_v22, %v979_v25 }
  0x6a   : > { %v1889_v38 = vsel %vm14006_vm2, %v1884_v11, %v1888_v27  ;;  %v1611_v39 = vcombine.low %v1603_v19, %v1610_v28  ;;  %v1622_v40 = vrot.slane %v1612_v29, %v10729_v8  ;;  %v981_v41 = vcombine.high %v977_v22, %v977_v22 }
  0x6b   : > { %9604 = vmatprep.mubr.msk.bf16.mxu1 %vm14000_vm1, %v1889_v38  ;;  %v1629_v43 = vrot.slane %v1613_v34, %v10729_v8  ;;  %v1636_v44 = vrot.slane %v1614_v36, %v10729_v8  ;;  %v1643_v45 = vrot.slane %v1615_v37, %v10729_v8  ;;  %v995_v49 = vrot.slane %v988_v32, %v10729_v8  ;;  %v314_v37 = vld [vmem:[%s10726_s15 + $0x100] sm:$0x3] }
  0x6c   : > { %v11041_v50 = vld [vmem:[#allocation2 + $0x40] sm:$0xff]  ;;  %1807 = vst.msk [vmem:[#allocation2 + $0x48] sm:$0xff] %vm14000_vm1, %v1611_v39  ;;  %v9000_v51 = vpack.c.bf16 %v313_v2, %v313_v2  ;;  %v1003_v55 = vrot.slane %v338_v21, %v10729_v8  ;;  %v1892_v56 = vor.u32 %v11032_v33, %v1888_v27  ;;  %v315_v39 = vld [vmem:[%s10726_s15 + $0x108] sm:$0xff] }
  0x6d   : > { %v11047_v57 = vshll.u32 %v11041_v50, 16  ;;  %9634 = vmatprep.mubr.msk.bf16.mxu0 %vm14000_vm1, %v11041_v50  ;;  %v1644_v59 = vcombine.low %v1622_v40, %v1629_v43  ;;  %v1645_v60 = vcombine.low %v1636_v44, %v1643_v45  ;;  %v1661_v0 = vcombine.low %v981_v41, %v995_v49  ;;  %v316_v40 = vld [vmem:[%s10726_s15 + $0x110] sm:$0xff] }
  0x6e   : > { %v1010_v61 = vrot.slane %v9000_v51, %v10729_v8  ;;  %v1011_v62 = vcombine.high %v1003_v55, %v1003_v55  ;;  %v1019_v63 = vrot.slane %v1003_v55, %v10729_v8  ;;  %v11057_v9 = vshrl.u32 %v11041_v50, 16 }
  0x6f   : > { %v1896_v2 = vrot.slane %v11047_v57, 1  ;;  %v1652_v5 = vrot.slane %v1644_v59, %v10729_v8  ;;  %v1659_v7 = vrot.slane %v1645_v60, %v10729_v8  ;;  %v1671_v22 = vrot.slane %v1661_v0, %v10729_v8 }
  0x70   : > { %v1012_v10 = vcombine.high %v1010_v61, %v1010_v61  ;;  %v1026_v11 = vrot.slane %v1010_v61, %v10729_v8  ;;  %v1033_v14 = vrot.slane %v1011_v62, %v10729_v8  ;;  %v339_v45 = vpack.c.bf16 %v314_v37, %v314_v37  ;;  %v2249_v61 = vld [vmem:[#allocation2] sm:$0xfe] }
  0x71   : > { %v1897_v15 = vsel %vm14006_vm2, %v1892_v56, %v1896_v2  ;;  %v1660_v16 = vcombine.low %v1652_v5, %v1659_v7  ;;  %v1900_v25 = vor.u32 %v11057_v9, %v1896_v2  ;;  %v340_v55 = vpack.c.bf16 %v316_v40, %v315_v39 }
  0x72   : > { %9605 = vmatmul.mubr.msk.bf16.gmra.mrb[8].mxu1 %vm14000_vm1, %v1897_v15  ;;  %v1040_v18 = vrot.slane %v1012_v10, %v10729_v8  ;;  %v1662_v19 = vcombine.low %v1019_v63, %v1033_v14  ;;  %v9012_v21 = vcombine.high %v1019_v63, %v1033_v14  ;;  %v9001_v56 = vpack.c.bf16 %v316_v40, %v316_v40 }
  0x73   : > { %v11065_v24 = vld [vmem:[#allocation2 + $0x48] sm:$0xff]  ;;  %1808 = vst.msk [vmem:[#allocation2 + $0x50] sm:$0xff] %vm14000_vm1, %v1660_v16  ;;  %v1051_v62 = vrot.slane %v339_v45, %v10729_v8  ;;  %v1066_v2 = vrot.slane %v340_v55, %v10729_v8  ;;  %v2265_v14 = vrot.slane %v2249_v61, 1  ;;  %v11127_v39 = vrot.slane %v10839_v46, 1 }
  0x74   : > { %v11070_v23 = vshll.u32 %v11065_v24, 16  ;;  %9635 = vmatmul.mubr.msk.bf16.gmra.mrb[16].mxu0 %vm14000_vm1, %v11065_v24  ;;  %v1664_v27 = vcombine.low %v1026_v11, %v1040_v18  ;;  %v1678_v28 = vrot.slane %v1662_v19, %v10729_v8  ;;  %v1685_v29 = vrot.slane %v9012_v21, %v10729_v8 }
  0x75   : > { %v11080_v38 = vshrl.u32 %v11065_v24, 16  ;;  %v9013_v63 = vcombine.high %v1026_v11, %v1040_v18  ;;  %v11099_v5 = vrot.slane %v9001_v56, %v10729_v8  ;;  %v1058_v10 = vrot.slane %v1051_v62, %v10729_v8 }
  0x76   : > { %v1904_v32 = vrot.slane %v11070_v23, 1  ;;  %v1692_v34 = vrot.slane %v1664_v27, %v10729_v8  ;;  %v1693_v36 = vcombine.low %v1671_v22, %v1678_v28  ;;  %v1074_v15 = vcombine.high %v1066_v2, %v1066_v2 }
  0x77   : > { %v1082_v16 = vrot.slane %v1066_v2, %v10729_v8  ;;  %v2266_v11 = vrot.slane %v10815_v12, 1  ;;  %v1720_v18 = vrot.slane %v9013_v63, %v10729_v8  ;;  %v2732_v21 = vrot.slane %v1850_v54, 1 }
  0x78   : > { %v1905_v41 = vsel %vm14006_vm2, %v1900_v25, %v1904_v32  ;;  %v1694_v43 = vcombine.low %v1685_v29, %v1692_v34  ;;  %v1701_v44 = vrot.slane %v1693_v36, %v10729_v8  ;;  %v1908_v59 = vor.u32 %v11080_v38, %v1904_v32 }
  0x79   : > { %9608 = vmatprep.mubr.msk.bf16.mxu1 %vm14000_vm1, %v1905_v41  ;;  %v11113_v22 = vrot.slane %v11099_v5, %v10729_v8  ;;  %v1096_v25 = vrot.slane %v1074_v15, %v10729_v8  ;;  %v1104_v27 = vcombine.high %v1082_v16, %v1082_v16  ;;  %v1711_v28 = vcombine.low %v1058_v10, %v1082_v16 }
  0x7a   : > { %v11087_v49 = vld [vmem:[#allocation2 + $0x50] sm:$0xff]  ;;  %v1708_v51 = vrot.slane %v1694_v43, %v10729_v8  ;;  %v2735_v12 = vrot.slane %v1846_v53, 2  ;;  %v2741_v32 = vrot.slane %v1858_v31, 1  ;;  %v2744_v54 = vrot.slane %v1854_v30, 2 }
  0x7b   : > { %v11092_v60 = vshll.u32 %v11087_v49, 16  ;;  %9638 = vmatprep.mubr.msk.bf16.mxu0 %vm14000_vm1, %v11087_v49  ;;  %v11117_v29 = vshrl.u32 %v11087_v49, 16  ;;  %v1106_v34 = vcombine.high %v1096_v25, %v1096_v25  ;;  %v1712_v36 = vcombine.low %v1096_v25, %v1104_v27 }
  0x7c   : > { %v1709_v0 = vcombine.low %v1701_v44, %v1708_v51  ;;  %v1727_v37 = vrot.slane %v1711_v28, %v10729_v8  ;;  %v11129_v40 = vor.u32 %v2735_v12, %v2732_v21  ;;  %v2745_v41 = vor.u32 %v2744_v54, %v2741_v32 }
  0x7d   : > { %v1912_v7 = vrot.slane %v11092_v60, 1  ;;  %v2750_v53 = vrot.slane %v1866_v4, 1  ;;  %v2267_v43 = vsel %vm14005_vm3, %v2265_v14, %v2266_v11  ;;  %v1713_v31 = vcombine.low %v1106_v34, %v11113_v22 }
  0x7e   : > { %1809 = vst.msk [vmem:[#allocation2 + $0x58] sm:$0xff] %vm14000_vm1, %v1709_v0  ;;  %v1742_v44 = vcombine.low %v1720_v18, %v1727_v37  ;;  %v2753_v30 = vrot.slane %v1862_v58, 2  ;;  %v1734_v55 = vrot.slane %v1712_v36, %v10729_v8  ;;  %v11142_v56 = vsel %vm14003_vm4, %v11129_v40, %v2745_v41 }
  0x7f   : > { %v1913_v19 = vsel %vm14006_vm2, %v1908_v59, %v1912_v7  ;;  %v2759_v4 = vrot.slane %v1874_v3, 1  ;;  %v1916_v59 = vor.u32 %v11117_v29, %v1912_v7  ;;  %v2269_v58 = vsel %vm14005_vm3, %v2266_v11, %v11127_v39 }
  0x80   : > { %9609 = vmatmul.mubr.msk.bf16.gmra.mrb[12].mxu1 %vm14000_vm1, %v1913_v19  ;;  %v1741_v63 = vrot.slane %v1713_v31, %v10729_v8  ;;  %v2754_v0 = vor.u32 %v2753_v30, %v2750_v53  ;;  %v2762_v2 = vrot.slane %v1870_v42, 2  ;;  %v2270_v7 = vrot.slane %v10879_v26, 1 }
  0x81   : > { %v1750_v10 = vrot.slane %v1742_v44, %v10729_v8  ;;  %v2768_v14 = vrot.slane %v11001_v47, 1  ;;  %v2771_v11 = vrot.slane %v10984_v1, 2  ;;  %v2777_v25 = vrot.slane %v11032_v33, 1 }
  0x82   : > { %v1743_v15 = vcombine.low %v1734_v55, %v1741_v63  ;;  %v11160_v16 = vsel %vm14003_vm4, %v2745_v41, %v2754_v0  ;;  %v2763_v19 = vor.u32 %v2762_v2, %v2759_v4  ;;  %v2780_v42 = vrot.slane %v11022_v17, 2  ;;  %v9065_v41 = vld [vmem:[%s13995_s1 + $0x8] sm:$0x3] }
  0x83   : > { %v2772_v12 = vor.u32 %v2771_v11, %v2768_v14  ;;  %v2786_v32 = vrot.slane %v11057_v9, 1  ;;  %v2564_v54 = vsel %vm1961_vm0, %v10926_v13, 0  ;;  %v2271_v34 = vsel %vm14005_vm3, %v11127_v39, %v2270_v7 }
  0x84   : > { %v1757_v27 = vrot.slane %v1743_v15, %v10729_v8  ;;  %v11169_v28 = vsel %vm14003_vm4, %v2754_v0, %v2763_v19  ;;  %v2781_v36 = vor.u32 %v2780_v42, %v2777_v25  ;;  %v2789_v37 = vrot.slane %v11047_v57, 2 }
  0x85   : > { %v11137_v45 = vld [vmem:[#allocation2 + $0x58] sm:$0x7]  ;;  %v2272_v44 = vrot.slane %v10900_v48, 1  ;;  %v2274_v30 = vrot.slane %v10949_v35, 1  ;;  %v2280_v63 = vrot.slane %v11041_v50, 1  ;;  %v2282_v0 = vrot.slane %v11065_v24, 1 }
  0x86   : > { %v1824_v51 = vld [vmem:[#allocation2 + $0x58] sm:$0x3]  ;;  %v1918_v61 = vshll.u32 %v11137_v45, 16  ;;  %v1922_v62 = vshrl.u32 %v11137_v45, 16  ;;  %v1758_v53 = vcombine.low %v1750_v10, %v1757_v27  ;;  %v11186_v31 = vsel %vm14003_vm4, %v2772_v12, %v2781_v36 }
  0x87   : > { %9639 = vmatmul.mubr.msk.bf16.gmra.mrb[20].mxu0 %vm14000_vm1, %v1824_v51  ;;  %v11188_v13 = vor.u32 %v2789_v37, %v2786_v32  ;;  %v2273_v55 = vsel %vm14005_vm3, %v2270_v7, %v2272_v44  ;;  %v2275_v4 = vsel %vm14005_vm3, %v2272_v44, %v2274_v30  ;;  %v2284_v7 = vrot.slane %v11087_v49, 1 }
  0x88   : > { %9644 = vmatprep.mubr.msk.bf16.mxu0 %vm14000_vm1, %v2267_v43  ;;  %v1920_v3 = vrot.slane %v1918_v61, 1  ;;  %v11182_v43 = vsel %vm14003_vm4, %v2763_v19, %v2772_v12  ;;  %1810 = vst.msk [vmem:[#allocation2 + $0x60] sm:$0xff] %vm14000_vm1, %v1758_v53  ;;  %v2278_v61 = vrot.slane %v11015_v52, 1  ;;  %v2286_v10 = vrot.slane %v11137_v45, 1  ;;  %v2478_v19 = vld [vmem:[#allocation2 + $0x8] sm:$0xfe] }
  0x89   : > { %v11197_v51 = vsel %vm14003_vm4, %v2781_v36, %v11188_v13  ;;  %v2285_v14 = vsel %vm14005_vm3, %v2282_v0, %v2284_v7  ;;  %v2504_v11 = vrot.slane %v2478_v19, 1  ;;  %v9078_v45 = vld [vmem:[%s13995_s1 + $0xa] sm:$0x3]  ;;  %v2722_v12 = vshrl.u32 %v2478_v19, 16  ;;  %v317_v53 = vld [vmem:[%s10726_s15 + $0x118] sm:$0x3] }
  0x8a   : > { %v1921_v18 = vsel %vm14006_vm2, %v1916_v59, %v1920_v3  ;;  %v1924_v21 = vor.u32 %v1922_v62, %v1920_v3  ;;  %v2276_v59 = vrot.slane %v10978_v20, 1  ;;  %v2281_v2 = vsel %vm14005_vm3, %v2278_v61, %v2280_v63 }
  0x8b   : > { %9612 = vmatprep.mubr.msk.bf16.mxu1 %vm14000_vm1, %v1921_v18  ;;  %v2283_v3 = vsel %vm14005_vm3, %v2280_v63, %v2282_v0  ;;  %v2287_v15 = vsel %vm14005_vm3, %v2284_v7, %v2286_v10  ;;  %v2506_v18 = vsel %vm14005_vm3, %v2504_v11, %v11127_v39  ;;  %v11236_v39 = vld [vmem:[#allocation2 + $0x58] sm:$0xff]  ;;  %v2725_v32 = vshll.u32 %v2478_v19, 16 }
  0x8c   : > { %9613 = vmatmul.mubr.msk.bf16.gmra.mrb[16].mxu1 %vm14000_vm1, %v1924_v21  ;;  %v2277_v62 = vsel %vm14005_vm3, %v2274_v30, %v2276_v59  ;;  %v2865_v21 = vsel %vm1961_vm0, %v9065_v41, 0  ;;  %v2523_v42 = vrot.slane %v11236_v39, 1  ;;  %v2724_v36 = vrot.slane %v2722_v12, 1 }
  0x8d   : > { %v2727_v37 = vrot.slane %v2725_v32, 2  ;;  %v341_v44 = vpack.c.bf16 %v317_v53, %v317_v53  ;;  %v1075_v30 = vcombine.high %v11099_v5, %v11099_v5  ;;  %v3029_v53 = vrot.slane %v10900_v48, 2 }
  0x8e   : > { %v3033_v48 = vrot.slane %v10978_v20, 2  ;;  %v3037_v20 = vrot.slane %v11041_v50, 2 }
  0x8f   : > { %9645 = vmatmul.mubr.msk.bf16.vlgmr.msra.gmra.mrb[0].mxu0 %vm14000_vm1, %v2269_v58  ;;  %v2279_v58 = vsel %vm14005_vm3, %v2276_v59, %v2278_v61  ;;  %v2489_v25 = vld [vmem:[#allocation2 + $0x60] sm:$0x7]  ;;  %v1114_v59 = vrot.slane %v341_v44, %v10729_v8  ;;  %v1105_v61 = vcombine.high %v11113_v22, %v11113_v22 }
  0x90   : > { %9669 = vmatpush3.bf16.msra.mxu0 %v2564_v54  ;;  %9648 = vmatprep.mubr.msk.bf16.mxu0 %vm14000_vm1, %v2271_v34  ;;  %v2525_v27 = vrot.slane %v2489_v25, 1  ;;  %v2524_v54 = vsel %vm14005_vm3, %v2284_v7, %v2523_v42  ;;  %v9091_v7 = vld [vmem:[%s13995_s1 + $0xc] sm:$0x3] }
  0x91   : > { %10333 = vmatprep.subr.msk.bf16.mxu0 %vm1961_vm0, %v9065_v41  ;;  %v2728_v41 = vor.u32 %v2727_v37, %v2724_v36  ;;  %v3025_v36 = vrot.slane %v10839_v46, 2  ;;  %v9104_v46 = vld [vmem:[%s13995_s1 + $0xe] sm:$0x3] }
  0x97   : > { %9649 = vmatmul.mubr.msk.bf16.gmra.mrb[4].mxu0 %vm14000_vm1, %v2273_v55 }
  0x98   : > { %9652 = vmatprep.mubr.msk.bf16.mxu0 %vm14000_vm1, %v2275_v4 }
  0x9f   : > { %9653 = vmatmul.mubr.msk.bf16.gmra.mrb[8].mxu0 %vm14000_vm1, %v2277_v62 }
  0xa0   : > { %9656 = vmatprep.mubr.msk.bf16.mxu0 %vm14000_vm1, %v2279_v58 }
  0xa7   : > { %9657 = vmatmul.mubr.msk.bf16.gmra.mrb[12].mxu0 %vm14000_vm1, %v2281_v2 }
  0xa8   : > { %9660 = vmatprep.mubr.msk.bf16.mxu0 %vm14000_vm1, %v2283_v3 }
  0xaf   : > { %9661 = vmatmul.mubr.msk.bf16.gmra.mrb[16].mxu0 %vm14000_vm1, %v2285_v14 }
  0xb0   : > { %9664 = vmatprep.mubr.msk.bf16.mxu0 %vm14000_vm1, %v2287_v15  ;;  %v11277_v15 = vld [vmem:[#allocation2 + $0x60] sm:$0xf] }
  0xb1   : > { %v2820_v11 = vshrl.u32 %v11277_v15, 16 }
  0xb3   : > { %v2822_v25 = vrot.slane %v2820_v11, 1 }
  0xb7   : > { %9665 = vmatmul.mubr.msk.bf16.gmra.mrb[24].mxu0 %vm14000_vm1, %v2286_v10  ;;  %v2795_v10 = vrot.slane %v11080_v38, 1 }
  0xb8   : > { %9670 = vmatprep.mubr.msk.bf16.mxu0 %vm14000_vm1, %v2506_v18  ;;  %v2823_v18 = vshll.u32 %v11277_v15, 16 }
  0xbf   : > { %9671 = vmatmul.mubr.msk.bf16.vlgmr.msra.gmra.mrb[0].mxu0 %vm14000_vm1, %v2271_v34  ;;  %v2526_v34 = vsel %vm14005_vm3, %v2523_v42, %v2525_v27  ;;  %v2825_v42 = vrot.slane %v2823_v18, 2  ;;  %vm4817_vm3 = vcmask 10240  }
  0xc0   : > { %9695 = vmatpush3.bf16.msra.mxu0 %v2865_v21  ;;  %9674 = vmatprep.mubr.msk.bf16.mxu0 %vm14000_vm1, %v2273_v55  ;;  %v2737_v55 = vsel %vm14003_vm4, %v2728_v41, %v11129_v40  ;;  %v3027_v41 = vrot.slane %v10879_v26, 2  ;;  %v3031_v26 = vrot.slane %v10949_v35, 2  ;;  %v3035_v35 = vrot.slane %v11015_v52, 2 }
  0xc1   : > { %10334 = vmatprep.subr.msk.bf16.mxu0 %vm1961_vm0, %v9078_v45  ;;  %v2826_v12 = vor.u32 %v2825_v42, %v2822_v25  ;;  %v11360_v42 = vld [vmem:[#allocation2 + $0x20] sm:$0xff] }
  0xc2   : > { %v3028_v44 = vsel %vm14004_vm6, %v3025_v36, %v3027_v41 }
  0xc7   : > { %9675 = vmatmul.mubr.msk.bf16.gmra.mrb[4].mxu0 %vm14000_vm1, %v2275_v4  ;;  %v1103_v4 = vrot.slane %v1075_v30, %v10729_v8  ;;  %v3323_v30 = vsel %vm1961_vm0, %v9091_v7, 0 }
  0xc8   : > { %9678 = vmatprep.mubr.msk.bf16.mxu0 %vm14000_vm1, %v2277_v62 }
  0xc9   : > { %v1107_v62 = vcombine.high %v1103_v4, %v1103_v4  ;;  %v1759_v63 = vcombine.low %v1103_v4, %v1105_v61  ;;  %v10637_v4 = vmov 0  }
  0xca   : > { %279 = vst.msk [vmem:[#allocation2 + $0x68] sm:$0xf0] %vm278_vm7, %v10637_v4  ;;  %vm4706_vm7 = vsmask.f32 1280 }
  0xcb   : > { %v1767_v5 = vrot.slane %v1759_v63, %v10729_v8  ;;  %253 = vst.msk [vmem:[#allocation3] sm:$0xf] %vm14007_vm10, %v10637_v4  ;;  %254 = vst.msk [vmem:[#allocation3 + $0x4] sm:$0xf] %vm14007_vm10, %v10637_v4 }
  0xcc   : > { %255 = vst.msk [vmem:[#allocation3 + $0x8] sm:$0xf] %vm14007_vm10, %v10637_v4  ;;  %256 = vst.msk [vmem:[#allocation3 + $0xc] sm:$0xf] %vm14007_vm10, %v10637_v4 }
  0xcd   : > { %257 = vst.msk [vmem:[#allocation3 + $0x10] sm:$0xf] %vm14007_vm10, %v10637_v4  ;;  %258 = vst.msk [vmem:[#allocation3 + $0x14] sm:$0xf] %vm14007_vm10, %v10637_v4 }
  0xce   : > { %259 = vst.msk [vmem:[#allocation3 + $0x18] sm:$0xf] %vm14007_vm10, %v10637_v4  ;;  %260 = vst.msk [vmem:[#allocation3 + $0x1c] sm:$0xf] %vm14007_vm10, %v10637_v4 }
  0xcf   : > { %9679 = vmatmul.mubr.msk.bf16.gmra.mrb[8].mxu0 %vm14000_vm1, %v2279_v58  ;;  %v1121_v58 = vrot.slane %v1114_v59, %v10729_v8  ;;  %v3032_v59 = vsel %vm14004_vm6, %v3029_v53, %v3031_v26  ;;  %261 = vst.msk [vmem:[#allocation3 + $0x20] sm:$0xf] %vm14007_vm10, %v10637_v4  ;;  %262 = vst.msk [vmem:[#allocation3 + $0x24] sm:$0xf] %vm14007_vm10, %v10637_v4 }
  0xd0   : > { %9682 = vmatprep.mubr.msk.bf16.mxu0 %vm14000_vm1, %v2281_v2  ;;  %v3084_v2 = vsel %vm1961_vm0, %v9078_v45, 0  ;;  %263 = vst.msk [vmem:[#allocation3 + $0x28] sm:$0xf] %vm14007_vm10, %v10637_v4  ;;  %264 = vst.msk [vmem:[#allocation3 + $0x2c] sm:$0xf] %vm14007_vm10, %v10637_v4 }
  0xd1   : > { %v1760_v0 = vcombine.low %v1107_v62, %v1121_v58  ;;  %v3034_v62 = vsel %vm14004_vm6, %v3031_v26, %v3033_v48  ;;  %265 = vst.msk [vmem:[#allocation3 + $0x30] sm:$0xf] %vm14007_vm10, %v10637_v4  ;;  %266 = vst.msk [vmem:[#allocation3 + $0x34] sm:$0xf] %vm14007_vm10, %v10637_v4 }
  0xd2   : > { %267 = vst.msk [vmem:[#allocation3 + $0x38] sm:$0xf] %vm14007_vm10, %v10637_v4  ;;  %268 = vst.msk [vmem:[#allocation3 + $0x3c] sm:$0xf] %vm14007_vm10, %v10637_v4 }
  0xd3   : > { %v1774_v40 = vrot.slane %v1760_v0, %v10729_v8  ;;  %269 = vst.msk [vmem:[#allocation3 + $0x40] sm:$0xf] %vm14007_vm10, %v10637_v4  ;;  %270 = vst.msk [vmem:[#allocation3 + $0x44] sm:$0xf] %vm14007_vm10, %v10637_v4 }
  0xd4   : > { %271 = vst.msk [vmem:[#allocation3 + $0x48] sm:$0xf] %vm14007_vm10, %v10637_v4  ;;  %272 = vst.msk [vmem:[#allocation3 + $0x4c] sm:$0xf] %vm14007_vm10, %v10637_v4 }
  0xd5   : > { %273 = vst.msk [vmem:[#allocation3 + $0x50] sm:$0xf] %vm14007_vm10, %v10637_v4  ;;  %274 = vst.msk [vmem:[#allocation3 + $0x54] sm:$0xf] %vm14007_vm10, %v10637_v4 }
  0xd6   : > { %275 = vst.msk [vmem:[#allocation3 + $0x58] sm:$0xf] %vm14007_vm10, %v10637_v4  ;;  %v11555_v4 = vld [vmem:[%s13996_s2] ss:$0 sm:$0xff] }
  0xd7   : > { %9683 = vmatmul.mubr.msk.bf16.gmra.mrb[12].mxu0 %vm14000_vm1, %v2283_v3  ;;  %v1775_v3 = vcombine.low %v1767_v5, %v1774_v40  ;;  %v3036_v5 = vsel %vm14004_vm6, %v3033_v48, %v3035_v35  ;;  %v3038_v40 = vsel %vm14004_vm6, %v3035_v35, %v3037_v20 }
  0xd8   : > { %9686 = vmatprep.mubr.msk.bf16.mxu0 %vm14000_vm1, %v2285_v14  ;;  %v2807_v14 = vrot.slane %v11092_v60, 2 }
  0xd9   : > { %v1782_v22 = vrot.slane %v1775_v3, %v10729_v8  ;;  %v2804_v8 = vrot.slane %v11117_v29, 1  ;;  %v3041_v3 = vrot.slane %v11087_v49, 2 }
  0xdb   : > { %1812 = vst.msk [vmem:[#allocation2 + $0x68] sm:$0xf] %vm1811_vm5, %v1782_v22  ;;  %v2808_v19 = vor.u32 %v2807_v14, %v2804_v8  ;;  %v3043_v8 = vrot.slane %v11236_v39, 2  ;;  %vm4659_vm5 = vcmask 8192  }
  0xdd   : > { %v3044_v11 = vsel %vm14004_vm6, %v3041_v3, %v3043_v8 }
  0xdf   : > { %9687 = vmatmul.mubr.msk.bf16.gmra.mrb[16].mxu0 %vm14000_vm1, %v2524_v54  ;;  %v3018_v54 = vld [vmem:[#allocation2 + $0x8] sm:$0xfc] }
  0xe0   : > { %9690 = vmatprep.mubr.msk.bf16.mxu0 %vm14000_vm1, %v2526_v34  ;;  %v3024_v34 = vrot.slane %v3018_v54, 2 }
  0xe2   : > { %v3026_v37 = vsel %vm14004_vm6, %v3024_v34, %v3025_v36 }
  0xe7   : > { %9691 = vmatmul.mubr.msk.bf16.gmra.mrb[28].mxu0 %vm14000_vm1, %v2525_v27 }
  0xe8   : > { %9696 = vmatprep.mubr.msk.bf16.mxu0 %vm14000_vm1, %v2737_v55  ;;  %v3030_v55 = vsel %vm14004_vm6, %v3027_v41, %v3029_v53  ;;  %v9117_v53 = vld [vmem:[%s13995_s1 + $0x10] sm:$0x3] }
  0xef   : > { %9697 = vmatmul.mubr.msk.bf16.vlgmr.msra.gmra.mrb[0].mxu0 %vm14000_vm1, %v11142_v56  ;;  %v2798_v56 = vrot.slane %v11070_v23, 2 }
  0xf0   : > { %9721 = vmatpush3.bf16.msra.mxu0 %v3084_v2  ;;  %9700 = vmatprep.mubr.msk.bf16.mxu0 %vm14000_vm1, %v11160_v16  ;;  %v3039_v2 = vrot.slane %v11065_v24, 2 }
  0xf1   : > { %10335 = vmatprep.subr.msk.bf16.mxu0 %vm1961_vm0, %v9091_v7  ;;  %v2799_v16 = vor.u32 %v2798_v56, %v2795_v10 }
  0xf2   : > { %v3040_v7 = vsel %vm14004_vm6, %v3037_v20, %v3039_v2  ;;  %v3042_v22 = vsel %vm14004_vm6, %v3039_v2, %v3041_v3 }
  0xf3   : > { %v2800_v21 = vsel %vm14003_vm4, %v11188_v13, %v2799_v16 }
  0xf7   : > { %9701 = vmatmul.mubr.msk.bf16.gmra.mrb[4].mxu0 %vm14000_vm1, %v11169_v28  ;;  %v2811_v28 = vshrl.u32 %v11236_v39, 16 }
  0xf8   : > { %9704 = vmatprep.mubr.msk.bf16.mxu0 %vm14000_vm1, %v11182_v43  ;;  %v2814_v43 = vshll.u32 %v11236_v39, 16 }
  0xf9   : > { %v2813_v45 = vrot.slane %v2811_v28, 1 }
  0xff   : > { %9705 = vmatmul.mubr.msk.bf16.gmra.mrb[8].mxu0 %vm14000_vm1, %v11186_v31  ;;  %v2816_v31 = vrot.slane %v2814_v43, 2 }
 0x100   : > { %9708 = vmatprep.mubr.msk.bf16.mxu0 %vm14000_vm1, %v11197_v51  ;;  %v2809_v51 = vsel %vm14003_vm4, %v2799_v16, %v2808_v19  ;;  %v3045_v16 = vrot.slane %v11277_v15, 2 }
 0x101   : > { %v2817_v27 = vor.u32 %v2816_v31, %v2813_v45  ;;  %v11354_v45 = vld [vmem:[#allocation2 + $0x18] sm:$0xff] }
 0x102   : > { %v3046_v18 = vsel %vm14004_vm6, %v3043_v8, %v3045_v16 }
 0x103   : > { %v2818_v32 = vsel %vm14003_vm4, %v2808_v19, %v2817_v27  ;;  %v2827_v13 = vsel %vm14003_vm4, %v2817_v27, %v2826_v12  ;;  %v11364_v27 = vld [vmem:[#allocation2 + $0x28] sm:$0xff]  ;;  %vm4864_vm4 = vsmask.f32 3328 }
 0x104   : > { %v3268_v34 = vrot.slane %v11364_v27, 2 }
 0x107   : > { %9709 = vmatmul.mubr.msk.bf16.gmra.mrb[12].mxu0 %vm14000_vm1, %v2800_v21  ;;  %v3237_v21 = vld [vmem:[#allocation2 + $0x10] sm:$0xfc] }
 0x108   : > { %9712 = vmatprep.mubr.msk.bf16.mxu0 %vm14000_vm1, %v2809_v51  ;;  %v3263_v31 = vrot.slane %v3237_v21, 2  ;;  %v3264_v51 = vrot.slane %v11354_v45, 2 }
 0x10a   : > { %v3265_v25 = vsel %vm14004_vm6, %v3263_v31, %v3264_v51 }
 0x10f   : > { %9713 = vmatmul.mubr.msk.bf16.gmra.mrb[16].mxu0 %vm14000_vm1, %v2818_v32  ;;  %v3266_v32 = vrot.slane %v11360_v42, 2 }
 0x110   : > { %9716 = vmatprep.mubr.msk.bf16.mxu0 %vm14000_vm1, %v2827_v13 }
 0x111   : > { %v3267_v36 = vsel %vm14004_vm6, %v3264_v51, %v3266_v32  ;;  %v3269_v41 = vsel %vm14004_vm6, %v3266_v32, %v3268_v34  ;;  %v3481_v32 = vshrl.u32 %v3237_v21, 16 }
 0x117   : > { %9717 = vmatmul.mubr.msk.bf16.gmra.mrb[32].mxu0 %vm14000_vm1, %v2826_v12 }
 0x118   : > { %9722 = vmatprep.mubr.msk.bf16.mxu0 %vm14000_vm1, %v3026_v37  ;;  %v3624_v37 = vsel %vm1961_vm0, %v9104_v46, 0 }
 0x11f   : > { %9723 = vmatmul.mubr.msk.bf16.vlgmr.msra.gmra.mrb[0].mxu0 %vm14000_vm1, %v3028_v44 }
 0x120   : > { %9747 = vmatpush3.bf16.msra.mxu0 %v3323_v30  ;;  %9726 = vmatprep.mubr.msk.bf16.mxu0 %vm14000_vm1, %v3030_v55  ;;  %v3271_v30 = vsel %vm14004_vm6, %v3268_v34, %v3033_v48  ;;  %v3484_v34 = vshll.u32 %v3237_v21, 16 }
 0x121   : > { %10336 = vmatprep.subr.msk.bf16.mxu0 %vm1961_vm0, %v9104_v46 }
 0x123   : > { %v11319_v61 = vpop.f32.mrb[0].mxu1 }
 0x124   : > { %v11322_v58 = vpop.f32.mrb[1].mxu1 }
 0x125   : > { %v11324_v63 = vpop.f32.mrb[2].mxu1 }
 0x126   : > { %v11327_v0 = vpop.f32.mrb[3].mxu1 }
 0x127   : > { %9727 = vmatmul.mubr.msk.bf16.gmra.mrb[4].mxu0 %vm14000_vm1, %v3032_v59 }
 0x128   : > { %9730 = vmatprep.mubr.msk.bf16.mxu0 %vm14000_vm1, %v3034_v62 }
 0x12f   : > { %9731 = vmatmul.mubr.msk.bf16.gmra.mrb[8].mxu0 %vm14000_vm1, %v3036_v5 }
 0x130   : > { %9734 = vmatprep.mubr.msk.bf16.mxu0 %vm14000_vm1, %v3038_v40 }
 0x135   : > { %v11340_v10 = vpop.f32.mrb[4].mxu1 }
 0x136   : > { %v11343_v56 = vpop.f32.mrb[5].mxu1 }
 0x137   : > { %9735 = vmatmul.mubr.msk.bf16.gmra.mrb[12].mxu0 %vm14000_vm1, %v3040_v7  ;;  %v11347_v14 = vpop.f32.mrb[6].mxu1 }
 0x138   : > { %9738 = vmatprep.mubr.msk.bf16.mxu0 %vm14000_vm1, %v3042_v22  ;;  %v11350_v19 = vpop.f32.mrb[7].mxu1 }
 0x13f   : > { %9739 = vmatmul.mubr.msk.bf16.gmra.mrb[16].mxu0 %vm14000_vm1, %v3044_v11 }
 0x140   : > { %9742 = vmatprep.mubr.msk.bf16.mxu0 %vm14000_vm1, %v3046_v18 }
 0x145   : > { %v11362_v15 = vpop.f32.mrb[8].mxu1 }
 0x146   : > { %v11367_v12 = vpop.f32.mrb[9].mxu1 }
 0x147   : > { %9743 = vmatmul.mubr.msk.bf16.gmra.mrb[36].mxu0 %vm14000_vm1, %v3045_v16  ;;  %v11371_v13 = vpop.f32.mrb[10].mxu1 }
 0x148   : > { %9748 = vmatprep.mubr.msk.bf16.mxu0 %vm14000_vm1, %v3265_v25  ;;  %v11373_v54 = vpop.f32.mrb[11].mxu1  ;;  %v11404_v25 = vld [vmem:[#allocation2 + $0x60] sm:$0xff] }
 0x14f   : > { %9749 = vmatmul.mubr.msk.bf16.vlgmr.msra.gmra.mrb[0].mxu0 %vm14000_vm1, %v3267_v36  ;;  %v3489_v36 = vshrl.u32 %v11354_v45, 16 }
 0x150   : > { %9773 = vmatpush3.bf16.msra.mxu0 %v3624_v37  ;;  %9752 = vmatprep.mubr.msk.bf16.mxu0 %vm14000_vm1, %v3269_v41  ;;  %v3492_v37 = vshll.u32 %v11354_v45, 16 }
 0x151   : > { %10337 = vmatprep.subr.msk.bf16.mxu0 %vm1961_vm0, %v9117_v53 }
 0x153   : > { %v11385_v44 = vpop.f32.mrb[12].mxu1 }
 0x154   : > { %v11388_v55 = vpop.f32.mrb[13].mxu1 }
 0x155   : > { %v11390_v46 = vpop.f32.mrb[14].mxu1 }
 0x156   : > { %v11393_v26 = vpop.f32.mrb[15].mxu1 }
 0x157   : > { %9753 = vmatmul.mubr.msk.bf16.gmra.mrb[4].mxu0 %vm14000_vm1, %v3271_v30  ;;  %v3483_v30 = vrot.slane %v3481_v32, 2 }
 0x158   : > { %9756 = vmatprep.mubr.msk.bf16.mxu0 %vm14000_vm1, %v3036_v5  ;;  %v3248_v5 = vld [vmem:[#allocation2 + $0x68] sm:$0xf] }
 0x15a   : > { %v9640_v59 = vpop.f32.mrb[20].mxu0 }
 0x15b   : > { %v2235_v62 = vpop.f32.mrb[21].mxu0 }
 0x15c   : > { %v9641_v35 = vpop.f32.mrb[22].mxu0 }
 0x15d   : > { %v2238_v20 = vpop.f32.mrb[23].mxu0  ;;  %v3491_v35 = vrot.slane %v3489_v36, 2 }
 0x15f   : > { %9757 = vmatmul.mubr.msk.bf16.gmra.mrb[8].mxu0 %vm14000_vm1, %v3038_v40  ;;  %v9614_v2 = vpop.f32.mrb[16].mxu1  ;;  %v3282_v40 = vrot.slane %v11404_v25, 2 }
 0x160   : > { %9760 = vmatprep.mubr.msk.bf16.mxu0 %vm14000_vm1, %v3040_v7  ;;  %v11398_v48 = vadd.f32 %v9640_v59, %v9614_v2  ;;  %v2079_v3 = vpop.f32.mrb[17].mxu1  ;;  %v3284_v7 = vrot.slane %v3248_v5, 2 }
 0x161   : > { %v11400_v16 = vadd.f32 %v2235_v62, %v2079_v3  ;;  %v9615_v18 = vpop.f32.mrb[18].mxu1  ;;  %v3283_v41 = vsel %vm14004_vm6, %v3043_v8, %v3282_v40  ;;  %v3486_v62 = vrot.slane %v3484_v34, 3  ;;  %v3507_v3 = vshrl.u32 %v11364_v27, 16 }
 0x162   : > { %v2082_v31 = vpop.f32.mrb[19].mxu1  ;;  %v3285_v59 = vsel %vm14004_vm6, %v3282_v40, %v3284_v7  ;;  %v3510_v8 = vshll.u32 %v11364_v27, 16  ;;  %vm4865_vm6 = vsmask.f32 7440 }
 0x163   : > { %v11402_v51 = vadd.f32 %v2238_v20, %v2082_v31  ;;  %v3494_v20 = vrot.slane %v3492_v37, 3  ;;  %v3487_v21 = vor.u32 %v3486_v62, %v3483_v30  ;;  %v3509_v40 = vrot.slane %v3507_v3, 2 }
 0x164   : > { %v3512_v32 = vrot.slane %v3510_v8, 3  ;;  %v3521_v30 = vrot.slane %v10984_v1, 3  ;;  %v3539_v1 = vrot.slane %v11047_v57, 3 }
 0x165   : > { %v3495_v2 = vor.u32 %v3494_v20, %v3491_v35  ;;  %v3527_v35 = vrot.slane %v11032_v33, 2  ;;  %v3530_v20 = vrot.slane %v11022_v17, 3  ;;  %v3548_v33 = vrot.slane %v11070_v23, 3 }
 0x166   : > { %v3513_v36 = vor.u32 %v3512_v32, %v3509_v40  ;;  %v3563_v32 = vrot.slane %v2811_v28, 2 }
 0x167   : > { %9761 = vmatmul.mubr.msk.bf16.gmra.mrb[12].mxu0 %vm14000_vm1, %v3042_v22  ;;  %v3498_v22 = vshrl.u32 %v11360_v42, 16  ;;  %v3496_v5 = vsel %vm14001_vm8, %v3487_v21, %v3495_v2  ;;  %v3545_v21 = vrot.slane %v11080_v38, 2  ;;  %v3557_v38 = vrot.slane %v11092_v60, 3 }
 0x168   : > { %9764 = vmatprep.mubr.msk.bf16.mxu0 %vm14000_vm1, %v3044_v11  ;;  %v3501_v11 = vshll.u32 %v11360_v42, 16  ;;  %v3570_v60 = vshrl.u32 %v11404_v25, 16 }
 0x169   : > { %v3500_v18 = vrot.slane %v3498_v22, 2  ;;  %v3531_v22 = vor.u32 %v3530_v20, %v3527_v35 }
 0x16a   : > { %v3503_v31 = vrot.slane %v3501_v11, 3 }
 0x16c   : > { %v3504_v34 = vor.u32 %v3503_v31, %v3500_v18 }
 0x16e   : > { %v3505_v37 = vsel %vm14001_vm8, %v3495_v2, %v3504_v34  ;;  %v3514_v62 = vsel %vm14001_vm8, %v3504_v34, %v3513_v36  ;;  %v3549_v2 = vor.u32 %v3548_v33, %v3545_v21  ;;  %v3566_v34 = vrot.slane %v2814_v43, 3 }
 0x16f   : > { %9765 = vmatmul.mubr.msk.bf16.gmra.mrb[16].mxu0 %vm14000_vm1, %v3283_v41  ;;  %v3518_v41 = vrot.slane %v11001_v47, 2  ;;  %v3536_v47 = vrot.slane %v11057_v9, 2  ;;  %v3786_v33 = vrot.slane %v11360_v42, 3  ;;  %v3794_v42 = vrot.slane %v11041_v50, 3 }
 0x170   : > { %9768 = vmatprep.mubr.msk.bf16.mxu0 %vm14000_vm1, %v3285_v59  ;;  %v3843_v59 = vsel %vm1961_vm0, %v9117_v53, 0  ;;  %v3800_v50 = vrot.slane %v11236_v39, 3  ;;  %vm4630_vm0 = vsmask.f32 4368 }
 0x171   : > { %v3540_v17 = vor.u32 %v3539_v1, %v3536_v47  ;;  %v3777_v47 = vld [vmem:[#allocation2 + $0x10] sm:$0xf8] }
 0x172   : > { %v3783_v1 = vrot.slane %v3777_v47, 3 }
 0x173   : > { %v3541_v57 = vsel %vm14001_vm8, %v3531_v22, %v3540_v17  ;;  %v3550_v40 = vsel %vm14001_vm8, %v3540_v17, %v3549_v2  ;;  %v3788_v17 = vrot.slane %v11364_v27, 3  ;;  %v3796_v27 = vrot.slane %v11065_v24, 3 }
 0x177   : > { %9769 = vmatmul.mubr.msk.bf16.gmra.mrb[40].mxu0 %vm14000_vm1, %v3284_v7  ;;  %v3522_v7 = vor.u32 %v3521_v30, %v3518_v41  ;;  %v3572_v30 = vrot.slane %v3570_v60, 2  ;;  %v3797_v60 = vsel %vm14002_vm9, %v3794_v42, %v3796_v27 }
 0x178   : > { %9774 = vmatprep.mubr.msk.bf16.mxu0 %vm14000_vm1, %v3496_v5  ;;  %v3554_v5 = vrot.slane %v11117_v29, 2 }
 0x179   : > { %v3523_v11 = vsel %vm14001_vm8, %v3513_v36, %v3522_v7  ;;  %v3532_v53 = vsel %vm14001_vm8, %v3522_v7, %v3531_v22  ;;  %v11450_v36 = vld [vmem:[#allocation2 + $0x68] sm:$0x1f] }
 0x17a   : > { %v3558_v29 = vor.u32 %v3557_v38, %v3554_v5  ;;  %v3579_v41 = vshrl.u32 %v11450_v36, 16  ;;  %v3582_v28 = vshll.u32 %v11450_v36, 16 }
 0x17c   : > { %v3559_v43 = vsel %vm14001_vm8, %v3549_v2, %v3558_v29  ;;  %v3584_v35 = vrot.slane %v3582_v28, 3 }
 0x17f   : > { %9775 = vmatmul.mubr.msk.bf16.vlgmr.msra.gmra.mrb[0].mxu0 %vm14000_vm1, %v3505_v37  ;;  %v3567_v37 = vor.u32 %v3566_v34, %v3563_v32 }
 0x180   : > { %9799 = vmatpush3.bf16.msra.mxu0 %v3843_v59  ;;  %9778 = vmatprep.mubr.msk.bf16.mxu0 %vm14000_vm1, %v3514_v62  ;;  %v3581_v62 = vrot.slane %v3579_v41, 2 }
 0x181   : > { %v3568_v59 = vsel %vm14001_vm8, %v3558_v29, %v3567_v37 }
 0x182   : > { %v3585_v7 = vor.u32 %v3584_v35, %v3581_v62 }
 0x187   : > { %9779 = vmatmul.mubr.msk.bf16.gmra.mrb[4].mxu0 %vm14000_vm1, %v3523_v11 }
 0x188   : > { %9782 = vmatprep.mubr.msk.bf16.mxu0 %vm14000_vm1, %v3532_v53  ;;  %v3784_v53 = vrot.slane %v11354_v45, 3  ;;  %v10478_v45 = vld [vmem:[#allocation2 + $0x30] sm:$0xff] }
 0x18a   : > { %v9666_v3 = vpop.f32.mrb[24].mxu0  ;;  %v3785_v21 = vsel %vm14002_vm9, %v3783_v1, %v3784_v53  ;;  %v3787_v2 = vsel %vm14002_vm9, %v3784_v53, %v3786_v33 }
 0x18b   : > { %v2477_v8 = vadd.f32 %v9666_v3, %v11398_v48  ;;  %v2441_v18 = vpop.f32.mrb[25].mxu0  ;;  %v3789_v3 = vsel %vm14002_vm9, %v3786_v33, %v3788_v17 }
 0x18c   : > { %v2475_v9 = vadd.f32 %v2441_v18, %v11400_v16  ;;  %v9667_v31 = vpop.f32.mrb[26].mxu0  ;;  %v3573_v16 = vshll.u32 %v11404_v25, 16  ;;  %v3790_v18 = vrot.slane %v10478_v45, 3 }
 0x18d   : > { %v2444_v23 = vpop.f32.mrb[27].mxu0  ;;  %v3792_v31 = vrot.slane %v11015_v52, 3 }
 0x18e   : > { %v2476_v48 = vadd.f32 %v2444_v23, %v11402_v51  ;;  %v3575_v51 = vrot.slane %v3573_v16, 3 }
 0x18f   : > { %9783 = vmatmul.mubr.msk.bf16.gmra.mrb[8].mxu0 %vm14000_vm1, %v3541_v57  ;;  %v3791_v57 = vsel %vm14002_vm9, %v3788_v17, %v3790_v18  ;;  %v3793_v5 = vsel %vm14002_vm9, %v3790_v18, %v3792_v31  ;;  %v3795_v29 = vsel %vm14002_vm9, %v3792_v31, %v3794_v42 }
 0x190   : > { %9786 = vmatprep.mubr.msk.bf16.mxu0 %vm14000_vm1, %v3550_v40  ;;  %v3576_v20 = vor.u32 %v3575_v51, %v3572_v30 }
 0x192   : > { %v3577_v22 = vsel %vm14001_vm8, %v3567_v37, %v3576_v20  ;;  %v3586_v11 = vsel %vm14001_vm8, %v3576_v20, %v3585_v7  ;;  %v3798_v37 = vrot.slane %v11087_v49, 3  ;;  %vm11694_vm8 = vmand %vm4731_vm12, %vm4732_vm13 }
 0x193   : > { %vm11712_vm12 = vmor %vm4629_vm15, %vm4630_vm0  ;;  %vm4890_vm0 = vsmask.f32 7950 }
 0x194   : > { %v3799_v24 = vsel %vm14002_vm9, %v3796_v27, %v3798_v37  ;;  %vm11722_vm13 = vmand %vm4659_vm5, %vm4629_vm15  ;;  %vm4810_vm5 = vcmask 11266  }
 0x197   : > { %9787 = vmatmul.mubr.msk.bf16.gmra.mrb[12].mxu0 %vm14000_vm1, %v3559_v43 }
 0x198   : > { %9790 = vmatprep.mubr.msk.bf16.mxu0 %vm14000_vm1, %v3568_v59 }
 0x19f   : > { %9791 = vmatmul.mubr.msk.bf16.gmra.mrb[16].mxu0 %vm14000_vm1, %v3577_v22 }
 0x1a0   : > { %9794 = vmatprep.mubr.msk.bf16.mxu0 %vm14000_vm1, %v3586_v11 }
 0x1a7   : > { %9795 = vmatmul.mubr.msk.bf16.gmra.mrb[44].mxu0 %vm14000_vm1, %v3585_v7 }
 0x1a8   : > { %9800 = vmatprep.mubr.msk.bf16.mxu0 %vm14000_vm1, %v3785_v21 }
 0x1af   : > { %9801 = vmatmul.mubr.msk.bf16.vlgmr.msra.gmra.mrb[0].mxu0 %vm14000_vm1, %v3787_v2 }
 0x1b0   : > { %9804 = vmatprep.mubr.msk.bf16.mxu0 %vm14000_vm1, %v3789_v3 }
 0x1b7   : > { %9805 = vmatmul.mubr.msk.bf16.gmra.mrb[4].mxu0 %vm14000_vm1, %v3791_v57 }
 0x1b8   : > { %9808 = vmatprep.mubr.msk.bf16.mxu0 %vm14000_vm1, %v3793_v5 }
 0x1ba   : > { %v9692_v38 = vpop.f32.mrb[28].mxu0 }
 0x1bb   : > { %v2716_v23 = vadd.f32 %v9692_v38, %v2477_v8  ;;  %v2680_v40 = vpop.f32.mrb[29].mxu0  ;;  %v3801_v8 = vsel %vm14002_vm9, %v3798_v37, %v3800_v50 }
 0x1bc   : > { %v2714_v32 = vadd.f32 %v2680_v40, %v2475_v9  ;;  %v9693_v34 = vpop.f32.mrb[30].mxu0  ;;  %v3802_v9 = vrot.slane %v11404_v25, 3 }
 0x1bd   : > { %v2683_v52 = vpop.f32.mrb[31].mxu0 }
 0x1be   : > { %v2715_v16 = vadd.f32 %v2683_v52, %v2476_v48  ;;  %v3804_v48 = vrot.slane %v11450_v36, 3  ;;  %v3803_v41 = vsel %vm14002_vm9, %v3800_v50, %v3802_v9 }
 0x1bf   : > { %9809 = vmatmul.mubr.msk.bf16.gmra.mrb[8].mxu0 %vm14000_vm1, %v3795_v29 }
 0x1c0   : > { %9812 = vmatprep.mubr.msk.bf16.mxu0 %vm14000_vm1, %v3797_v60  ;;  %v3805_v28 = vsel %vm14002_vm9, %v3802_v9, %v3804_v48  ;;  %vm11702_vm9 = vmand %vm14007_vm10, %vm4653_vm14  ;;  %vm4889_vm14 = vcmask 11267  }
 0x1c7   : > { %9813 = vmatmul.mubr.msk.bf16.gmra.mrb[12].mxu0 %vm14000_vm1, %v3799_v24 }
 0x1c8   : > { %9816 = vmatprep.mubr.msk.bf16.mxu0 %vm14000_vm1, %v3801_v8 }
 0x1cf   : > { %9817 = vmatmul.mubr.msk.bf16.gmra.mrb[16].mxu0 %vm14000_vm1, %v3803_v41 }
 0x1d0   : > { %9820 = vmatprep.mubr.msk.bf16.mxu0 %vm14000_vm1, %v3805_v28 }
 0x1d7   : > { %9821 = vmatmul.mubr.msk.bf16.gmra.mrb[48].mxu0 %vm14000_vm1, %v3804_v48  ;;  %vm4707_vm1 = vsmask.f32 5392 }
 0x1d8   : > { %vm11740_vm15 = vmor %vm4706_vm7, %vm4707_vm1 }
 0x1d9   : > { %vm11754_vm1 = vmand %vm276_vm11, %vm4706_vm7  ;;  %vm4811_vm7 = vsmask.f32 7946 }
 0x1da   : > { %vm11776_vm11 = vmand %vm4889_vm14, %vm4890_vm0  ;;  %vm4785_vm14 = vsmask.f32 2304  ;;  %vm4786_vm0 = vsmask.f32 6416 }
 0x1db   : > { %vm11857_vm2 = vmand %vm4810_vm5, %vm4811_vm7 }
 0x1dc   : > { %vm11874_vm5 = vmor %vm4864_vm4, %vm4865_vm6  ;;  %vm14058_vm6 = vcmask 11264  }
 0x1dd   : > { %vm11880_vm7 = vmand %vm4817_vm3, %vm4785_vm14 }
 0x1de   : > { %vm14059_vm3 = vmmov %vm14058_vm6 }
 0x1ea   : > { %v9718_v49 = vpop.f32.mrb[32].mxu0 }
 0x1eb   : > { %v3017_v39 = vadd.f32 %v9718_v49, %v2716_v23  ;;  %v2981_v43 = vpop.f32.mrb[33].mxu0 }
 0x1ec   : > { %v3015_v30 = vadd.f32 %v2981_v43, %v2714_v32  ;;  %v9719_v51 = vpop.f32.mrb[34].mxu0 }
 0x1ed   : > { %v2984_v59 = vpop.f32.mrb[35].mxu0 }
 0x1ee   : > { %v3016_v62 = vadd.f32 %v2984_v59, %v2715_v16 }
 0x21a   : > { %v9744_v25 = vpop.f32.mrb[36].mxu0 }
 0x21b   : > { %v3236_v35 = vadd.f32 %v9744_v25, %v3017_v39  ;;  %v3200_v36 = vpop.f32.mrb[37].mxu0 }
 0x21c   : > { %v3234_v20 = vadd.f32 %v3200_v36, %v3015_v30  ;;  %v9745_v7 = vpop.f32.mrb[38].mxu0 }
 0x21d   : > { %v3203_v22 = vpop.f32.mrb[39].mxu0 }
 0x21e   : > { %v3235_v11 = vadd.f32 %v3203_v22, %v3016_v62 }
 0x24a   : > { %v9770_v47 = vpop.f32.mrb[40].mxu0 }
 0x24b   : > { %v3475_v1 = vadd.f32 %v9770_v47, %v3236_v35  ;;  %v3439_v53 = vpop.f32.mrb[41].mxu0 }
 0x24c   : > { %v3473_v21 = vadd.f32 %v3439_v53, %v3234_v20  ;;  %v9771_v33 = vpop.f32.mrb[42].mxu0 }
 0x24d   : > { %v3442_v17 = vpop.f32.mrb[43].mxu0 }
 0x24e   : > { %v3474_v2 = vadd.f32 %v3442_v17, %v3235_v11 }
 0x27a   : > { %v9796_v3 = vpop.f32.mrb[44].mxu0 }
 0x27b   : > { %v11546_v45 = vadd.f32 %v9796_v3, %v3475_v1  ;;  %v3740_v18 = vpop.f32.mrb[45].mxu0 }
 0x27c   : > { %v11548_v31 = vadd.f32 %v3740_v18, %v3473_v21  ;;  %v9797_v57 = vpop.f32.mrb[46].mxu0 }
 0x27d   : > { %v3743_v5 = vpop.f32.mrb[47].mxu0 }
 0x27e   : > { %v11550_v42 = vadd.f32 %v3743_v5, %v3474_v2 }
 0x282   : > { %v9802_v27 = vpop.f32.mrb[0].mxu0 }
 0x283   : > { %v11558_v38 = vadd.f32 %v9802_v27, %v11555_v4  ;;  %v3879_v23 = vpop.f32.mrb[1].mxu0 }
 0x284   : > { %v11561_v40 = vadd.f32 %v11555_v4, %v3879_v23  ;;  %v9803_v32 = vpop.f32.mrb[2].mxu0 }
 0x285   : > { %v9133_v34 = vmul.f32 -1.442695, %v11558_v38  ;;  %v11565_v29 = vadd.f32 %v9803_v32, %v11555_v4  ;;  %v3882_v52 = vpop.f32.mrb[3].mxu0 }
 0x286   : > { %v9131_v60 = vmul.f32 -1.442695, %v11561_v40  ;;  %v11569_v16 = vadd.f32 %v11555_v4, %v3882_v52 }
 0x287   : > { %10386 = vpow2.f32 %v9133_v34  ;;  %v9134_v37 = vmul.f32 -1.442695, %v11565_v29 }
 0x288   : > { %10388 = vpow2.f32 %v9131_v60  ;;  %v9132_v50 = vmul.f32 -1.442695, %v11569_v16 }
 0x289   : > { %10390 = vpow2.f32 %v9134_v37 }
 0x28a   : > { %10392 = vpow2.f32 %v9132_v50  ;;  %v9806_v24 = vpop.f32.mrb[4].mxu0 }
 0x28b   : > { %v10168_v8 = vadd.f32 %v9806_v24, %v11319_v61  ;;  %v3895_v9 = vpop.f32.mrb[5].mxu0 }
 0x28c   : > { %v10169_v48 = vadd.f32 %v3895_v9, %v11322_v58  ;;  %v9807_v41 = vpop.f32.mrb[6].mxu0 }
 0x28d   : > { %v11576_v28 = vadd.f32 %v10168_v8, %v11555_v4  ;;  %v10170_v49 = vadd.f32 %v9807_v41, %v11324_v63  ;;  %v3898_v39 = vpop.f32.mrb[7].mxu0 }
 0x28e   : > { %v11580_v43 = vadd.f32 %v10169_v48, %v11555_v4  ;;  %v10171_v30 = vadd.f32 %v3898_v39, %v11327_v0  ;;  %v10638_v0 = vmov 1983009808  }
 0x28f   : > { %v9137_v51 = vmul.f32 -1.442695, %v11576_v28  ;;  %v11585_v59 = vadd.f32 %v10170_v49, %v11555_v4  ;;  %v4212_v7 = vunpack.c.l.s4 %v10638_v0 }
 0x290   : > { %v9135_v61 = vmul.f32 -1.442695, %v11580_v43  ;;  %v11589_v58 = vadd.f32 %v10171_v30, %v11555_v4 }
 0x291   : > { %v10387_v62 = vpop.eup %10386  ;;  %10394 = vpow2.f32 %v9137_v51  ;;  %v9138_v63 = vmul.f32 -1.442695, %v11585_v59  ;;  %v4213_v34 = vunpack.c.0.s8 %v4212_v7 }
 0x292   : > { %v10389_v25 = vpop.eup %10388  ;;  %v4097_v35 = vadd.f32 1.0, %v10387_v62  ;;  %10396 = vpow2.f32 %v9135_v61  ;;  %v9810_v36 = vpop.f32.mrb[8].mxu0  ;;  %v9136_v21 = vmul.f32 -1.442695, %v11589_v58 }
 0x293   : > { %v10391_v20 = vpop.eup %10390  ;;  %v4095_v22 = vadd.f32 1.0, %v10389_v25  ;;  %10398 = vpow2.f32 %v9138_v63  ;;  %v10172_v11 = vadd.f32 %v9810_v36, %v11340_v10  ;;  %v3911_v47 = vpop.f32.mrb[9].mxu0  ;;  %v11616_v49 = vsub.s32 %v4213_v34, %v10720_v6 }
 0x294   : > { %v10393_v1 = vpop.eup %10392  ;;  %10400 = vrcp.f32 %v4097_v35  ;;  %v4098_v53 = vadd.f32 1.0, %v10391_v20  ;;  %v10173_v33 = vadd.f32 %v3911_v47, %v11343_v56  ;;  %v9811_v17 = vpop.f32.mrb[10].mxu0 }
 0x295   : > { %10402 = vrcp.f32 %v4095_v22  ;;  %v4096_v2 = vadd.f32 1.0, %v10393_v1  ;;  %v11596_v3 = vadd.f32 %v10172_v11, %v11555_v4  ;;  %v10174_v18 = vadd.f32 %v9811_v17, %v11347_v14  ;;  %v3914_v57 = vpop.f32.mrb[11].mxu0 }
 0x296   : > { %10404 = vrcp.f32 %v4098_v53  ;;  %v11600_v10 = vadd.f32 %v10173_v33, %v11555_v4  ;;  %v10175_v5 = vadd.f32 %v3914_v57, %v11350_v19 }
 0x297   : > { %10406 = vrcp.f32 %v4096_v2  ;;  %v9141_v27 = vmul.f32 -1.442695, %v11596_v3  ;;  %v11605_v56 = vadd.f32 %v10174_v18, %v11555_v4 }
 0x298   : > { %v9139_v23 = vmul.f32 -1.442695, %v11600_v10  ;;  %v11609_v32 = vadd.f32 %v10175_v5, %v11555_v4  ;;  %10408 = vpow2.f32 %v9136_v21 }
 0x299   : > { %v9142_v14 = vmul.f32 -1.442695, %v11605_v56  ;;  %10410 = vpow2.f32 %v9141_v27 }
 0x29a   : > { %v9140_v52 = vmul.f32 -1.442695, %v11609_v32  ;;  %v9814_v60 = vpop.f32.mrb[12].mxu0  ;;  %10412 = vpow2.f32 %v9139_v23 }
 0x29b   : > { %v10395_v19 = vpop.eup %10394  ;;  %v10176_v37 = vadd.f32 %v9814_v60, %v11362_v15  ;;  %v3927_v50 = vpop.f32.mrb[13].mxu0  ;;  %10414 = vpow2.f32 %v9142_v14 }
 0x29c   : > { %v10397_v24 = vpop.eup %10396  ;;  %v4101_v8 = vadd.f32 1.0, %v10395_v19  ;;  %v10177_v9 = vadd.f32 %v3927_v50, %v11367_v12  ;;  %v9815_v48 = vpop.f32.mrb[14].mxu0  ;;  %10416 = vpow2.f32 %v9140_v52 }
 0x29d   : > { %v10399_v41 = vpop.eup %10398  ;;  %v4099_v39 = vadd.f32 1.0, %v10397_v24  ;;  %v11619_v30 = vadd.f32 %v9815_v48, %v11371_v13  ;;  %v3930_v51 = vpop.f32.mrb[15].mxu0  ;;  %v11622_v62 = vadd.f32 %v10176_v37, %v11555_v4 }
 0x29e   : > { %v10401_v61 = vpop.eup %10400  ;;  %10418 = vrcp.f32 %v4101_v8  ;;  %v4102_v15 = vadd.f32 1.0, %v10399_v41  ;;  %v11625_v63 = vadd.f32 %v3930_v51, %v11373_v54  ;;  %v11632_v7 = vadd.f32 %v10177_v9, %v11555_v4 }
 0x29f   : > { %v10403_v12 = vpop.eup %10402  ;;  %v4166_v25 = vmul.f32 %v10401_v61, %v11558_v38  ;;  %10420 = vrcp.f32 %v4099_v39  ;;  %v9145_v38 = vmul.f32 -1.442695, %v11622_v62 }
 0x2a0   : > { %v10405_v6 = vpop.eup %10404  ;;  %v4164_v35 = vmul.f32 %v10403_v12, %v11561_v40  ;;  %10422 = vrcp.f32 %v4102_v15  ;;  %v9143_v39 = vmul.f32 -1.442695, %v11632_v7 }
 0x2a1   : > { %v10407_v13 = vpop.eup %10406  ;;  %v4244_v36 = vcombine.high %v4166_v25, %v4166_v25  ;;  %v4251_v20 = vrot.slane %v4166_v25, %v11616_v49  ;;  %v4167_v0 = vmul.f32 %v10405_v6, %v11565_v29  ;;  %10424 = vpow2.f32 %v9145_v38 }
 0x2a2   : > { %v4210_v22 = vcombine.high %v4164_v35, %v4164_v35  ;;  %v4217_v54 = vrot.slane %v4164_v35, %v11616_v49  ;;  %v4165_v11 = vmul.f32 %v10407_v13, %v11569_v16  ;;  %v11637_v47 = vpop.f32.mrb[16].mxu0  ;;  %v11639_v40 = vpop.eup %10408  ;;  %10426 = vpow2.f32 %v9143_v39 }
 0x2a3   : > { %v4258_v1 = vrot.slane %v4244_v36, %v11616_v49  ;;  %v4259_v53 = vcombine.high %v4251_v20, %v4251_v20  ;;  %v4261_v21 = vcombine.high %v4167_v0, %v4167_v0  ;;  %v4268_v29 = vrot.slane %v4167_v0, %v11616_v49  ;;  %v11643_v33 = vpop.f32.mrb[17].mxu0  ;;  %v11645_v17 = vpop.eup %10410 }
 0x2a4   : > { %v4224_v2 = vrot.slane %v4210_v22, %v11616_v49  ;;  %v4225_v18 = vcombine.high %v4217_v54, %v4217_v54  ;;  %v4227_v16 = vcombine.high %v4165_v11, %v4165_v11  ;;  %v4234_v57 = vrot.slane %v4165_v11, %v11616_v49  ;;  %v11649_v5 = vpop.f32.mrb[18].mxu0  ;;  %v11651_v27 = vpop.eup %10412 }
 0x2a5   : > { %v4664_v23 = vcombine.low %v4259_v53, %v4258_v1  ;;  %v4260_v34 = vcombine.high %v4258_v1, %v4258_v1  ;;  %v4275_v14 = vrot.slane %v4261_v21, %v11616_v49  ;;  %v4276_v52 = vcombine.high %v4268_v29, %v4268_v29  ;;  %v11654_v60 = vpop.f32.mrb[19].mxu0  ;;  %v11656_v19 = vpop.eup %10414 }
 0x2a6   : > { %v4226_v37 = vcombine.high %v4224_v2, %v4224_v2  ;;  %v4587_v50 = vcombine.low %v4217_v54, %v4225_v18  ;;  %v4241_v24 = vrot.slane %v4227_v16, %v11616_v49  ;;  %v4242_v8 = vcombine.high %v4234_v57, %v4234_v57  ;;  %v11659_v9 = vpop.eup %10416 }
 0x2a7   : > { %v4672_v48 = vrot.slane %v4664_v23, %v11616_v49  ;;  %v4665_v41 = vcombine.low %v4260_v34, %v4268_v29  ;;  %v4277_v15 = vcombine.high %v4275_v14, %v4275_v14  ;;  %v4681_v36 = vcombine.low %v4276_v52, %v4275_v14 }
 0x2a8   : > { %v10419_v51 = vpop.eup %10418  ;;  %v4588_v61 = vcombine.low %v4224_v2, %v4226_v37  ;;  %v4243_v12 = vcombine.high %v4241_v24, %v4241_v24  ;;  %v4604_v25 = vcombine.low %v4234_v57, %v4242_v8  ;;  %v4595_v35 = vrot.slane %v4587_v50, %v11616_v49 }
 0x2a9   : > { %v10421_v6 = vpop.eup %10420  ;;  %v4679_v13 = vrot.slane %v4665_v41, %v11616_v49  ;;  %v4170_v20 = vmul.f32 %v10419_v51, %v11576_v28  ;;  %v11680_v52 = vadd.f32 %v11619_v30, %v11555_v4  ;;  %v4100_v30 = vadd.f32 1.0, %v11639_v40 }
 0x2aa   : > { %v10423_v0 = vpop.eup %10422  ;;  %v4602_v22 = vrot.slane %v4588_v61, %v11616_v49  ;;  %v4605_v54 = vcombine.low %v4241_v24, %v4243_v12  ;;  %v4612_v11 = vrot.slane %v4604_v25, %v11616_v49  ;;  %v4168_v38 = vmul.f32 %v10421_v6, %v11580_v43  ;;  %v11669_v1 = vpop.f32.mrb[48].mxu0 }
 0x2ab   : > { %v4680_v53 = vcombine.low %v4672_v48, %v4679_v13  ;;  %v4311_v21 = vcombine.high %v4170_v20, %v4170_v20  ;;  %v4318_v29 = vrot.slane %v4170_v20, %v11616_v49  ;;  %v4171_v2 = vmul.f32 %v10423_v0, %v11585_v59  ;;  %v11673_v18 = vpop.f32.mrb[49].mxu0  ;;  %v11689_v6 = vpop.eup %10424 }
 0x2ac   : > { %v4603_v28 = vcombine.low %v4595_v35, %v4602_v22  ;;  %v4619_v16 = vrot.slane %v4605_v54, %v11616_v49  ;;  %v4278_v57 = vcombine.high %v4168_v38, %v4168_v38  ;;  %v4285_v23 = vrot.slane %v4168_v38, %v11616_v49  ;;  %v9823_v34 = vpop.f32.mrb[50].mxu0  ;;  %v4734_v54 = vld [vmem:[#allocation3 + $0x8] sm:$0xe] }
 0x2ad   : > { %v9365_v14 = vpack.c.bf16 %v4680_v53, %v4680_v53  ;;  %v4325_v43 = vrot.slane %v4311_v21, %v11616_v49  ;;  %v11682_v37 = vpop.f32.mrb[51].mxu0  ;;  %v4326_v24 = vcombine.high %v4318_v29, %v4318_v29  ;;  %v4689_v48 = vrot.slane %v4681_v36, %v11616_v49  ;;  %v4655_v53 = vld [vmem:[#allocation3] sm:$0xf] }
 0x2ae   : > { %v9363_v59 = vpack.c.bf16 %v4603_v28, %v4603_v28  ;;  %v4620_v50 = vcombine.low %v4612_v11, %v4619_v16  ;;  %v4682_v8 = vcombine.low %v4277_v15, %v4285_v23  ;;  %v4328_v61 = vcombine.high %v4171_v2, %v4171_v2 }
 0x2af   : > { %v4710_v41 = vshrl.u32 %v9365_v14, 16  ;;  %v4713_v51 = vshll.u32 %v9365_v14, 16  ;;  %v11686_v39 = vrot.slane %v4278_v57, %v11616_v49  ;;  %v4327_v20 = vcombine.high %v4325_v43, %v4325_v43 }
 0x2b0   : > { %v4633_v12 = vshrl.u32 %v9363_v59, 16  ;;  %v9364_v25 = vpack.c.bf16 %v4620_v50, %v4620_v50  ;;  %v4696_v15 = vrot.slane %v4682_v8, %v11616_v49  ;;  %v4636_v0 = vshll.u32 %v9363_v59, 16 }
 0x2b1   : > { %v4712_v35 = vrot.slane %v4710_v41, 6  ;;  %v4715_v13 = vrot.slane %v4713_v51, 7  ;;  %v11698_v38 = vcombine.low %v4318_v29, %v4326_v24  ;;  %v4335_v16 = vrot.slane %v4171_v2, %v11616_v49  ;;  %v4661_v24 = vld [vmem:[#allocation3 + $0x8] sm:$0x1] }
 0x2b2   : > { %v4635_v36 = vrot.slane %v4633_v12, 7  ;;  %v4641_v11 = vshrl.u32 %v9364_v25, 16  ;;  %v4697_v28 = vcombine.low %v4689_v48, %v4696_v15  ;;  %v11708_v57 = vrot.slane %v4328_v61, %v11616_v49 }
 0x2b3   : > { %v4716_v21 = vor.u32 %v4715_v13, %v4712_v35  ;;  %v4644_v14 = vshll.u32 %v9364_v25, 16  ;;  %v4293_v43 = vcombine.high %v11686_v39, %v11686_v39  ;;  %v4343_v48 = vcombine.high %v4335_v16, %v4335_v16  ;;  %v10427_v25 = vpop.eup %10426 }
 0x2b4   : > { %v4638_v23 = vor.u32 %v4636_v0, %v4635_v36  ;;  %v4643_v34 = vrot.slane %v4641_v11, 7  ;;  %v4639_v59 = vrot.slane %v4635_v36, 4  ;;  %v9366_v8 = vpack.c.bf16 %v4697_v28, %v4697_v28 }
 0x2b5   : > { %v4735_v50 = vsel %vm11694_vm8, %v4716_v21, %v4734_v54  ;;  %v4822_v12 = vcombine.low %v4327_v20, %v4335_v16  ;;  %v4823_v15 = vcombine.low %v4343_v48, %v11708_v57  ;;  %10428 = vrcp.f32 %v4100_v30 }
 0x2b6   : > { %v4656_v41 = vsel %vm11702_vm9, %v4638_v23, %v4655_v53  ;;  %4736 = vst [vmem:[#allocation3 + $0x8] sm:$0xe] %v4735_v50  ;;  %v4646_v51 = vor.u32 %v4644_v14, %v4643_v34  ;;  %v4648_v61 = vrot.slane %v4643_v34, 4  ;;  %v4719_v35 = vshrl.u32 %v9366_v8, 16 }
 0x2b7   : > { %4657 = vst [vmem:[#allocation3] sm:$0xf] %v4656_v41  ;;  %v4722_v13 = vshll.u32 %v9366_v8, 16  ;;  %v4830_v54 = vrot.slane %v4822_v12, %v11616_v49  ;;  %v4105_v11 = vadd.f32 1.0, %v11645_v17  ;;  %v4837_v28 = vrot.slane %v4823_v15, %v11616_v49 }
 0x2b8   : > { %v4647_v36 = vsel %vm11712_vm12, %v4639_v59, %v4646_v51  ;;  %v4662_v0 = vsel %vm11722_vm13, %v4648_v61, %v4661_v24  ;;  %v4721_v20 = vrot.slane %v4719_v35, 6  ;;  %v4103_v16 = vadd.f32 1.0, %v11651_v27  ;;  %v4740_v24 = vld [vmem:[#allocation3 + $0x10] sm:$0x3] }
 0x2b9   : > { %4658 = vst.msk [vmem:[#allocation3 + $0x4] sm:$0xf] %vm14007_vm10, %v4647_v36  ;;  %4663 = vst [vmem:[#allocation3 + $0x8] sm:$0x1] %v4662_v0  ;;  %v4724_v53 = vrot.slane %v4722_v13, 7  ;;  %v4717_v30 = vrot.slane %v4716_v21, 4  ;;  %10430 = vrcp.f32 %v4105_v11  ;;  %v11747_v17 = vadd.f32 %v11625_v63, %v11555_v4 }
 0x2ba   : > { %v4106_v34 = vadd.f32 1.0, %v11656_v19  ;;  %v4838_v59 = vcombine.low %v4830_v54, %v4837_v28  ;;  %10432 = vrcp.f32 %v4103_v16  ;;  %v4104_v50 = vadd.f32 1.0, %v11659_v9 }
 0x2bb   : > { %v4725_v14 = vor.u32 %v4724_v53, %v4721_v20  ;;  %v4775_v27 = vrot.slane %v11698_v38, %v11616_v49  ;;  %v11759_v19 = vcombine.low %v11686_v39, %v4293_v43  ;;  %v4109_v63 = vadd.f32 1.0, %v11689_v6 }
 0x2bc   : > { %10434 = vrcp.f32 %v4106_v34  ;;  %v9369_v48 = vpack.c.bf16 %v4838_v59, %v4838_v59  ;;  %v4107_v41 = vadd.f32 1.0, %v10427_v25  ;;  %v9146_v51 = vmul.f32 -1.442695, %v11680_v52 }
 0x2bd   : > { %v4726_v8 = vsel %vm11740_vm15, %v4717_v30, %v4725_v14  ;;  %v4727_v9 = vrot.slane %v4725_v14, 4  ;;  %v10180_v61 = vadd.f32 %v11637_v47, %v11385_v44  ;;  %v10181_v39 = vadd.f32 %v11643_v33, %v11388_v55  ;;  %v4892_v44 = vld [vmem:[#allocation3 + $0x18] sm:$0x8] }
 0x2be   : > { %4737 = vst.msk [vmem:[#allocation3 + $0xc] sm:$0xf] %vm14007_vm10, %v4726_v8  ;;  %v10182_v43 = vadd.f32 %v11649_v5, %v11390_v46  ;;  %v4868_v12 = vshll.u32 %v9369_v48, 16  ;;  %v4871_v35 = vshrl.u32 %v9369_v48, 16  ;;  %10436 = vrcp.f32 %v4104_v50  ;;  %vm11864_vm10 = vmor %vm4785_vm14, %vm4786_vm0 }
 0x2bf   : > { %v4741_v6 = vsel %vm11754_vm1, %v4727_v9, %v4740_v24  ;;  %10438 = vrcp.f32 %v4109_v63  ;;  %v9144_v55 = vmul.f32 -1.442695, %v11747_v17  ;;  %v11782_v47 = vadd.f32 %v10180_v61, %v11555_v4  ;;  %v10429_v33 = vpop.eup %10428  ;;  %vm14060_vm14 = vmmov %vm14059_vm3 }
 0x2c0   : > { %4742 = vst [vmem:[#allocation3 + $0x10] sm:$0x3] %v4741_v6  ;;  %v11785_v46 = vadd.f32 %v10181_v39, %v11555_v4  ;;  %v4870_v5 = vrot.slane %v4868_v12, 5  ;;  %v4873_v13 = vrot.slane %v4871_v35, 4  ;;  %v11788_v15 = vadd.f32 %v10182_v43, %v11555_v4  ;;  %vm11898_vm0 = vmand %vm14060_vm14, %vm4864_vm4 }
 0x2c1   : > { %v10183_v36 = vadd.f32 %v11654_v60, %v11393_v26  ;;  %v4751_v0 = vrot.slane %v11759_v19, %v11616_v49  ;;  %v4169_v54 = vmul.f32 %v10429_v33, %v11589_v58  ;;  %v4344_v11 = vcombine.high %v11708_v57, %v11708_v57  ;;  %vm14063_vm4 = vmmov %vm14059_vm3 }
 0x2c2   : > { %10440 = vrcp.f32 %v4107_v41  ;;  %v4874_v20 = vor.u32 %v4873_v13, %v4870_v5  ;;  %v4893_v53 = vsel %vm11776_vm11, %v4870_v5, %v4892_v44  ;;  %v9149_v28 = vmul.f32 -1.442695, %v11782_v47 }
 0x2c3   : > { %v11802_v16 = vadd.f32 %v11669_v1, %v11546_v45  ;;  %v10431_v26 = vpop.eup %10430  ;;  %4894 = vst [vmem:[#allocation3 + $0x18] sm:$0x8] %v4893_v53  ;;  %v4294_v60 = vcombine.high %v4169_v54, %v4169_v54  ;;  %v4301_v30 = vrot.slane %v4169_v54, %v11616_v49  ;;  %10442 = vpow2.f32 %v9146_v51 }
 0x2c4   : > { %v11807_v58 = vadd.f32 %v11673_v18, %v11548_v31  ;;  %v10433_v57 = vpop.eup %10432  ;;  %v4174_v34 = vmul.f32 %v10431_v26, %v11596_v3  ;;  %10444 = vpow2.f32 %v9144_v55  ;;  %v9147_v14 = vmul.f32 -1.442695, %v11785_v46 }
 0x2c5   : > { %v9150_v59 = vmul.f32 -1.442695, %v11788_v15  ;;  %v4308_v1 = vrot.slane %v4294_v60, %v11616_v49  ;;  %v4309_v50 = vcombine.high %v4301_v30, %v4301_v30  ;;  %v4172_v24 = vmul.f32 %v10433_v57, %v11600_v10 }
 0x2c6   : > { %v10435_v45 = vpop.eup %10434  ;;  %v11815_v19 = vadd.f32 %v10183_v36, %v11555_v4  ;;  %v11817_v63 = vrot.slane %v4874_v20, 4  ;;  %v4378_v31 = vcombine.high %v4174_v34, %v4174_v34  ;;  %v4385_v18 = vrot.slane %v4174_v34, %v11616_v49 }
 0x2c7   : > { %10446 = vpow2.f32 %v9149_v28  ;;  %v4310_v3 = vcombine.high %v4308_v1, %v4308_v1  ;;  %v4744_v8 = vcombine.low %v4301_v30, %v4309_v50  ;;  %v4345_v9 = vcombine.high %v4172_v24, %v4172_v24 }
 0x2c8   : > { %v4352_v48 = vrot.slane %v4172_v24, %v11616_v49  ;;  %v10437_v41 = vpop.eup %10436  ;;  %v4392_v51 = vrot.slane %v4378_v31, %v11616_v49  ;;  %v4393_v10 = vcombine.high %v4385_v18, %v4385_v18  ;;  %v4175_v61 = vmul.f32 %v10435_v45, %v11605_v56 }
 0x2c9   : > { %10448 = vpow2.f32 %v9147_v14  ;;  %v10439_v39 = vpop.eup %10438  ;;  %v4758_v43 = vrot.slane %v4744_v8, %v11616_v49  ;;  %v4760_v6 = vcombine.low %v4308_v1, %v4310_v3  ;;  %v4359_v12 = vrot.slane %v4345_v9, %v11616_v49 }
 0x2ca   : > { %v4360_v35 = vcombine.high %v4352_v48, %v4352_v48  ;;  %v4394_v44 = vcombine.high %v4392_v51, %v4392_v51  ;;  %v4917_v55 = vcombine.low %v4385_v18, %v4393_v10  ;;  %v4839_v33 = vcombine.low %v4344_v11, %v4352_v48 }
 0x2cb   : > { %v11826_v5 = vmul.f32 -1.442695, %v11815_v19  ;;  %v4759_v56 = vcombine.low %v4751_v0, %v4758_v43  ;;  %v4768_v36 = vrot.slane %v4760_v6, %v11616_v49  ;;  %10450 = vpow2.f32 %v9150_v59  ;;  %v4813_v43 = vld [vmem:[#allocation3 + $0x10] sm:$0xc] }
 0x2cc   : > { %v11828_v13 = vpop.eup %10440  ;;  %v4840_v54 = vcombine.low %v4360_v35, %v4359_v12  ;;  %v4918_v20 = vcombine.low %v4392_v51, %v4394_v44  ;;  %v4395_v53 = vcombine.high %v4175_v61, %v4175_v61  ;;  %v11832_v28 = vrot.slane %v4175_v61, %v11616_v49 }
 0x2cd   : > { %v4173_v11 = vmul.f32 %v10437_v41, %v11609_v32  ;;  %v11835_v26 = vpop.eup %10442  ;;  %v4776_v60 = vcombine.low %v4768_v36, %v4775_v27  ;;  %v9367_v30 = vpack.c.bf16 %v4759_v56, %v4759_v56  ;;  %v4847_v0 = vrot.slane %v4839_v33, %v11616_v49 }
 0x2ce   : > { %v4854_v57 = vrot.slane %v4840_v54, %v11616_v49  ;;  %v11842_v34 = vpop.eup %10444  ;;  %v4925_v14 = vrot.slane %v4917_v55, %v11616_v49  ;;  %v4932_v59 = vrot.slane %v4918_v20, %v11616_v49  ;;  %v11850_v18 = vrot.slane %v4395_v53, %v11616_v49 }
 0x2cf   : > { %v4361_v45 = vcombine.high %v4173_v11, %v4173_v11  ;;  %v4368_v32 = vrot.slane %v4173_v11, %v11616_v49  ;;  %v9368_v1 = vpack.c.bf16 %v4776_v60, %v4776_v60  ;;  %v4789_v50 = vshrl.u32 %v9367_v30, 16 }
 0x2d0   : > { %v4792_v24 = vshll.u32 %v9367_v30, 16  ;;  %v4855_v31 = vcombine.low %v4847_v0, %v4854_v57  ;;  %v4933_v27 = vcombine.low %v4925_v14, %v4932_v59  ;;  %v4178_v44 = vmul.f32 %v10439_v39, %v11622_v62 }
 0x2d1   : > { %v11847_v38 = vpop.eup %10446  ;;  %v4375_v3 = vrot.slane %v4361_v45, %v11616_v49  ;;  %v4376_v8 = vcombine.high %v4368_v32, %v4368_v32  ;;  %v4791_v9 = vrot.slane %v4789_v50, 5  ;;  %v4798_v41 = vshrl.u32 %v9368_v1, 16 }
 0x2d2   : > { %v4794_v48 = vrot.slane %v4792_v24, 6  ;;  %v4801_v51 = vshll.u32 %v9368_v1, 16  ;;  %v9372_v6 = vpack.c.bf16 %v4933_v27, %v4933_v27  ;;  %v9370_v12 = vpack.c.bf16 %v4855_v31, %v4855_v31  ;;  %v4966_v27 = vld [vmem:[#allocation3 + $0x2c] sm:$0x1] }
 0x2d3   : > { %v11853_v10 = vpop.eup %10448  ;;  %v4377_v35 = vcombine.high %v4375_v3, %v4375_v3  ;;  %v4800_v33 = vrot.slane %v4798_v41, 5  ;;  %v4900_v36 = vcombine.low %v4368_v32, %v4376_v8  ;;  %v4410_v60 = vcombine.high %v11832_v28, %v11832_v28  ;;  %v4819_v28 = vld [vmem:[#allocation3 + $0x18] sm:$0x7] }
 0x2d4   : > { %v4795_v55 = vor.u32 %v4794_v48, %v4791_v9  ;;  %v4803_v56 = vrot.slane %v4801_v51, 6  ;;  %v4951_v20 = vshrl.u32 %v9372_v6, 16  ;;  %v4877_v53 = vshll.u32 %v9370_v12, 16 }
 0x2d5   : > { %v4881_v11 = vshrl.u32 %v9370_v12, 16  ;;  %v10451_v30 = vpop.eup %10450  ;;  %v4901_v14 = vcombine.low %v4375_v3, %v4377_v35  ;;  %v4445_v50 = vcombine.high %v4178_v44, %v4178_v44  ;;  %v4908_v8 = vrot.slane %v4900_v36, %v11616_v49  ;;  %v4897_v12 = vld [vmem:[#allocation3 + $0x20] sm:$0xf] }
 0x2d6   : > { %v4796_v0 = vrot.slane %v4795_v55, 4  ;;  %v4804_v57 = vor.u32 %v4803_v56, %v4800_v33  ;;  %v4814_v62 = vsel %vm11857_vm2, %v4795_v55, %v4813_v43  ;;  %v4953_v45 = vrot.slane %v4951_v20, 7 }
 0x2d7   : > { %4815 = vst [vmem:[#allocation3 + $0x10] sm:$0xc] %v4814_v62  ;;  %v4879_v32 = vrot.slane %v4877_v53, 5  ;;  %v4883_v1 = vrot.slane %v4881_v11, 4  ;;  %v4915_v3 = vrot.slane %v4901_v14, %v11616_v49  ;;  %10452 = vpow2.f32 %v11826_v5 }
 0x2d8   : > { %v4805_v24 = vsel %vm11864_vm10, %v4796_v0, %v4804_v57  ;;  %v4806_v31 = vrot.slane %v4804_v57, 4  ;;  %v4958_v9 = vrot.slane %v4953_v45, 4  ;;  %v4969_v35 = vcombine.low %v4410_v60, %v11850_v18 }
 0x2d9   : > { %4816 = vst.msk [vmem:[#allocation3 + $0x14] sm:$0xf] %vm14058_vm6, %v4805_v24  ;;  %v4880_v48 = vsel %vm11874_vm5, %v11817_v63, %v4879_v32  ;;  %v4884_v41 = vor.u32 %v4883_v1, %v4879_v32  ;;  %v4916_v55 = vcombine.low %v4908_v8, %v4915_v3  ;;  %v4954_v63 = vshll.u32 %v9372_v6, 16  ;;  %v4962_v1 = vld [vmem:[#allocation3 + $0x24] sm:$0xf]  ;;  %vm14064_vm6 = vmmov %vm14059_vm3 }
 0x2da   : > { %v4820_v51 = vsel %vm11880_vm7, %v4806_v31, %v4819_v28  ;;  %4895 = vst.msk [vmem:[#allocation3 + $0x1c] sm:$0xf] %vm14059_vm3, %v4880_v48  ;;  %v4967_v5 = vsel %vm11722_vm13, %v4958_v9, %v4966_v27  ;;  %v4176_v56 = vmul.f32 %v11828_v13, %v11632_v7  ;;  %v4452_v20 = vrot.slane %v4178_v44, %v11616_v49 }
 0x2db   : > { %4821 = vst [vmem:[#allocation3 + $0x18] sm:$0x7] %v4820_v51  ;;  %v4885_v33 = vrot.slane %v4884_v41, 4  ;;  %4968 = vst [vmem:[#allocation3 + $0x2c] sm:$0x1] %v4967_v5  ;;  %v9371_v36 = vpack.c.bf16 %v4916_v55, %v4916_v55  ;;  %v4459_v53 = vrot.slane %v4445_v50, %v11616_v49  ;;  %v4110_v11 = vadd.f32 1.0, %v11835_v26 }
 0x2dc   : > { %v4411_v6 = vcombine.high %v11850_v18, %v11850_v18  ;;  %v4419_v0 = vrot.slane %v4176_v56, %v11616_v49  ;;  %v4108_v57 = vadd.f32 1.0, %v11842_v34  ;;  %v4977_v7 = vrot.slane %v4969_v35, %v11616_v49 }
 0x2dd   : > { %v4898_v60 = vsel %vm11898_vm0, %v4885_v33, %v4897_v12  ;;  %v4943_v13 = vshrl.u32 %v9371_v36, 16  ;;  %v4956_v62 = vor.u32 %v4954_v63, %v4953_v45  ;;  %v4412_v44 = vcombine.high %v4176_v56, %v4176_v56 }
 0x2de   : > { %4899 = vst [vmem:[#allocation3 + $0x20] sm:$0xf] %v4898_v60  ;;  %v4970_v14 = vcombine.low %v4411_v6, %v4419_v0  ;;  %10454 = vrcp.f32 %v4110_v11  ;;  %v4946_v26 = vshll.u32 %v9371_v36, 16  ;;  %v4113_v32 = vadd.f32 1.0, %v11847_v38 }
 0x2df   : > { %v4945_v28 = vrot.slane %v4943_v13, 7  ;;  %10456 = vrcp.f32 %v4108_v57  ;;  %v4460_v50 = vcombine.high %v4452_v20, %v4452_v20  ;;  %v4461_v18 = vcombine.high %v4459_v53, %v4459_v53 }
 0x2e0   : > { %v4984_v24 = vrot.slane %v4970_v14, %v11616_v49  ;;  %v4111_v34 = vadd.f32 1.0, %v11853_v10  ;;  %10458 = vrcp.f32 %v4113_v32  ;;  %v4114_v8 = vadd.f32 1.0, %v10451_v30 }
 0x2e1   : > { %v4948_v31 = vor.u32 %v4946_v26, %v4945_v28  ;;  %v4949_v27 = vrot.slane %v4945_v28, 4  ;;  %v10453_v45 = vpop.eup %10452  ;;  %v4426_v3 = vrot.slane %v4412_v44, %v11616_v49  ;;  %v4427_v9 = vcombine.high %v4419_v0, %v4419_v0 }
 0x2e2   : > { %v4985_v48 = vcombine.low %v4977_v7, %v4984_v24  ;;  %10460 = vrcp.f32 %v4111_v34  ;;  %v11927_v10 = vadd.f32 %v11555_v4, %v11802_v16  ;;  %v11932_v51 = vadd.f32 %v11555_v4, %v11807_v58 }
 0x2e3   : > { %v4957_v38 = vsel %vm11712_vm12, %v4949_v27, %v4956_v62  ;;  %v4963_v41 = vsel %vm11702_vm9, %v4948_v31, %v4962_v1  ;;  %10462 = vrcp.f32 %v4114_v8  ;;  %v3994_v12 = vadd.f32 %v11682_v37, %v11550_v42 }
 0x2e4   : > { %4964 = vst [vmem:[#allocation3 + $0x24] sm:$0xf] %v4963_v41  ;;  %4965 = vst.msk [vmem:[#allocation3 + $0x28] sm:$0xf] %vm14063_vm4, %v4957_v38  ;;  %v9373_v30 = vpack.c.bf16 %v4985_v48, %v4985_v48  ;;  %v11936_v35 = vcombine.low %v4452_v20, %v4460_v50  ;;  %v5057_v55 = vcombine.low %v4459_v53, %v4461_v18  ;;  %v4112_v63 = vadd.f32 1.0, %v10453_v45 }
 0x2e5   : > { %v9153_v16 = vmul.f32 -1.442695, %v11927_v10  ;;  %v11940_v56 = vadd.f32 %v11555_v4, %v3994_v12  ;;  %v4986_v36 = vcombine.low %v4427_v9, %v4426_v3  ;;  %v9151_v11 = vmul.f32 -1.442695, %v11932_v51  ;;  %v5033_v53 = vld [vmem:[#allocation3 + $0x2c] sm:$0xe] }
 0x2e6   : > { %v5012_v5 = vshrl.u32 %v9373_v30, 16  ;;  %v5015_v33 = vshll.u32 %v9373_v30, 16  ;;  %v5055_v37 = vrot.slane %v11936_v35, %v11616_v49  ;;  %v5065_v20 = vrot.slane %v5057_v55, %v11616_v49 }
 0x2e7   : > { %v9152_v0 = vmul.f32 -1.442695, %v11940_v56  ;;  %10464 = vrcp.f32 %v4112_v63  ;;  %v4428_v13 = vcombine.high %v4426_v3, %v4426_v3  ;;  %v4994_v44 = vrot.slane %v4986_v36, %v11616_v49 }
 0x2e8   : > { %v10455_v60 = vpop.eup %10454  ;;  %v5014_v58 = vrot.slane %v5012_v5, 6  ;;  %v5017_v6 = vrot.slane %v5015_v33, 7  ;;  %10466 = vpow2.f32 %v9153_v16 }
 0x2e9   : > { %v10457_v42 = vpop.eup %10456  ;;  %v4179_v57 = vmul.f32 %v10455_v60, %v11680_v52  ;;  %10468 = vpow2.f32 %v9151_v11 }
 0x2ea   : > { %v11948_v4 = vor.u32 %v5017_v6, %v5014_v58  ;;  %v4177_v7 = vmul.f32 %v10457_v42, %v11747_v17  ;;  %v10459_v62 = vpop.eup %10458  ;;  %10470 = vpow2.f32 %v9152_v0 }
 0x2eb   : > { %v4462_v14 = vcombine.high %v4179_v57, %v4179_v57  ;;  %v4469_v28 = vrot.slane %v4179_v57, %v11616_v49  ;;  %v4182_v24 = vmul.f32 %v10459_v62, %v11782_v47 }
 0x2ec   : > { %v10461_v26 = vpop.eup %10460  ;;  %v5034_v32 = vsel %vm11694_vm8, %v11948_v4, %v5033_v53  ;;  %v4429_v52 = vcombine.high %v4177_v7, %v4177_v7  ;;  %v4436_v1 = vrot.slane %v4177_v7, %v11616_v49  ;;  %v5019_v31 = vrot.slane %v11948_v4, 4 }
 0x2ed   : > { %v10463_v50 = vpop.eup %10462  ;;  %5035 = vst [vmem:[#allocation3 + $0x2c] sm:$0xe] %v5034_v32  ;;  %v4476_v17 = vrot.slane %v4462_v14, %v11616_v49  ;;  %v4477_v18 = vcombine.high %v4469_v28, %v4469_v28  ;;  %v4180_v34 = vmul.f32 %v10461_v26, %v11785_v46  ;;  %v4512_v48 = vcombine.high %v4182_v24, %v4182_v24 }
 0x2ee   : > { %v4443_v27 = vrot.slane %v4429_v52, %v11616_v49  ;;  %v4987_v8 = vcombine.low %v4428_v13, %v4436_v1  ;;  %v4183_v45 = vmul.f32 %v10463_v50, %v11788_v15  ;;  %v4519_v38 = vrot.slane %v4182_v24, %v11616_v49 }
 0x2ef   : > { %v4478_v3 = vcombine.high %v4476_v17, %v4476_v17  ;;  %v5058_v9 = vcombine.low %v4469_v28, %v4477_v18  ;;  %v4479_v12 = vcombine.high %v4180_v34, %v4180_v34  ;;  %v4486_v47 = vrot.slane %v4180_v34, %v11616_v49 }
 0x2f0   : > { %v4444_v41 = vcombine.high %v4443_v27, %v4443_v27  ;;  %v5001_v30 = vrot.slane %v4987_v8, %v11616_v49  ;;  %v4526_v55 = vrot.slane %v4512_v48, %v11616_v49  ;;  %v4527_v63 = vcombine.high %v4519_v38, %v4519_v38 }
 0x2f1   : > { %v5072_v46 = vrot.slane %v5058_v9, %v11616_v49  ;;  %v4529_v5 = vcombine.high %v4183_v45, %v4183_v45  ;;  %v11969_v15 = vrot.slane %v4479_v12, %v11616_v49  ;;  %v4494_v36 = vcombine.high %v4486_v47, %v4486_v47  ;;  %v11971_v11 = vpop.eup %10464 }
 0x2f2   : > { %v5002_v33 = vcombine.low %v4994_v44, %v5001_v30  ;;  %v5040_v16 = vcombine.low %v4443_v27, %v4444_v41  ;;  %v4528_v58 = vcombine.high %v4526_v55, %v4526_v55  ;;  %v5182_v6 = vcombine.low %v4519_v38, %v4527_v63  ;;  %v11973_v42 = vpop.eup %10466 }
 0x2f3   : > { %v5073_v60 = vcombine.low %v5065_v20, %v5072_v46  ;;  %v5111_v0 = vcombine.low %v4478_v3, %v4486_v47  ;;  %v5112_v7 = vcombine.low %v4494_v36, %v11969_v15  ;;  %v4536_v13 = vrot.slane %v4183_v45, %v11616_v49  ;;  %v11978_v62 = vpop.eup %10468  ;;  %v5037_v46 = vld [vmem:[#allocation3 + $0x34] sm:$0x3] }
 0x2f4   : > { %v9374_v53 = vpack.c.bf16 %v5002_v33, %v5002_v33  ;;  %v5048_v57 = vrot.slane %v5040_v16, %v11616_v49  ;;  %v5183_v14 = vcombine.low %v4526_v55, %v4528_v58  ;;  %v5190_v28 = vrot.slane %v5182_v6, %v11616_v49  ;;  %v11982_v26 = vpop.eup %10470  ;;  %v5108_v16 = vld [vmem:[#allocation3 + $0x3c] sm:$0x7] }
 0x2f5   : > { %v9376_v44 = vpack.c.bf16 %v5073_v60, %v5073_v60  ;;  %v5119_v20 = vrot.slane %v5111_v0, %v11616_v49  ;;  %v5126_v50 = vrot.slane %v5112_v7, %v11616_v49  ;;  %v4543_v34 = vrot.slane %v4529_v5, %v11616_v49  ;;  %v5104_v0 = vld [vmem:[#allocation3 + $0x34] sm:$0xc] }
 0x2f6   : > { %v5021_v32 = vshrl.u32 %v9374_v53, 16  ;;  %v5024_v52 = vshll.u32 %v9374_v53, 16  ;;  %v5056_v1 = vcombine.low %v5048_v57, %v5055_v37  ;;  %v5197_v24 = vrot.slane %v5183_v14, %v11616_v49 }
 0x2f7   : > { %v5092_v17 = vshrl.u32 %v9376_v44, 16  ;;  %v5095_v18 = vshll.u32 %v9376_v44, 16  ;;  %v5127_v3 = vcombine.low %v5119_v20, %v5126_v50  ;;  %v4544_v41 = vcombine.high %v4536_v13, %v4536_v13 }
 0x2f8   : > { %v5023_v27 = vrot.slane %v5021_v32, 6  ;;  %v5026_v8 = vrot.slane %v5024_v52, 7  ;;  %v9375_v45 = vpack.c.bf16 %v5056_v1, %v5056_v1  ;;  %v5198_v38 = vcombine.low %v5190_v28, %v5197_v24  ;;  %v5244_v1 = vld [vmem:[#allocation3 + $0x48] sm:$0xf] }
 0x2f9   : > { %v5094_v9 = vrot.slane %v5092_v17, 5  ;;  %v5097_v48 = vrot.slane %v5095_v18, 6  ;;  %v9377_v37 = vpack.c.bf16 %v5127_v3, %v5127_v3  ;;  %v4545_v63 = vcombine.high %v4543_v34, %v4543_v34 }
 0x2fa   : > { %v5027_v30 = vor.u32 %v5026_v8, %v5023_v27  ;;  %v5083_v12 = vshrl.u32 %v9375_v45, 16  ;;  %v5086_v35 = vshll.u32 %v9375_v45, 16  ;;  %v9379_v55 = vpack.c.bf16 %v5198_v38, %v5198_v38 }
 0x2fb   : > { %v5098_v47 = vor.u32 %v5097_v48, %v5094_v9  ;;  %v5199_v33 = vcombine.low %v4536_v13, %v4544_v41  ;;  %v5154_v57 = vshll.u32 %v9377_v37, 16  ;;  %v5175_v13 = vld [vmem:[#allocation3 + $0x3c] sm:$0x8]  ;;  %v5200_v14 = vcombine.low %v4543_v34, %v4545_v63 }
 0x2fc   : > { %v5028_v5 = vsel %vm11740_vm15, %v5019_v31, %v5027_v30  ;;  %v5029_v36 = vrot.slane %v5027_v30, 4  ;;  %v5085_v60 = vrot.slane %v5083_v12, 5  ;;  %v5088_v58 = vrot.slane %v5086_v35, 6 }
 0x2fd   : > { %v5100_v6 = vrot.slane %v5098_v47, 4  ;;  %5036 = vst.msk [vmem:[#allocation3 + $0x30] sm:$0xf] %vm14064_vm6, %v5028_v5  ;;  %v5225_v53 = vshrl.u32 %v9379_v55, 16  ;;  %v5228_v28 = vshll.u32 %v9379_v55, 16  ;;  %v5156_v20 = vrot.slane %v5154_v57, 5 }
 0x2fe   : > { %v5038_v7 = vsel %vm11754_vm1, %v5029_v36, %v5037_v46  ;;  %v5089_v44 = vor.u32 %v5088_v58, %v5085_v60  ;;  %v5207_v50 = vrot.slane %v5199_v33, %v11616_v49  ;;  %v5214_v17 = vrot.slane %v5200_v14, %v11616_v49 }
 0x2ff   : > { %v5109_v4 = vsel %vm11880_vm7, %v5100_v6, %v5108_v16  ;;  %5039 = vst [vmem:[#allocation3 + $0x34] sm:$0x3] %v5038_v7  ;;  %v5227_v31 = vrot.slane %v5225_v53, 7  ;;  %v5176_v59 = vsel %vm11776_vm11, %v5156_v20, %v5175_v13  ;;  %v4181_v24 = vmul.f32 %v11971_v11, %v11815_v19 }
 0x300   : > { %5110 = vst [vmem:[#allocation3 + $0x3c] sm:$0x7] %v5109_v4  ;;  %v5090_v32 = vrot.slane %v5089_v44, 4  ;;  %v5105_v52 = vsel %vm11857_vm2, %v5089_v44, %v5104_v0  ;;  %v5157_v27 = vshrl.u32 %v9377_v37, 16  ;;  %5177 = vst [vmem:[#allocation3 + $0x3c] sm:$0x8] %v5176_v59  ;;  %v5215_v61 = vcombine.low %v5207_v50, %v5214_v17 }
 0x301   : > { %5106 = vst [vmem:[#allocation3 + $0x34] sm:$0xc] %v5105_v52  ;;  %v5230_v18 = vor.u32 %v5228_v28, %v5227_v31  ;;  %v4495_v8 = vcombine.high %v11969_v15, %v11969_v15  ;;  %vm14065_vm2 = vmmov %vm14059_vm3  ;;  %v4496_v3 = vcombine.high %v4181_v24, %v4181_v24  ;;  %v4503_v25 = vrot.slane %v4181_v24, %v11616_v49 }
 0x302   : > { %v5099_v34 = vsel %vm11864_vm10, %v5090_v32, %v5098_v47  ;;  %v4117_v9 = vadd.f32 1.0, %v11973_v42  ;;  %v9380_v19 = vpack.c.bf16 %v5215_v61, %v5215_v61  ;;  %v4115_v54 = vadd.f32 1.0, %v11978_v62  ;;  %v5248_v47 = vld [vmem:[#allocation3 + $0x50] sm:$0x1]  ;;  %vm14066_vm10 = vmmov %vm14065_vm2 }
 0x303   : > { %5107 = vst.msk [vmem:[#allocation3 + $0x38] sm:$0xf] %vm14065_vm2, %v5099_v34  ;;  %v5245_v45 = vsel %vm11702_vm9, %v5230_v18, %v5244_v1  ;;  %v4116_v11 = vadd.f32 1.0, %v11982_v26  ;;  %v4510_v48 = vrot.slane %v4496_v3, %v11616_v49  ;;  %v4511_v38 = vcombine.high %v4503_v25, %v4503_v25  ;;  %vm14068_vm11 = vmmov %vm14065_vm2 }
 0x304   : > { %5246 = vst [vmem:[#allocation3 + $0x48] sm:$0xf] %v5245_v45  ;;  %v5128_v15 = vcombine.low %v4495_v8, %v4503_v25  ;;  %10472 = vrcp.f32 %v4117_v9  ;;  %v5233_v41 = vshrl.u32 %v9380_v19, 16  ;;  %v5159_v30 = vrot.slane %v5157_v27, 4 }
 0x305   : > { %10474 = vrcp.f32 %v4115_v54  ;;  %v5129_v12 = vcombine.low %v4511_v38, %v4510_v48  ;;  %v5236_v42 = vshll.u32 %v9380_v19, 16  ;;  %v5231_v62 = vrot.slane %v5227_v31, 4 }
 0x306   : > { %v5136_v35 = vrot.slane %v5128_v15, %v11616_v49  ;;  %10476 = vrcp.f32 %v4116_v11  ;;  %v5235_v37 = vrot.slane %v5233_v41, 7  ;;  %v5160_v63 = vor.u32 %v5159_v30, %v5156_v20  ;;  %v5179_v20 = vld [vmem:[#allocation3 + $0x44] sm:$0xf] }
 0x307   : > { %v5143_v46 = vrot.slane %v5129_v12, %v11616_v49 }
 0x308   : > { %v5238_v55 = vor.u32 %v5236_v42, %v5235_v37  ;;  %v5240_v26 = vrot.slane %v5235_v37, 4  ;;  %v5161_v58 = vrot.slane %v5160_v63, 4  ;;  %v5315_v42 = vld [vmem:[#allocation3 + $0x50] sm:$0xe] }
 0x309   : > { %v5144_v33 = vcombine.low %v5136_v35, %v5143_v46 }
 0x30a   : > { %v5239_v16 = vsel %vm11712_vm12, %v5231_v62, %v5238_v55  ;;  %v5249_v5 = vsel %vm11722_vm13, %v5240_v26, %v5248_v47  ;;  %vm14067_vm12 = vmmov %vm14065_vm2  ;;  %v5319_v26 = vld [vmem:[#allocation3 + $0x58] sm:$0x3] }
 0x30b   : > { %5247 = vst.msk [vmem:[#allocation3 + $0x4c] sm:$0xf] %vm14066_vm10, %v5239_v16  ;;  %5250 = vst [vmem:[#allocation3 + $0x50] sm:$0x1] %v5249_v5  ;;  %v9378_v36 = vpack.c.bf16 %v5144_v33, %v5144_v33  ;;  %v5326_v5 = vld [vmem:[#allocation3] sm:$0xf] (!%p9174_p7) }
 0x30d   : > { %v5163_v6 = vshll.u32 %v9378_v36, 16  ;;  %v5167_v0 = vshrl.u32 %v9378_v36, 16  ;;  %v5330_v36 = vld [vmem:[#allocation3 + $0x8] sm:$0x1] (!%p9174_p7) }
 0x30e   : > { %v10473_v60 = vpop.eup %10472  ;;  %v5331_v23 = vsel (!%p9174_p7), %vm11722_vm13, 0, %v5330_v36 }
 0x30f   : > { %v10475_v53 = vpop.eup %10474  ;;  %v5165_v7 = vrot.slane %v5163_v6, 5  ;;  %v5169_v44 = vrot.slane %v5167_v0, 4  ;;  %v4186_v32 = vmul.f32 %v10473_v60, %v11927_v10  ;;  %v5327_v60 = vsel (!%p9174_p7), %vm11702_vm9, 0, %v5326_v5  ;;  %5332 = vst [vmem:[#allocation3 + $0x8] sm:$0x1] (!%p9174_p7), %v5331_v23 }
 0x310   : > { %v10477_v57 = vpop.eup %10476  ;;  %v4184_v13 = vmul.f32 %v10475_v53, %v11932_v51  ;;  %5328 = vst [vmem:[#allocation3] sm:$0xf] (!%p9174_p7), %v5327_v60 }
 0x311   : > { %v4185_v29 = vmul.f32 %v10477_v57, %v11940_v56  ;;  %v5166_v14 = vsel %vm11874_vm5, %v5161_v58, %v5165_v7  ;;  %v5170_v4 = vor.u32 %v5169_v44, %v5165_v7  ;;  %v4586_v34 = vrot.slane %v4186_v32, %v11616_v49 }
 0x312   : > { %v4546_v31 = vcombine.high %v4184_v13, %v4184_v13  ;;  %v4553_v28 = vrot.slane %v4184_v13, %v11616_v49  ;;  %5178 = vst.msk [vmem:[#allocation3 + $0x40] sm:$0xf] %vm14067_vm12, %v5166_v14  ;;  %v10639_v58 = vmov (!%p9174_p7), 0   ;;  %vm14069_vm5 = vcmask (!%p9174_p7), 11264  }
 0x313   : > { %v4563_v52 = vcombine.high %v4185_v29, %v4185_v29  ;;  %v4570_v1 = vrot.slane %v4185_v29, %v11616_v49  ;;  %v5171_v50 = vrot.slane %v5170_v4, 4  ;;  %5329 = vst.msk [vmem:[#allocation3 + $0x4] sm:$0xf] (!%p9174_p7), %vm14069_vm5, %v10639_v58 }
 0x314   : > { %v4560_v51 = vrot.slane %v4546_v31, %v11616_v49  ;;  %v4561_v17 = vcombine.high %v4553_v28, %v4553_v28 }
 0x315   : > { %v4577_v56 = vrot.slane %v4563_v52, %v11616_v49  ;;  %v4578_v39 = vcombine.high %v4570_v1, %v4570_v1  ;;  %v5180_v18 = vsel %vm11898_vm0, %v5171_v50, %v5179_v20 }
 0x316   : > { %v5251_v59 = vcombine.low %v4561_v17, %v4560_v51  ;;  %v4562_v24 = vcombine.high %v4560_v51, %v4560_v51  ;;  %5181 = vst [vmem:[#allocation3 + $0x44] sm:$0xf] %v5180_v18 }
 0x317   : > { %v4579_v27 = vcombine.high %v4577_v56, %v4577_v56  ;;  %v5268_v10 = vcombine.low %v4578_v39, %v4577_v56 }
 0x318   : > { %v5252_v61 = vcombine.low %v4562_v24, %v4570_v1  ;;  %v5259_v45 = vrot.slane %v5251_v59, %v11616_v49 }
 0x319   : > { %v5269_v8 = vcombine.low %v4579_v27, %v4586_v34  ;;  %v5276_v25 = vrot.slane %v5268_v10, %v11616_v49 }
 0x31a   : > { %v5266_v3 = vrot.slane %v5252_v61, %v11616_v49 }
 0x31b   : > { %v5283_v9 = vrot.slane %v5269_v8, %v11616_v49 }
 0x31c   : > { %v5267_v19 = vcombine.low %v5259_v45, %v5266_v3 }
 0x31d   : > { %v5284_v43 = vcombine.low %v5276_v25, %v5283_v9 }
 0x31e   : > { %v9381_v54 = vpack.c.bf16 %v5267_v19, %v5267_v19 }
 0x31f   : > { %v9382_v11 = vpack.c.bf16 %v5284_v43, %v5284_v43 }
 0x320   : > { %v5294_v48 = vshrl.u32 %v9381_v54, 16  ;;  %v5297_v38 = vshll.u32 %v9381_v54, 16 }
 0x321   : > { %v5303_v15 = vshrl.u32 %v9382_v11, 16  ;;  %v5306_v41 = vshll.u32 %v9382_v11, 16 }
 0x322   : > { %v5296_v30 = vrot.slane %v5294_v48, 6  ;;  %v5299_v12 = vrot.slane %v5297_v38, 7 }
 0x323   : > { %v5305_v35 = vrot.slane %v5303_v15, 6  ;;  %v5308_v37 = vrot.slane %v5306_v41, 7 }
 0x324   : > { %v5300_v47 = vor.u32 %v5299_v12, %v5296_v30  ;;  %5325 = sbr.rel (%p9174_p7) target bundleno = 811 (0x32b), region = 44 }
 0x325   : > { %v5309_v46 = vor.u32 %v5308_v37, %v5305_v35 }
 0x326   : > { %v5301_v62 = vrot.slane %v5300_v47, 4  ;;  %v5316_v55 = vsel %vm11694_vm8, %v5300_v47, %v5315_v42 }
 0x327   : > { %v5311_v63 = vrot.slane %v5309_v46, 4  ;;  %5317 = vst [vmem:[#allocation3 + $0x50] sm:$0xe] %v5316_v55 }
 0x328   : > { %v5310_v33 = vsel %vm11740_vm15, %v5301_v62, %v5309_v46 }
 0x329   : > { %5318 = vst.msk [vmem:[#allocation3 + $0x54] sm:$0xf] %vm14068_vm11, %v5310_v33  ;;  %v5320_v16 = vsel %vm11754_vm1, %v5311_v63, %v5319_v26 }
 0x32a   : > { %5321 = vst [vmem:[#allocation3 + $0x58] sm:$0x3] %v5320_v16 }
 0x32b PF: > { %s5333_s17 = sadd.s32 8, %s10709_s27 }
 0x32c   : > { %p9175_p8 = scmp.ne.s32.totalorder %s5333_s17, 16 }
 0x32d   : > { %v10640_v40 = vmov (!%p9175_p8), 0   ;;  %vm14070_vm9 = vcmask (!%p9175_p8), 11264  }
 0x32e   : > { %5337 = sbr.rel (%p9175_p8) target bundleno = 821 (0x335), region = 48  ;;  %v5338_v6 = vld [vmem:[#allocation3 + $0x50] sm:$0xe] (!%p9175_p8)  ;;  %5341 = vst.msk [vmem:[#allocation3 + $0x54] sm:$0xf] (!%p9175_p8), %vm14070_vm9, %v10640_v40 }
 0x32f   : > { %v5339_v53 = vsel (!%p9175_p8), %vm11694_vm8, 0, %v5338_v6 }
 0x330   : > { %5340 = vst [vmem:[#allocation3 + $0x50] sm:$0xe] (!%p9175_p8), %v5339_v53 }
 0x331   : > { %v5342_v0 = vld [vmem:[#allocation3 + $0x58] sm:$0x3] (!%p9175_p8) }
 0x332   : > { %v5343_v57 = vsel (!%p9175_p8), %vm11754_vm1, 0, %v5342_v0 }
 0x333   : > { %5344 = vst [vmem:[#allocation3 + $0x58] sm:$0x3] (!%p9175_p8), %v5343_v57 }
 0x335 PF: > { %v9176_v2 = vld [vmem:[%s13997_s3 + $0x1] sm:$0x1]  ;;  %vm5519_vm13 = vcmask 1040384   ;;  %v10641_v7 = vmov 0.0   ;;  %v5345_v44 = vld [vmem:[#allocation3] sm:$0xf] }
 0x336   : > { %9824 = vmatprep.subr.bf16.mxu1 %v10641_v7  ;;  %v5521_v22 = vsel %vm5519_vm13, %v9176_v2, 0  ;;  %v12067_v13 = vld [vmem:[#allocation3 + $0x8] sm:$0xff]   ;;  %10052 = vmatprep.subr.bf16.mxu0 %v10641_v7  ;;  %vm10642_vm8 = vmmov 0   ;;  %v12072_v21 = vld [vmem:[#allocation3 + $0x4] sm:$0xf]  ;;  %v12083_v28 = vld [vmem:[#allocation3 + $0x10] sm:$0xff]  }
 0x337   : > { %9825 = vmatpush3.bf16.msra.mxu1 %v5521_v22  ;;  %9826 = vmatprep.mubr.msk.bf16.mxu1 %vm10642_vm8, %v10641_v7  ;;  %v12076_v29 = vcombine.low %v5345_v44, %v12072_v21  ;;  %v5423_v14 = vshll.u32 %v12067_v13, 16  ;;  %v5363_v52 = vld [vmem:[%s13997_s3] sm:$0x1]  ;;  %vm5491_vm15 = vcmask 15360   ;;  %v5427_v50 = vshrl.u32 %v12067_v13, 16  ;;  %v12093_v39 = vld [vmem:[#allocation3 + $0x18] sm:$0xff]  }
 0x338   : > { %9862 = vmatprep.subr.bf16.mxu1 %v10641_v7  ;;  %10054 = vmatprep.mubr.msk.bf16.mxu0 %vm10642_vm8, %v10641_v7  ;;  %v5431_v51 = vshll.u32 %v12083_v28, 16  ;;  %v5647_v17 = vsel %vm5519_vm13, %v5363_v52, 0  ;;  %vm14071_vm1 = vsmask.f32 7424  ;;  %v5435_v24 = vshrl.u32 %v12083_v28, 16  ;;  %v12101_v10 = vld [vmem:[#allocation3 + $0x20] sm:$0xff]  }
 0x339   : > { %v5416_v4 = vshrl.u32 %v12076_v29, 16  ;;  %v5418_v31 = vshll.u32 %v12076_v29, 16  ;;  %v5425_v32 = vrot.slane %v5423_v14, 1  ;;  %v5439_v34 = vshll.u32 %v12093_v39, 16  ;;  %vm14072_vm7 = vmmov %vm14071_vm1  ;;  %v12112_v43 = vld [vmem:[#allocation3 + $0x28] sm:$0xff]   ;;  %v12120_v41 = vld [vmem:[#allocation3 + $0x30] sm:$0xff]  }
 0x33a   : > { %v5433_v59 = vrot.slane %v5431_v51, 1  ;;  %v5443_v45 = vshrl.u32 %v12093_v39, 16  ;;  %v5447_v3 = vshll.u32 %v12101_v10, 16  ;;  %vm14073_vm3 = vmmov %vm14071_vm1  ;;  %v5451_v11 = vshrl.u32 %v12101_v10, 16  ;;  %v12128_v47 = vld [vmem:[#allocation3 + $0x38] sm:$0xff]   ;;  %v12136_v33 = vld [vmem:[#allocation3 + $0x40] sm:$0xff]  }
 0x33b   : > { %v5420_v20 = vrot.slane %v5418_v31, 1  ;;  %v5429_v18 = vor.u32 %v5427_v50, %v5425_v32  ;;  %v5441_v8 = vrot.slane %v5439_v34, 1  ;;  %vm14074_vm14 = vmmov %vm14071_vm1  ;;  %v5455_v48 = vshll.u32 %v12112_v43, 16  ;;  %v12144_v23 = vld [vmem:[#allocation3 + $0x48] ss:$0 sps:$4 sm:$0x11]  }
 0x33c   : > { %v5437_v61 = vor.u32 %v5435_v24, %v5433_v59  ;;  %v5449_v19 = vrot.slane %v5447_v3, 1  ;;  %vm14075_vm0 = vmmov %vm14071_vm1  ;;  %v5459_v12 = vshrl.u32 %v12112_v43, 16  ;;  %v5463_v35 = vshll.u32 %v12120_v41, 16  ;;  %v9205_v22 = vld [vmem:[%s13997_s3 + $0x2] sm:$0x1] }
 0x33d   : > { %v5421_v1 = vor.u32 %v5420_v20, %v5416_v4  ;;  %v5434_v27 = vsel %vm14072_vm7, %v5429_v18, %v5433_v59  ;;  %v5445_v9 = vor.u32 %v5443_v45, %v5441_v8  ;;  %v5457_v15 = vrot.slane %v5455_v48, 1  ;;  %vm14076_vm4 = vmmov %vm14075_vm0  ;;  %v9216_v20 = vld [vmem:[%s13997_s3 + $0x3] sm:$0x1] }
 0x33e   : > { %v5442_v25 = vsel %vm14073_vm3, %v5437_v61, %v5441_v8  ;;  %v5453_v38 = vor.u32 %v5451_v11, %v5449_v19  ;;  %v5465_v42 = vrot.slane %v5463_v35, 1  ;;  %v5467_v62 = vshrl.u32 %v12120_v41, 16  ;;  %vm14077_vm6 = vmmov %vm14075_vm0  ;;  %v5932_v61 = vld [vmem:[#allocation3 + $0x8] sm:$0xe]  ;;  %v12244_v8 = vld [vmem:[#allocation3 + $0xc] sm:$0xf] }
 0x33f   : > { %v5426_v56 = vsel %vm14071_vm1, %v5421_v1, %v5425_v32  ;;  %v5450_v54 = vsel %vm14074_vm14, %v5445_v9, %v5449_v19  ;;  %v5461_v37 = vor.u32 %v5459_v12, %v5457_v15  ;;  %v5471_v55 = vshll.u32 %v12128_v47, 16  ;;  %vm14078_vm2 = vmmov %vm14075_vm0 }
 0x340   : > { %9827 = vmatmul.mubr.msk.bf16.vlgmr.msra.gmra.mrb[20].mxu1 %vm5491_vm15, %v5426_v56  ;;  %v5458_v30 = vsel %vm14075_vm0, %v5453_v38, %v5457_v15  ;;  %v5469_v26 = vor.u32 %v5467_v62, %v5465_v42  ;;  %v5475_v5 = vshrl.u32 %v12128_v47, 16  ;;  %v5479_v36 = vshll.u32 %v12136_v33, 16  ;;  %vm14079_vm10 = vmmov %vm14075_vm0  ;;  %v12265_v15 = vld [vmem:[#allocation3 + $0x18] sm:$0xff]  }
 0x341   : > { %9863 = vmatpush3.bf16.msra.mxu1 %v5647_v17  ;;  %9830 = vmatprep.mubr.msk.bf16.mxu1 %vm10642_vm8, %v10641_v7  ;;  %v5466_v46 = vsel %vm14076_vm4, %v5461_v37, %v5465_v42  ;;  %v5473_v63 = vrot.slane %v5471_v55, 1  ;;  %v5483_v0 = vshrl.u32 %v12136_v33, 16  ;;  %v5487_v53 = vshll.u32 %v12144_v23, 16 }
 0x342   : > { %9900 = vmatprep.subr.bf16.mxu1 %v10641_v7  ;;  %v5481_v58 = vrot.slane %v5479_v36, 1  ;;  %v5807_v44 = vsel %vm5519_vm13, %v9205_v22, 0  ;;  %v5761_v31 = vrot.slane %v12067_v13, 1  ;;  %vm14080_vm12 = vcmask 1046528  }
 0x343   : > { %v5474_v16 = vsel %vm14077_vm6, %v5469_v26, %v5473_v63  ;;  %v5477_v60 = vor.u32 %v5475_v5, %v5473_v63  ;;  %v5489_v57 = vrot.slane %v5487_v53, 1  ;;  %v6048_v52 = vsel %vm5519_vm13, %v9216_v20, 0  ;;  %vm14081_vm11 = vmmov %vm14080_vm12  ;;  %v6599_v26 = vld [vmem:[#allocation3 + $0x10] sm:$0xc]  ;;  %v12284_v63 = vld [vmem:[#allocation3 + $0x14] sm:$0xf] }
 0x344   : > { %v5485_v40 = vor.u32 %v5483_v0, %v5481_v58  ;;  %v5765_v1 = vrot.slane %v12093_v39, 1  ;;  %vm14082_vm5 = vmmov %vm14081_vm11  ;;  %v5769_v17 = vrot.slane %v12112_v43, 1  ;;  %v5773_v59 = vrot.slane %v12128_v47, 1  ;;  %v12292_v5 = vld [vmem:[#allocation3 + $0x18] sm:$0xff]  }
 0x345   : > { %v5482_v6 = vsel %vm14078_vm2, %v5477_v60, %v5481_v58  ;;  %vm14083_vm9 = vmmov %vm14082_vm5  ;;  %v5775_v34 = vrot.slane %v12136_v33, 1  ;;  %v12248_v3 = vcombine.low %v5932_v61, %v12244_v8  ;;  %v6004_v12 = vrot.slane %v12265_v15, 1 }
 0x346   : > { %v5490_v2 = vsel %vm14079_vm10, %v5485_v40, %v5489_v57  ;;  %vm14084_vm1 = vmmov %vm14082_vm5  ;;  %v12302_v40 = vld [vmem:[#allocation3 + $0x28] sm:$0xff]   ;;  %vm14092_vm10 = vcmask 1045504  }
 0x347   : > { %vm14085_vm7 = vmmov %vm14084_vm1  ;;  %v6001_v9 = vrot.slane %v12248_v3, 1  ;;  %v6008_v22 = vrot.slane %v12302_v40, 1 }
 0x348   : > { %9831 = vmatmul.mubr.msk.bf16.gmra.mrb[24].mxu1 %vm5491_vm15, %v5434_v27  ;;  %vm14086_vm3 = vmmov %vm14084_vm1 }
 0x349   : > { %9834 = vmatprep.mubr.msk.bf16.mxu1 %vm10642_vm8, %v10641_v7  ;;  %vm14087_vm14 = vmmov %vm14084_vm1 }
 0x34a   : > { %v5776_v27 = vsel %vm14087_vm14, %v5773_v59, %v5775_v34  ;;  %vm14088_vm0 = vmmov %vm14084_vm1 }
 0x34b   : > { %vm14089_vm4 = vmmov %vm14088_vm0 }
 0x34c   : > { %vm14090_vm6 = vmmov %vm14088_vm0 }
 0x34d   : > { %vm14091_vm2 = vmmov %vm14088_vm0 }
 0x350   : > { %9835 = vmatmul.mubr.msk.bf16.gmra.mrb[28].mxu1 %vm5491_vm15, %v5442_v25  ;;  %v12250_v25 = vld [vmem:[#allocation3 + $0x10] sm:$0xff]  }
 0x351   : > { %9838 = vmatprep.mubr.msk.bf16.mxu1 %vm10642_vm8, %v10641_v7  ;;  %v6002_v19 = vrot.slane %v12250_v25, 1 }
 0x353   : > { %v6003_v38 = vsel %vm14089_vm4, %v6001_v9, %v6002_v19 }
 0x358   : > { %9839 = vmatmul.mubr.msk.bf16.gmra.mrb[32].mxu1 %vm5491_vm15, %v5450_v54  ;;  %v9236_v54 = vld [vmem:[%s13997_s3 + $0x4] sm:$0x1] }
 0x359   : > { %9842 = vmatprep.mubr.msk.bf16.mxu1 %vm10642_vm8, %v10641_v7 }
 0x360   : > { %9843 = vmatmul.mubr.msk.bf16.gmra.mrb[36].mxu1 %vm5491_vm15, %v5458_v30  ;;  %v6296_v30 = vsel %vm5519_vm13, %v9236_v54, 0 }
 0x361   : > { %9846 = vmatprep.mubr.msk.bf16.mxu1 %vm10642_vm8, %v10641_v7 }
 0x368   : > { %9847 = vmatmul.mubr.msk.bf16.gmra.mrb[40].mxu1 %vm5491_vm15, %v5466_v46  ;;  %v12278_v46 = vld [vmem:[#allocation3 + $0x20] sm:$0xff]  }
 0x369   : > { %9850 = vmatprep.mubr.msk.bf16.mxu1 %vm10642_vm8, %v10641_v7  ;;  %v6006_v55 = vrot.slane %v12278_v46, 1 }
 0x36b   : > { %v6007_v53 = vsel %vm14091_vm2, %v6004_v12, %v6006_v55 }
 0x370   : > { %9851 = vmatmul.mubr.msk.bf16.gmra.mrb[44].mxu1 %vm5491_vm15, %v5474_v16  ;;  %v12290_v16 = vcombine.low %v6599_v26, %v12284_v63 }
 0x371   : > { %9854 = vmatprep.mubr.msk.bf16.mxu1 %vm10642_vm8, %v10641_v7 }
 0x378   : > { %9855 = vmatmul.mubr.msk.bf16.gmra.mrb[48].mxu1 %vm5491_vm15, %v5482_v6  ;;  %v6669_v6 = vrot.slane %v12292_v5, 2 }
 0x379   : > { %9858 = vmatprep.mubr.msk.bf16.mxu1 %vm10642_vm8, %v10641_v7 }
 0x380   : > { %9859 = vmatmul.mubr.msk.bf16.gmra.mrb[52].mxu1 %vm5491_vm15, %v5490_v2 }
 0x381   : > { %9864 = vmatprep.mubr.msk.bf16.mxu1 %vm10642_vm8, %v10641_v7 }
 0x388   : > { %9865 = vmatmul.mubr.msk.bf16.vlgmr.msra.gmra.mrb[56].mxu1 %vm5491_vm15, %v12076_v29  ;;  %v5754_v29 = vld [vmem:[#allocation3] sm:$0xe] }
 0x389   : > { %9901 = vmatpush3.bf16.msra.mxu1 %v5807_v44  ;;  %9868 = vmatprep.mubr.msk.bf16.mxu1 %vm10642_vm8, %v10641_v7  ;;  %v9206_v14 = vcombine.low %v5754_v29, %v12072_v21  ;;  %v5763_v21 = vrot.slane %v12083_v28, 1  ;;  %v9289_v44 = vld [vmem:[%s13997_s3 + $0x8] sm:$0x1] }
 0x38a   : > { %9938 = vmatprep.subr.bf16.mxu1 %v10641_v7  ;;  %v7141_v29 = vsel %vm5519_vm13, %v9289_v44, 0 }
 0x38b   : > { %v5760_v4 = vrot.slane %v9206_v14, 1  ;;  %v5766_v50 = vsel %vm14082_vm5, %v5763_v21, %v5765_v1  ;;  %v12317_v14 = vld [vmem:[#allocation3 + $0x20] sm:$0xff]   ;;  %vm14095_vm5 = vmmov %vm14088_vm0 }
 0x38c   : > { %v6671_v20 = vrot.slane %v12317_v14, 2 }
 0x38d   : > { %v5762_v32 = vsel %vm14080_vm12, %v5760_v4, %v5761_v31  ;;  %vm14093_vm12 = vmmov %vm14088_vm0 }
 0x390   : > { %9869 = vmatmul.mubr.msk.bf16.gmra.mrb[60].mxu1 %vm5491_vm15, %v12067_v13  ;;  %v5764_v13 = vsel %vm14081_vm11, %v5761_v31, %v5763_v21  ;;  %v12325_v21 = vld [vmem:[#allocation3 + $0x30] sm:$0xff]   ;;  %vm14094_vm11 = vmmov %vm14092_vm10 }
 0x391   : > { %9872 = vmatprep.mubr.msk.bf16.mxu1 %vm10642_vm8, %v10641_v7 }
 0x398   : > { %9873 = vmatmul.mubr.msk.bf16.gmra.mrb[64].mxu1 %vm5491_vm15, %v12083_v28  ;;  %v5767_v28 = vrot.slane %v12101_v10, 1 }
 0x399   : > { %9876 = vmatprep.mubr.msk.bf16.mxu1 %vm10642_vm8, %v10641_v7 }
 0x39a   : > { %v5768_v51 = vsel %vm14083_vm9, %v5765_v1, %v5767_v28  ;;  %v5770_v56 = vsel %vm14084_vm1, %v5767_v28, %v5769_v17  ;;  %v6672_v1 = vsel %vm14094_vm11, %v6669_v6, %v6671_v20  ;;  %v12335_v28 = vld [vmem:[#allocation3 + $0x28] sm:$0xff]   ;;  %vm14096_vm9 = vmmov %vm14092_vm10 }
 0x39b   : > { %vm14097_vm1 = vmmov %vm14088_vm0 }
 0x3a0   : > { %9877 = vmatmul.mubr.msk.bf16.gmra.mrb[68].mxu1 %vm5491_vm15, %v12093_v39  ;;  %v5771_v39 = vrot.slane %v12120_v41, 1 }
 0x3a1   : > { %9880 = vmatprep.mubr.msk.bf16.mxu1 %vm10642_vm8, %v10641_v7 }
 0x3a2   : > { %v5772_v18 = vsel %vm14085_vm7, %v5769_v17, %v5771_v39  ;;  %v5774_v24 = vsel %vm14086_vm3, %v5771_v39, %v5773_v59  ;;  %v12343_v59 = vld [vmem:[#allocation3 + $0x38] sm:$0xff]   ;;  %vm14098_vm7 = vmmov %vm14096_vm9 }
 0x3a3   : > { %vm14099_vm3 = vmmov %vm14088_vm0 }
 0x3a4   : > { %vm14100_vm14 = vmmov %vm14098_vm7 }
 0x3a5   : > { %vm14101_vm4 = vmmov %vm14098_vm7 }
 0x3a6   : > { %vm14103_vm2 = vmmov %vm14101_vm4 }
 0x3a8   : > { %9881 = vmatmul.mubr.msk.bf16.gmra.mrb[72].mxu1 %vm5491_vm15, %v12101_v10  ;;  %v5777_v10 = vrot.slane %v12144_v23, 1  ;;  %v6668_v23 = vrot.slane %v12290_v16, 2 }
 0x3a9   : > { %9884 = vmatprep.mubr.msk.bf16.mxu1 %vm10642_vm8, %v10641_v7 }
 0x3aa   : > { %v5778_v45 = vsel %vm14088_vm0, %v5775_v34, %v5777_v10  ;;  %v6670_v2 = vsel %vm14092_vm10, %v6668_v23, %v6669_v6  ;;  %v12353_v10 = vld [vmem:[#allocation3 + $0x30] sm:$0xff]   ;;  %v12389_v6 = vld [vmem:[#allocation3 + $0x40] sm:$0xff]   ;;  %vm14104_vm10 = vsmask.f32 6400 }
 0x3ab   : > { %v6675_v9 = vrot.slane %v12353_v10, 2  ;;  %vm14106_vm11 = vmmov %vm14104_vm10 }
 0x3b0   : > { %9885 = vmatmul.mubr.msk.bf16.gmra.mrb[76].mxu1 %vm5491_vm15, %v12112_v43 }
 0x3b1   : > { %9888 = vmatprep.mubr.msk.bf16.mxu1 %vm10642_vm8, %v10641_v7 }
 0x3b8   : > { %9889 = vmatmul.mubr.msk.bf16.gmra.mrb[80].mxu1 %vm5491_vm15, %v12120_v41 }
 0x3b9   : > { %9892 = vmatprep.mubr.msk.bf16.mxu1 %vm10642_vm8, %v10641_v7 }
 0x3c0   : > { %9893 = vmatmul.mubr.msk.bf16.gmra.mrb[84].mxu1 %vm5491_vm15, %v12128_v47  ;;  %v6005_v47 = vsel %vm14090_vm6, %v6002_v19, %v6004_v12  ;;  %v12371_v12 = vld [vmem:[#allocation3 + $0x38] sm:$0xff]   ;;  %vm14102_vm6 = vmmov %vm14088_vm0 }
 0x3c1   : > { %9896 = vmatprep.mubr.msk.bf16.mxu1 %vm10642_vm8, %v10641_v7 }
 0x3c8   : > { %9897 = vmatmul.mubr.msk.bf16.gmra.mrb[88].mxu1 %vm5491_vm15, %v12136_v33  ;;  %v9258_v33 = vld [vmem:[%s13997_s3 + $0x6] sm:$0x1] }
 0x3c9   : > { %9902 = vmatprep.mubr.msk.bf16.mxu1 %vm10642_vm8, %v10641_v7  ;;  %v6715_v60 = vsel %vm5519_vm13, %v9258_v33, 0  ;;  %v12379_v33 = vld [vmem:[#allocation3 + $0x48] sm:$0xff]  }
 0x3ca   : > { %10053 = vmatpush3.bf16.msra.mxu0 %v6715_v60  ;;  %v6016_v23 = vrot.slane %v12379_v33, 1 }
 0x3cb   : > { %10128 = vmatprep.subr.bf16.mxu0 %v10641_v7 }
 0x3cd   : > { %10055 = vmatmul.mubr.msk.bf16.vlgmr.msra.gmra.mrb[52].mxu0 %vm5491_vm15, %v6670_v2  ;;  %v10499_v2 = vld [vmem:[#allocation3 + $0x50] ss:$0 sps:$4 sm:$0x11]  }
 0x3ce   : > { %10058 = vmatprep.mubr.msk.bf16.mxu0 %vm10642_vm8, %v10641_v7  ;;  %10129 = vmatpush3.bf16.msra.mxu0 %v7141_v29 }
 0x3d0   : > { %9903 = vmatmul.mubr.msk.bf16.vlgmr.msra.gmra.mrb[92].mxu1 %vm5491_vm15, %v5762_v32 }
 0x3d1   : > { %9939 = vmatpush3.bf16.msra.mxu1 %v6048_v52  ;;  %9906 = vmatprep.mubr.msk.bf16.mxu1 %vm10642_vm8, %v10641_v7  ;;  %v6009_v52 = vsel %vm14093_vm12, %v6006_v55, %v6008_v22  ;;  %vm14105_vm12 = vmmov %vm14103_vm2 }
 0x3d2   : > { %9976 = vmatprep.subr.bf16.mxu1 %v10641_v7 }
 0x3d5   : > { %10059 = vmatmul.mubr.msk.bf16.gmra.mrb[56].mxu0 %vm5491_vm15, %v6672_v1  ;;  %v6183_v1 = vshll.u32 %v12248_v3, 16 }
 0x3d6   : > { %10062 = vmatprep.mubr.msk.bf16.mxu0 %vm10642_vm8, %v10641_v7 }
 0x3d8   : > { %9907 = vmatmul.mubr.msk.bf16.gmra.mrb[96].mxu1 %vm5491_vm15, %v5764_v13 }
 0x3d9   : > { %9910 = vmatprep.mubr.msk.bf16.mxu1 %vm10642_vm8, %v10641_v7 }
 0x3e0   : > { %9911 = vmatmul.mubr.msk.bf16.gmra.mrb[100].mxu1 %vm5491_vm15, %v5766_v50  ;;  %v6010_v50 = vrot.slane %v12325_v21, 1 }
 0x3e1   : > { %9914 = vmatprep.mubr.msk.bf16.mxu1 %vm10642_vm8, %v10641_v7 }
 0x3e8   : > { %9915 = vmatmul.mubr.msk.bf16.gmra.mrb[104].mxu1 %vm5491_vm15, %v5768_v51 }
 0x3e9   : > { %9918 = vmatprep.mubr.msk.bf16.mxu1 %vm10642_vm8, %v10641_v7 }
 0x3f0   : > { %9919 = vmatmul.mubr.msk.bf16.gmra.mrb[108].mxu1 %vm5491_vm15, %v5770_v56  ;;  %v6673_v56 = vrot.slane %v12335_v28, 2 }
 0x3f1   : > { %9922 = vmatprep.mubr.msk.bf16.mxu1 %vm10642_vm8, %v10641_v7 }
 0x3f2   : > { %v6674_v34 = vsel %vm14096_vm9, %v6671_v20, %v6673_v56  ;;  %vm14108_vm9 = vmmov %vm14104_vm10 }
 0x3f3   : > { %10063 = vmatmul.mubr.msk.bf16.gmra.mrb[60].mxu0 %vm5491_vm15, %v6674_v34 }
 0x3f4   : > { %10066 = vmatprep.mubr.msk.bf16.mxu0 %vm10642_vm8, %v10641_v7 }
 0x3f8   : > { %9923 = vmatmul.mubr.msk.bf16.gmra.mrb[112].mxu1 %vm5491_vm15, %v5772_v18  ;;  %v6011_v18 = vsel %vm14095_vm5, %v6008_v22, %v6010_v50  ;;  %v6679_v22 = vrot.slane %v12389_v6, 2  ;;  %vm14107_vm5 = vmmov %vm14103_vm2 }
 0x3f9   : > { %9926 = vmatprep.mubr.msk.bf16.mxu1 %vm10642_vm8, %v10641_v7 }
 0x400   : > { %9927 = vmatmul.mubr.msk.bf16.gmra.mrb[116].mxu1 %vm5491_vm15, %v5774_v24 }
 0x401   : > { %9930 = vmatprep.mubr.msk.bf16.mxu1 %vm10642_vm8, %v10641_v7 }
 0x408   : > { %9931 = vmatmul.mubr.msk.bf16.gmra.mrb[120].mxu1 %vm5491_vm15, %v5776_v27  ;;  %v6012_v27 = vrot.slane %v12343_v59, 1 }
 0x409   : > { %9934 = vmatprep.mubr.msk.bf16.mxu1 %vm10642_vm8, %v10641_v7 }
 0x40a   : > { %v6013_v54 = vsel %vm14097_vm1, %v6010_v50, %v6012_v27  ;;  %v6188_v50 = vshrl.u32 %v12250_v25, 16  ;;  %vm14109_vm1 = vcmask 1044480  }
 0x410   : > { %9935 = vmatmul.mubr.msk.bf16.gmra.mrb[124].mxu1 %vm5491_vm15, %v5778_v45 }
 0x411   : > { %9940 = vmatprep.mubr.msk.bf16.mxu1 %vm10642_vm8, %v10641_v7 }
 0x413   : > { %v12257_v43 = vpop.f32.mrb[20].mxu1 }
 0x414   : > { %v9828_v11 = vpop.f32.mrb[21].mxu1 }
 0x415   : > { %v12262_v48 = vpop.f32.mrb[22].mxu1  ;;  %v12361_v11 = vld [vmem:[#allocation3 + $0x40] sm:$0xff]  }
 0x416   : > { %v9829_v41 = vpop.f32.mrb[23].mxu1 }
 0x417   : > { %v6676_v41 = vsel %vm14098_vm7, %v6673_v56, %v6675_v9  ;;  %v12408_v56 = vld [vmem:[#allocation3 + $0x48] sm:$0xff]   ;;  %vm14110_vm7 = vmmov %vm14108_vm9 }
 0x418   : > { %9941 = vmatmul.mubr.msk.bf16.vlgmr.msra.gmra.mrb[128].mxu1 %vm5491_vm15, %v6003_v38  ;;  %10067 = vmatmul.mubr.msk.bf16.gmra.mrb[64].mxu0 %vm5491_vm15, %v6676_v41 }
 0x419   : > { %9977 = vmatpush3.bf16.msra.mxu1 %v6296_v30  ;;  %9944 = vmatprep.mubr.msk.bf16.mxu1 %vm10642_vm8, %v10641_v7  ;;  %v6014_v30 = vrot.slane %v12361_v11, 1 }
 0x41a   : > { %10014 = vmatprep.subr.bf16.mxu1 %v10641_v7  ;;  %10070 = vmatprep.mubr.msk.bf16.mxu0 %vm10642_vm8, %v10641_v7 }
 0x41b   : > { %v12273_v35 = vpop.f32.mrb[24].mxu1  ;;  %v6015_v26 = vsel %vm14099_vm3, %v6012_v27, %v6014_v30  ;;  %v6017_v29 = vsel %vm14088_vm0, %v6014_v30, %v6016_v23  ;;  %v6681_v27 = vrot.slane %v12408_v56, 2  ;;  %vm14111_vm3 = vmmov %vm14109_vm1 }
 0x41c   : > { %v9832_v37 = vpop.f32.mrb[25].mxu1  ;;  %vm14113_vm0 = vmmov %vm14109_vm1 }
 0x41d   : > { %v12275_v42 = vpop.f32.mrb[26].mxu1  ;;  %v6682_v30 = vsel %vm14103_vm2, %v6679_v22, %v6681_v27 }
 0x41e   : > { %v9833_v62 = vpop.f32.mrb[27].mxu1 }
 0x41f   : > { %v6677_v62 = vrot.slane %v12371_v12, 2 }
 0x420   : > { %9945 = vmatmul.mubr.msk.bf16.gmra.mrb[132].mxu1 %vm5491_vm15, %v6005_v47 }
 0x421   : > { %9948 = vmatprep.mubr.msk.bf16.mxu1 %vm10642_vm8, %v10641_v7  ;;  %v6680_v20 = vsel %vm14101_vm4, %v6677_v62, %v6679_v22  ;;  %vm14114_vm4 = vmmov %vm14110_vm7 }
 0x422   : > { %vm14116_vm2 = vmmov %vm14114_vm4 }
 0x423   : > { %v12294_v36 = vpop.f32.mrb[28].mxu1 }
 0x424   : > { %v9836_v58 = vpop.f32.mrb[29].mxu1 }
 0x425   : > { %v12299_v0 = vpop.f32.mrb[30].mxu1  ;;  %v6678_v58 = vsel %vm14100_vm14, %v6675_v9, %v6677_v62  ;;  %vm14112_vm14 = vmmov %vm14110_vm7 }
 0x426   : > { %v9837_v57 = vpop.f32.mrb[31].mxu1  ;;  %10071 = vmatmul.mubr.msk.bf16.gmra.mrb[68].mxu0 %vm5491_vm15, %v6678_v58  ;;  %v12425_v58 = vld [vmem:[#allocation3 + $0x50] sm:$0xff]  }
 0x427   : > { %10074 = vmatprep.mubr.msk.bf16.mxu0 %vm10642_vm8, %v10641_v7 }
 0x428   : > { %9949 = vmatmul.mubr.msk.bf16.gmra.mrb[136].mxu1 %vm5491_vm15, %v6007_v53 }
 0x429   : > { %9952 = vmatprep.mubr.msk.bf16.mxu1 %vm10642_vm8, %v10641_v7 }
 0x42b   : > { %v12319_v4 = vpop.f32.mrb[32].mxu1 }
 0x42c   : > { %v9840_v31 = vpop.f32.mrb[33].mxu1 }
 0x42d   : > { %v12322_v32 = vpop.f32.mrb[34].mxu1 }
 0x42e   : > { %v9841_v13 = vpop.f32.mrb[35].mxu1  ;;  %10075 = vmatmul.mubr.msk.bf16.gmra.mrb[72].mxu0 %vm5491_vm15, %v6680_v20 }
 0x42f   : > { %10078 = vmatprep.mubr.msk.bf16.mxu0 %vm10642_vm8, %v10641_v7  ;;  %v6180_v13 = vshrl.u32 %v12248_v3, 16 }
 0x430   : > { %9953 = vmatmul.mubr.msk.bf16.gmra.mrb[140].mxu1 %vm5491_vm15, %v6009_v52  ;;  %v6018_v52 = vrot.slane %v10499_v2, 1 }
 0x431   : > { %9956 = vmatprep.mubr.msk.bf16.mxu1 %vm10642_vm8, %v10641_v7  ;;  %v6182_v9 = vrot.slane %v6180_v13, 1 }
 0x432   : > { %v6019_v34 = vsel %vm14102_vm6, %v6016_v23, %v6018_v52  ;;  %vm14115_vm6 = vmmov %vm14113_vm0 }
 0x433   : > { %v12337_v51 = vpop.f32.mrb[36].mxu1 }
 0x434   : > { %v9844_v17 = vpop.f32.mrb[37].mxu1 }
 0x435   : > { %v12340_v39 = vpop.f32.mrb[38].mxu1  ;;  %v6191_v17 = vshll.u32 %v12250_v25, 16 }
 0x436   : > { %v9845_v24 = vpop.f32.mrb[39].mxu1  ;;  %10079 = vmatmul.mubr.msk.bf16.gmra.mrb[76].mxu0 %vm5491_vm15, %v6682_v30 }
 0x437   : > { %v6193_v41 = vrot.slane %v6191_v17, 2  ;;  %10082 = vmatprep.mubr.msk.bf16.mxu0 %vm10642_vm8, %v10641_v7 }
 0x438   : > { %9957 = vmatmul.mubr.msk.bf16.gmra.mrb[144].mxu1 %vm5491_vm15, %v6011_v18 }
 0x439   : > { %9960 = vmatprep.mubr.msk.bf16.mxu1 %vm10642_vm8, %v10641_v7 }
 0x43b   : > { %v12355_v61 = vpop.f32.mrb[40].mxu1 }
 0x43c   : > { %v9848_v45 = vpop.f32.mrb[41].mxu1 }
 0x43d   : > { %v12358_v19 = vpop.f32.mrb[42].mxu1 }
 0x43e   : > { %v9849_v38 = vpop.f32.mrb[43].mxu1 }
 0x43f   : > { %v6190_v38 = vrot.slane %v6188_v50, 1 }
 0x440   : > { %9961 = vmatmul.mubr.msk.bf16.gmra.mrb[148].mxu1 %vm5491_vm15, %v6013_v54  ;;  %v6185_v54 = vrot.slane %v6183_v1, 2 }
 0x441   : > { %9964 = vmatprep.mubr.msk.bf16.mxu1 %vm10642_vm8, %v10641_v7  ;;  %v6194_v62 = vor.u32 %v6193_v41, %v6190_v38 }
 0x443   : > { %v12373_v37 = vpop.f32.mrb[44].mxu1 }
 0x444   : > { %v9852_v47 = vpop.f32.mrb[45].mxu1 }
 0x445   : > { %v12376_v55 = vpop.f32.mrb[46].mxu1  ;;  %v6186_v47 = vor.u32 %v6185_v54, %v6182_v9  ;;  %v10511_v9 = vld [vmem:[#allocation3 + $0x58] ss:$0 sps:$4 sm:$0x33]  }
 0x446   : > { %v9853_v60 = vpop.f32.mrb[47].mxu1  ;;  %v6685_v41 = vrot.slane %v10511_v9, 2 }
 0x447   : > { %v6200_v60 = vshll.u32 %v12265_v15, 16  ;;  %v6195_v20 = vsel %vm14104_vm10, %v6186_v47, %v6194_v62  ;;  %vm14117_vm10 = vmmov %vm14113_vm0 }
 0x448   : > { %9965 = vmatmul.mubr.msk.bf16.gmra.mrb[152].mxu1 %vm5491_vm15, %v6015_v26  ;;  %v6197_v26 = vshrl.u32 %v12265_v15, 16 }
 0x449   : > { %9968 = vmatprep.mubr.msk.bf16.mxu1 %vm10642_vm8, %v10641_v7  ;;  %v6202_v13 = vrot.slane %v6200_v60, 2 }
 0x44a   : > { %v6199_v52 = vrot.slane %v6197_v26, 1 }
 0x44b   : > { %v12391_v53 = vpop.f32.mrb[48].mxu1 }
 0x44c   : > { %v9856_v57 = vpop.f32.mrb[49].mxu1 }
 0x44d   : > { %v12394_v44 = vpop.f32.mrb[50].mxu1  ;;  %v9247_v57 = vld [vmem:[%s13997_s3 + $0x5] sm:$0x1] }
 0x44e   : > { %v9857_v31 = vpop.f32.mrb[51].mxu1  ;;  %v6474_v17 = vsel %vm5519_vm13, %v9247_v57, 0 }
 0x450   : > { %9969 = vmatmul.mubr.msk.bf16.gmra.mrb[156].mxu1 %vm5491_vm15, %v6017_v29  ;;  %v6683_v29 = vrot.slane %v12425_v58, 2 }
 0x451   : > { %9972 = vmatprep.mubr.msk.bf16.mxu1 %vm10642_vm8, %v10641_v7 }
 0x452   : > { %v6686_v57 = vsel %vm14107_vm5, %v6683_v29, %v6685_v41  ;;  %vm14120_vm5 = vmmov %vm14116_vm2 }
 0x453   : > { %v12410_v18 = vpop.f32.mrb[52].mxu1 }
 0x454   : > { %v9860_v24 = vpop.f32.mrb[53].mxu1 }
 0x455   : > { %v12414_v45 = vpop.f32.mrb[54].mxu1  ;;  %v6684_v24 = vsel %vm14105_vm12, %v6681_v27, %v6683_v29  ;;  %vm14118_vm12 = vmmov %vm14116_vm2 }
 0x456   : > { %v9861_v3 = vpop.f32.mrb[55].mxu1  ;;  %10083 = vmatmul.mubr.msk.bf16.gmra.mrb[80].mxu0 %vm5491_vm15, %v6684_v24 }
 0x457   : > { %10086 = vmatprep.mubr.msk.bf16.mxu0 %vm10642_vm8, %v10641_v7 }
 0x458   : > { %9973 = vmatmul.mubr.msk.bf16.gmra.mrb[160].mxu1 %vm5491_vm15, %v6019_v34  ;;  %v6209_v34 = vshll.u32 %v12278_v46, 16 }
 0x459   : > { %9978 = vmatprep.mubr.msk.bf16.mxu1 %vm10642_vm8, %v10641_v7 }
 0x45a   : > { %v6211_v26 = vrot.slane %v6209_v34, 2 }
 0x45b   : > { %v5683_v23 = vpop.f32.mrb[56].mxu1 }
 0x45c   : > { %v12431_v2 = vadd.f32 %v5683_v23, %v12257_v43  ;;  %v9866_v22 = vpop.f32.mrb[57].mxu1  ;;  %v6203_v43 = vor.u32 %v6202_v13, %v6199_v52 }
 0x45d   : > { %v5686_v31 = vpop.f32.mrb[58].mxu1  ;;  %v6218_v22 = vshll.u32 %v12302_v40, 16 }
 0x45e   : > { %v12436_v1 = vadd.f32 %v5686_v31, %v12262_v48  ;;  %v9867_v50 = vpop.f32.mrb[59].mxu1  ;;  %v6206_v48 = vshrl.u32 %v12278_v46, 16  ;;  %v6204_v30 = vsel %vm14106_vm11, %v6194_v62, %v6203_v43  ;;  %10087 = vmatmul.mubr.msk.bf16.gmra.mrb[84].mxu0 %vm5491_vm15, %v6686_v57  ;;  %v6215_v62 = vshrl.u32 %v12302_v40, 16  ;;  %vm14119_vm11 = vmmov %vm14113_vm0 }
 0x45f   : > { %10130 = vmatprep.mubr.msk.bf16.mxu0 %vm10642_vm8, %v10641_v7  ;;  %v7095_v50 = vrot.slane %v12292_v5, 3  ;;  %v6220_v34 = vrot.slane %v6218_v22, 2 }
 0x460   : > { %9979 = vmatmul.mubr.msk.bf16.vlgmr.msra.gmra.mrb[164].mxu1 %vm5491_vm15, %v6195_v20  ;;  %v6208_v47 = vrot.slane %v6206_v48, 1  ;;  %v6217_v48 = vrot.slane %v6215_v62, 1 }
 0x461   : > { %10015 = vmatpush3.bf16.msra.mxu1 %v6474_v17  ;;  %9982 = vmatprep.mubr.msk.bf16.mxu1 %vm10642_vm8, %v10641_v7 }
 0x462   : > { %10090 = vmatprep.subr.bf16.mxu1 %v10641_v7 }
 0x463   : > { %v5691_v27 = vpop.f32.mrb[60].mxu1 }
 0x464   : > { %v12450_v54 = vadd.f32 %v5691_v27, %v12273_v35  ;;  %v9870_v38 = vpop.f32.mrb[61].mxu1  ;;  %v6212_v35 = vor.u32 %v6211_v26, %v6208_v47 }
 0x465   : > { %v5694_v3 = vpop.f32.mrb[62].mxu1 }
 0x466   : > { %v12454_v60 = vadd.f32 %v5694_v3, %v12275_v42  ;;  %v9871_v23 = vpop.f32.mrb[63].mxu1  ;;  %v7088_v42 = vld [vmem:[#allocation3 + $0x10] sm:$0x8]  ;;  %v6213_v24 = vsel %vm14108_vm9, %v6203_v43, %v6212_v35  ;;  %v6227_v43 = vshll.u32 %v12325_v21, 16  ;;  %vm14121_vm9 = vmmov %vm14113_vm0 }
 0x467   : > { %v9290_v31 = vcombine.low %v7088_v42, %v12284_v63  ;;  %v6221_v63 = vor.u32 %v6220_v34, %v6217_v48 }
 0x468   : > { %9983 = vmatmul.mubr.msk.bf16.gmra.mrb[168].mxu1 %vm5491_vm15, %v6204_v30  ;;  %v7097_v30 = vrot.slane %v12317_v14, 3  ;;  %v6229_v57 = vrot.slane %v6227_v43, 2 }
 0x469   : > { %9986 = vmatprep.mubr.msk.bf16.mxu1 %vm10642_vm8, %v10641_v7  ;;  %v7094_v13 = vrot.slane %v9290_v31, 3  ;;  %v6222_v26 = vsel %vm14110_vm7, %v6212_v35, %v6221_v63  ;;  %v6233_v35 = vshrl.u32 %v12343_v59, 16  ;;  %v6236_v31 = vshll.u32 %v12343_v59, 16  ;;  %vm14123_vm7 = vmmov %vm14113_vm0 }
 0x46a   : > { %v7098_v42 = vsel %vm14111_vm3, %v7095_v50, %v7097_v30 }
 0x46b   : > { %v5699_v20 = vpop.f32.mrb[64].mxu1  ;;  %v7096_v38 = vsel %vm14109_vm1, %v7094_v13, %v7095_v50  ;;  %v7099_v13 = vrot.slane %v12335_v28, 3  ;;  %v6238_v48 = vrot.slane %v6236_v31, 2  ;;  %vm14122_vm1 = vcmask 1045504  }
 0x46c   : > { %v12467_v29 = vadd.f32 %v5699_v20, %v12294_v36  ;;  %v9874_v52 = vpop.f32.mrb[65].mxu1  ;;  %10131 = vmatmul.mubr.msk.bf16.vlgmr.msra.gmra.mrb[88].mxu0 %vm5491_vm15, %v7096_v38  ;;  %v6224_v36 = vshrl.u32 %v12325_v21, 16  ;;  %vm14124_vm3 = vmmov %vm14122_vm1 }
 0x46d   : > { %v5702_v17 = vpop.f32.mrb[66].mxu1  ;;  %10134 = vmatprep.mubr.msk.bf16.mxu0 %vm10642_vm8, %v10641_v7  ;;  %v7100_v38 = vsel %vm14113_vm0, %v7097_v30, %v7099_v13 }
 0x46e   : > { %v12472_v9 = vadd.f32 %v5702_v17, %v12299_v0  ;;  %v9875_v27 = vpop.f32.mrb[67].mxu1  ;;  %v6226_v23 = vrot.slane %v6224_v36, 1  ;;  %v6245_v36 = vshll.u32 %v12361_v11, 16 }
 0x470   : > { %9987 = vmatmul.mubr.msk.bf16.gmra.mrb[172].mxu1 %vm5491_vm15, %v6213_v24  ;;  %v6235_v24 = vrot.slane %v6233_v35, 1  ;;  %v6254_v35 = vshll.u32 %v12379_v33, 16 }
 0x471   : > { %9990 = vmatprep.mubr.msk.bf16.mxu1 %vm10642_vm8, %v10641_v7 }
 0x473   : > { %v5707_v0 = vpop.f32.mrb[68].mxu1 }
 0x474   : > { %v12484_v41 = vadd.f32 %v5707_v0, %v12319_v4  ;;  %v9878_v3 = vpop.f32.mrb[69].mxu1  ;;  %10135 = vmatmul.mubr.msk.bf16.gmra.mrb[92].mxu0 %vm5491_vm15, %v7098_v42  ;;  %v6230_v4 = vor.u32 %v6229_v57, %v6226_v23  ;;  %v6247_v23 = vrot.slane %v6245_v36, 2 }
 0x475   : > { %v5710_v47 = vpop.f32.mrb[70].mxu1  ;;  %10138 = vmatprep.mubr.msk.bf16.mxu0 %vm10642_vm8, %v10641_v7  ;;  %v7101_v3 = vrot.slane %v12353_v10, 3 }
 0x476   : > { %v12489_v62 = vadd.f32 %v5710_v47, %v12322_v32  ;;  %v9879_v22 = vpop.f32.mrb[71].mxu1  ;;  %v6231_v17 = vsel %vm14112_vm14, %v6221_v63, %v6230_v4  ;;  %v6242_v63 = vshrl.u32 %v12361_v11, 16  ;;  %vm14125_vm14 = vmmov %vm14113_vm0 }
 0x477   : > { %v7102_v42 = vsel %vm14115_vm6, %v7099_v13, %v7101_v3  ;;  %vm14126_vm0 = vmmov %vm14122_vm1 }
 0x478   : > { %9991 = vmatmul.mubr.msk.bf16.gmra.mrb[176].mxu1 %vm5491_vm15, %v6222_v26  ;;  %v6244_v26 = vrot.slane %v6242_v63, 1  ;;  %vm14128_vm6 = vmmov %vm14126_vm0 }
 0x479   : > { %9994 = vmatprep.mubr.msk.bf16.mxu1 %vm10642_vm8, %v10641_v7 }
 0x47b   : > { %v5715_v32 = vpop.f32.mrb[72].mxu1 }
 0x47c   : > { %v12501_v20 = vadd.f32 %v5715_v32, %v12337_v51  ;;  %v9882_v52 = vpop.f32.mrb[73].mxu1  ;;  %10139 = vmatmul.mubr.msk.bf16.gmra.mrb[96].mxu0 %vm5491_vm15, %v7100_v38  ;;  %v6239_v51 = vor.u32 %v6238_v48, %v6235_v24  ;;  %v6256_v24 = vrot.slane %v6254_v35, 2  ;;  %v12539_v48 = vld [vmem:[#allocation3 + $0x50] ss:$0 sps:$4 sm:$0x33]  }
 0x47d   : > { %v5718_v50 = vpop.f32.mrb[74].mxu1  ;;  %10142 = vmatprep.mubr.msk.bf16.mxu0 %vm10642_vm8, %v10641_v7  ;;  %v7103_v52 = vrot.slane %v12371_v12, 3  ;;  %v6263_v36 = vshll.u32 %v12539_v48, 16 }
 0x47e   : > { %v12506_v34 = vadd.f32 %v5718_v50, %v12340_v39  ;;  %v9883_v27 = vpop.f32.mrb[75].mxu1  ;;  %v6240_v47 = vsel %vm14114_vm4, %v6230_v4, %v6239_v51  ;;  %v6251_v4 = vshrl.u32 %v12379_v33, 16  ;;  %vm14127_vm4 = vmmov %vm14126_vm0 }
 0x47f   : > { %v7104_v63 = vsel %vm14117_vm10, %v7101_v3, %v7103_v52  ;;  %v7105_v3 = vrot.slane %v12389_v6, 3  ;;  %vm14130_vm10 = vmmov %vm14126_vm0 }
 0x480   : > { %9995 = vmatmul.mubr.msk.bf16.gmra.mrb[180].mxu1 %vm5491_vm15, %v6231_v17  ;;  %v6253_v17 = vrot.slane %v6251_v4, 1 }
 0x481   : > { %9998 = vmatprep.mubr.msk.bf16.mxu1 %vm10642_vm8, %v10641_v7  ;;  %v7106_v4 = vsel %vm14119_vm11, %v7103_v52, %v7105_v3  ;;  %vm14132_vm11 = vmmov %vm14126_vm0 }
 0x483   : > { %v5723_v39 = vpop.f32.mrb[76].mxu1 }
 0x484   : > { %v12518_v43 = vadd.f32 %v5723_v39, %v12355_v61  ;;  %v9886_v0 = vpop.f32.mrb[77].mxu1  ;;  %10143 = vmatmul.mubr.msk.bf16.gmra.mrb[100].mxu0 %vm5491_vm15, %v7102_v42  ;;  %v6248_v61 = vor.u32 %v6247_v23, %v6244_v26  ;;  %v6265_v23 = vrot.slane %v6263_v36, 2  ;;  %v7109_v36 = vrot.slane %v12425_v58, 3 }
 0x485   : > { %v5726_v30 = vpop.f32.mrb[78].mxu1  ;;  %10146 = vmatprep.mubr.msk.bf16.mxu0 %vm10642_vm8, %v10641_v7 }
 0x486   : > { %v12523_v57 = vadd.f32 %v5726_v30, %v12358_v19  ;;  %v9887_v22 = vpop.f32.mrb[79].mxu1  ;;  %v6249_v50 = vsel %vm14116_vm2, %v6239_v51, %v6248_v61  ;;  %v6260_v51 = vshrl.u32 %v12539_v48, 16  ;;  %vm14129_vm2 = vmmov %vm14126_vm0 }
 0x488   : > { %9999 = vmatmul.mubr.msk.bf16.gmra.mrb[184].mxu1 %vm5491_vm15, %v6240_v47  ;;  %v6262_v26 = vrot.slane %v6260_v51, 1 }
 0x489   : > { %10002 = vmatprep.mubr.msk.bf16.mxu1 %vm10642_vm8, %v10641_v7 }
 0x48b   : > { %v5731_v19 = vpop.f32.mrb[80].mxu1 }
 0x48c   : > { %v12535_v31 = vadd.f32 %v5731_v19, %v12373_v37  ;;  %v9890_v32 = vpop.f32.mrb[81].mxu1  ;;  %10147 = vmatmul.mubr.msk.bf16.gmra.mrb[104].mxu0 %vm5491_vm15, %v7104_v63  ;;  %v6257_v37 = vor.u32 %v6256_v24, %v6253_v17  ;;  %v6428_v63 = vrot.slane %v12250_v25, 2 }
 0x48d   : > { %v5734_v13 = vpop.f32.mrb[82].mxu1  ;;  %10150 = vmatprep.mubr.msk.bf16.mxu0 %vm10642_vm8, %v10641_v7  ;;  %v7107_v32 = vrot.slane %v12408_v56, 3 }
 0x48e   : > { %v12542_v27 = vadd.f32 %v5734_v13, %v12376_v55  ;;  %v9891_v38 = vpop.f32.mrb[83].mxu1  ;;  %v6258_v47 = vsel %vm14118_vm12, %v6248_v61, %v6257_v37  ;;  %v6421_v61 = vld [vmem:[#allocation3 + $0x8] sm:$0xc]  ;;  %vm14131_vm12 = vmmov %vm14126_vm0 }
 0x48f   : > { %v7108_v38 = vsel %vm14121_vm9, %v7105_v3, %v7107_v32 }
 0x490   : > { %10003 = vmatmul.mubr.msk.bf16.gmra.mrb[188].mxu1 %vm5491_vm15, %v6249_v50  ;;  %v9248_v50 = vcombine.low %v6421_v61, %v12244_v8 }
 0x491   : > { %10006 = vmatprep.mubr.msk.bf16.mxu1 %vm10642_vm8, %v10641_v7 }
 0x493   : > { %v5739_v55 = vpop.f32.mrb[84].mxu1 }
 0x494   : > { %v12554_v39 = vadd.f32 %v5739_v55, %v12391_v53  ;;  %v9894_v0 = vpop.f32.mrb[85].mxu1  ;;  %10151 = vmatmul.mubr.msk.bf16.gmra.mrb[108].mxu0 %vm5491_vm15, %v7106_v4  ;;  %v6266_v53 = vor.u32 %v6265_v23, %v6262_v26 }
 0x495   : > { %v5742_v30 = vpop.f32.mrb[86].mxu1  ;;  %10154 = vmatprep.mubr.msk.bf16.mxu0 %vm10642_vm8, %v10641_v7 }
 0x496   : > { %v12559_v22 = vadd.f32 %v5742_v30, %v12394_v44  ;;  %v9895_v42 = vpop.f32.mrb[87].mxu1  ;;  %v6267_v13 = vsel %vm14120_vm5, %v6257_v37, %v6266_v53  ;;  %vm14133_vm5 = vsmask.f32 5376 }
 0x497   : > { %vm14134_vm9 = vmmov %vm14133_vm5 }
 0x498   : > { %10007 = vmatmul.mubr.msk.bf16.gmra.mrb[192].mxu1 %vm5491_vm15, %v6258_v47  ;;  %v7110_v47 = vsel %vm14123_vm7, %v7107_v32, %v7109_v36 }
 0x499   : > { %10010 = vmatprep.mubr.msk.bf16.mxu1 %vm10642_vm8, %v10641_v7 }
 0x49b   : > { %v5747_v35 = vpop.f32.mrb[88].mxu1 }
 0x49c   : > { %v12569_v19 = vadd.f32 %v5747_v35, %v12410_v18  ;;  %v9898_v44 = vpop.f32.mrb[89].mxu1  ;;  %10155 = vmatmul.mubr.msk.bf16.gmra.mrb[112].mxu0 %vm5491_vm15, %v7108_v38  ;;  %v6427_v18 = vrot.slane %v9248_v50, 2 }
 0x49d   : > { %v5750_v52 = vpop.f32.mrb[90].mxu1  ;;  %10158 = vmatprep.mubr.msk.bf16.mxu0 %vm10642_vm8, %v10641_v7 }
 0x49e   : > { %v12575_v17 = vadd.f32 %v5750_v52, %v12414_v45  ;;  %v9899_v24 = vpop.f32.mrb[91].mxu1  ;;  %v9278_v45 = vld [vmem:[%s13997_s3 + $0x7] sm:$0x1]  ;;  %v6429_v0 = vsel %vm14122_vm1, %v6427_v18, %v6428_v63  ;;  %v6434_v18 = vrot.slane %v12302_v40, 2  ;;  %vm14135_vm1 = vmmov %vm14133_vm5 }
 0x49f   : > { %v6963_v25 = vsel %vm5519_vm13, %v9278_v45, 0  ;;  %vm14136_vm7 = vmmov %vm14135_vm1 }
 0x4a0   : > { %10011 = vmatmul.mubr.msk.bf16.gmra.mrb[196].mxu1 %vm5491_vm15, %v6267_v13 }
 0x4a1   : > { %10016 = vmatprep.mubr.msk.bf16.mxu1 %vm10642_vm8, %v10641_v7 }
 0x4a3   : > { %v5843_v8 = vpop.f32.mrb[92].mxu1 }
 0x4a4   : > { %v12589_v37 = vadd.f32 %v5843_v8, %v12431_v2  ;;  %v9904_v51 = vpop.f32.mrb[93].mxu1  ;;  %10159 = vmatmul.mubr.msk.bf16.gmra.mrb[116].mxu0 %vm5491_vm15, %v7110_v47  ;;  %v6430_v2 = vrot.slane %v12265_v15, 2  ;;  %v6432_v15 = vrot.slane %v12278_v46, 2  ;;  %v6438_v47 = vrot.slane %v12343_v59, 2 }
 0x4a5   : > { %v5846_v55 = vpop.f32.mrb[94].mxu1  ;;  %10162 = vmatprep.mubr.msk.bf16.mxu0 %vm10642_vm8, %v10641_v7 }
 0x4a6   : > { %v12594_v3 = vadd.f32 %v5846_v55, %v12436_v1  ;;  %v9905_v30 = vpop.f32.mrb[95].mxu1  ;;  %v12605_v1 = vld [vmem:[#allocation3 + $0x58] ss:$0 sps:$4 sm:$0x77]   ;;  %v6431_v61 = vsel %vm14124_vm3, %v6428_v63, %v6430_v2  ;;  %v6435_v45 = vsel %vm14127_vm4, %v6432_v15, %v6434_v18  ;;  %vm14137_vm3 = vmmov %vm14135_vm1 }
 0x4a7   : > { %v7111_v4 = vrot.slane %v12605_v1, 3 }
 0x4a8   : > { %10017 = vmatmul.mubr.msk.bf16.vlgmr.msra.gmra.mrb[200].mxu1 %vm5491_vm15, %v6429_v0 }
 0x4a9   : > { %10091 = vmatpush3.bf16.msra.mxu1 %v6963_v25  ;;  %10020 = vmatprep.mubr.msk.bf16.mxu1 %vm10642_vm8, %v10641_v7  ;;  %v7112_v32 = vsel %vm14125_vm14, %v7109_v36, %v7111_v4  ;;  %v6436_v36 = vrot.slane %v12325_v21, 2  ;;  %vm14138_vm14 = vmmov %vm14135_vm1 }
 0x4ab   : > { %v5851_v26 = vpop.f32.mrb[96].mxu1  ;;  %v6437_v30 = vsel %vm14128_vm6, %v6434_v18, %v6436_v36  ;;  %v6444_v18 = vrot.slane %v12539_v48, 2 }
 0x4ac   : > { %v12608_v23 = vadd.f32 %v5851_v26, %v12450_v54  ;;  %v9908_v42 = vpop.f32.mrb[97].mxu1  ;;  %10163 = vmatmul.mubr.msk.bf16.gmra.mrb[120].mxu0 %vm5491_vm15, %v7112_v32 }
 0x4ad   : > { %v5854_v53 = vpop.f32.mrb[98].mxu1  ;;  %v6439_v42 = vsel %vm14129_vm2, %v6436_v36, %v6438_v47  ;;  %vm8182_vm2 = vcmask 1044484  }
 0x4ae   : > { %v12613_v35 = vadd.f32 %v5854_v53, %v12454_v60  ;;  %v9909_v44 = vpop.f32.mrb[99].mxu1  ;;  %v6433_v60 = vsel %vm14126_vm0, %v6430_v2, %v6432_v15  ;;  %v6440_v53 = vrot.slane %v12361_v11, 2  ;;  %vm14139_vm0 = vmmov %vm14135_vm1 }
 0x4af   : > { %vm14140_vm4 = vmmov %vm14139_vm0 }
 0x4b0   : > { %10021 = vmatmul.mubr.msk.bf16.gmra.mrb[204].mxu1 %vm5491_vm15, %v6431_v61  ;;  %v6441_v32 = vsel %vm14130_vm10, %v6438_v47, %v6440_v53  ;;  %v6867_v47 = vshll.u32 %v12317_v14, 16  ;;  %vm14141_vm6 = vmmov %vm14139_vm0  ;;  %vm8184_vm10 = vcmask 1046534  }
 0x4b1   : > { %10024 = vmatprep.mubr.msk.bf16.mxu1 %vm10642_vm8, %v10641_v7 }
 0x4b3   : > { %v5859_v54 = vpop.f32.mrb[100].mxu1 }
 0x4b4   : > { %v12622_v52 = vadd.f32 %v5859_v54, %v12467_v29  ;;  %v9912_v13 = vpop.f32.mrb[101].mxu1  ;;  %v6442_v54 = vrot.slane %v12379_v33, 2  ;;  %v6847_v33 = vshrl.u32 %v12290_v16, 16 }
 0x4b5   : > { %v5862_v50 = vpop.f32.mrb[102].mxu1 }
 0x4b6   : > { %v12626_v24 = vadd.f32 %v5862_v50, %v12472_v9  ;;  %v9913_v38 = vpop.f32.mrb[103].mxu1  ;;  %v6849_v48 = vrot.slane %v6847_v33, 2  ;;  %v12727_v33 = vpop.f32.mrb[52].mxu0 }
 0x4b8   : > { %10025 = vmatmul.mubr.msk.bf16.gmra.mrb[208].mxu1 %vm5491_vm15, %v6433_v60  ;;  %v6443_v60 = vsel %vm14131_vm12, %v6440_v53, %v6442_v54  ;;  %v6869_v53 = vrot.slane %v6867_v47, 3 }
 0x4b9   : > { %10028 = vmatprep.mubr.msk.bf16.mxu1 %vm10642_vm8, %v10641_v7 }
 0x4bb   : > { %v5867_v46 = vpop.f32.mrb[104].mxu1 }
 0x4bc   : > { %v12633_v63 = vadd.f32 %v5867_v46, %v12484_v41  ;;  %v9916_v29 = vpop.f32.mrb[105].mxu1  ;;  %v6855_v46 = vshrl.u32 %v12292_v5, 16 }
 0x4bd   : > { %v5870_v8 = vpop.f32.mrb[106].mxu1  ;;  %v6858_v29 = vshll.u32 %v12292_v5, 16 }
 0x4be   : > { %v12637_v51 = vadd.f32 %v5870_v8, %v12489_v62  ;;  %v9917_v9 = vpop.f32.mrb[107].mxu1 }
 0x4bf   : > { %v6445_v9 = vsel %vm14132_vm11, %v6442_v54, %v6444_v18  ;;  %v6882_v18 = vshrl.u32 %v12353_v10, 16  ;;  %vm14231_vm11 = vcmask 31744  }
 0x4c0   : > { %10029 = vmatmul.mubr.msk.bf16.gmra.mrb[212].mxu1 %vm5491_vm15, %v6435_v45 }
 0x4c1   : > { %10032 = vmatprep.mubr.msk.bf16.mxu1 %vm10642_vm8, %v10641_v7 }
 0x4c3   : > { %v5875_v40 = vpop.f32.mrb[108].mxu1 }
 0x4c4   : > { %v12644_v55 = vadd.f32 %v5875_v40, %v12501_v20  ;;  %v9920_v41 = vpop.f32.mrb[109].mxu1 }
 0x4c5   : > { %v5878_v0 = vpop.f32.mrb[110].mxu1  ;;  %v6857_v41 = vrot.slane %v6855_v46, 2  ;;  %v10056_v46 = vpop.f32.mrb[53].mxu0 }
 0x4c6   : > { %v12648_v25 = vadd.f32 %v5878_v0, %v12506_v34  ;;  %v9921_v62 = vpop.f32.mrb[111].mxu1  ;;  %v6860_v0 = vrot.slane %v6858_v29, 3  ;;  %v6912_v46 = vshll.u32 %v12408_v56, 16 }
 0x4c7   : > { %v6864_v62 = vshrl.u32 %v12317_v14, 16 }
 0x4c8   : > { %10033 = vmatmul.mubr.msk.bf16.gmra.mrb[216].mxu1 %vm5491_vm15, %v6437_v30 }
 0x4c9   : > { %10036 = vmatprep.mubr.msk.bf16.mxu1 %vm10642_vm8, %v10641_v7 }
 0x4cb   : > { %v5883_v21 = vpop.f32.mrb[112].mxu1 }
 0x4cc   : > { %v12655_v2 = vadd.f32 %v5883_v21, %v12518_v43  ;;  %v9924_v20 = vpop.f32.mrb[113].mxu1 }
 0x4cd   : > { %v5886_v26 = vpop.f32.mrb[114].mxu1 }
 0x4ce   : > { %v12659_v4 = vadd.f32 %v5886_v26, %v12523_v57  ;;  %v9925_v34 = vpop.f32.mrb[115].mxu1 }
 0x4cf   : > { %v6866_v34 = vrot.slane %v6864_v62, 2 }
 0x4d0   : > { %10037 = vmatmul.mubr.msk.bf16.gmra.mrb[220].mxu1 %vm5491_vm15, %v6439_v42 }
 0x4d1   : > { %10040 = vmatprep.mubr.msk.bf16.mxu1 %vm10642_vm8, %v10641_v7  ;;  %v6870_v14 = vor.u32 %v6869_v53, %v6866_v34 }
 0x4d3   : > { %v5891_v59 = vpop.f32.mrb[116].mxu1 }
 0x4d4   : > { %v12666_v61 = vadd.f32 %v5891_v59, %v12535_v31  ;;  %v9928_v43 = vpop.f32.mrb[117].mxu1 }
 0x4d5   : > { %v5894_v44 = vpop.f32.mrb[118].mxu1 }
 0x4d6   : > { %v12670_v15 = vadd.f32 %v5894_v44, %v12542_v27  ;;  %v9929_v57 = vpop.f32.mrb[119].mxu1  ;;  %v6873_v44 = vshrl.u32 %v12335_v28, 16 }
 0x4d8   : > { %10041 = vmatmul.mubr.msk.bf16.gmra.mrb[224].mxu1 %vm5491_vm15, %v6441_v32 }
 0x4d9   : > { %10044 = vmatprep.mubr.msk.bf16.mxu1 %vm10642_vm8, %v10641_v7 }
 0x4db   : > { %v5899_v11 = vpop.f32.mrb[120].mxu1 }
 0x4dc   : > { %v12677_v13 = vadd.f32 %v5899_v11, %v12554_v39  ;;  %v9932_v31 = vpop.f32.mrb[121].mxu1  ;;  %v6850_v39 = vshll.u32 %v12290_v16, 16 }
 0x4dd   : > { %v5902_v50 = vpop.f32.mrb[122].mxu1  ;;  %v6875_v31 = vrot.slane %v6873_v44, 2  ;;  %v6903_v44 = vshll.u32 %v12389_v6, 16 }
 0x4de   : > { %v12681_v38 = vadd.f32 %v5902_v50, %v12559_v22  ;;  %v9933_v27 = vpop.f32.mrb[123].mxu1  ;;  %v6852_v40 = vrot.slane %v6850_v39, 3 }
 0x4e0   : > { %10045 = vmatmul.mubr.msk.bf16.gmra.mrb[228].mxu1 %vm5491_vm15, %v6443_v60  ;;  %v6853_v5 = vor.u32 %v6852_v40, %v6849_v48 }
 0x4e1   : > { %10048 = vmatprep.mubr.msk.bf16.mxu1 %vm10642_vm8, %v10641_v7 }
 0x4e3   : > { %v5907_v8 = vpop.f32.mrb[124].mxu1 }
 0x4e4   : > { %v12692_v22 = vadd.f32 %v5907_v8, %v12569_v19  ;;  %v9936_v45 = vpop.f32.mrb[125].mxu1  ;;  %v6861_v19 = vor.u32 %v6860_v0, %v6857_v41  ;;  %v12732_v8 = vpop.f32.mrb[54].mxu0  ;;  %v6891_v0 = vshrl.u32 %v12371_v12, 16 }
 0x4e5   : > { %v5910_v36 = vpop.f32.mrb[126].mxu1  ;;  %v10057_v40 = vpop.f32.mrb[55].mxu0 }
 0x4e6   : > { %v12696_v30 = vadd.f32 %v5910_v36, %v12575_v17  ;;  %v9937_v16 = vpop.f32.mrb[127].mxu1  ;;  %v6862_v17 = vsel %vm14133_vm5, %v6853_v5, %v6861_v19  ;;  %v6884_v36 = vrot.slane %v6882_v18, 2  ;;  %v12743_v5 = vpop.f32.mrb[56].mxu0  ;;  %vm14236_vm5 = vmmov %vm14231_vm11 }
 0x4e7   : > { %v6894_v16 = vshll.u32 %v12371_v12, 16  ;;  %v10060_v62 = vpop.f32.mrb[57].mxu0 }
 0x4e8   : > { %10049 = vmatmul.mubr.msk.bf16.gmra.mrb[232].mxu1 %vm5491_vm15, %v6445_v9  ;;  %v6918_v62 = vshrl.u32 %v12425_v58, 16 }
 0x4e9   : > { %10092 = vmatprep.mubr.msk.bf16.mxu1 %vm10642_vm8, %v10641_v7  ;;  %v6896_v34 = vrot.slane %v6894_v16, 3 }
 0x4eb   : > { %v6084_v21 = vpop.f32.mrb[128].mxu1 }
 0x4ec   : > { %v12704_v20 = vadd.f32 %v6084_v21, %v12589_v37  ;;  %v9942_v26 = vpop.f32.mrb[129].mxu1  ;;  %v6876_v37 = vshll.u32 %v12335_v28, 16  ;;  %v12748_v21 = vpop.f32.mrb[58].mxu0 }
 0x4ed   : > { %v6087_v42 = vpop.f32.mrb[130].mxu1  ;;  %v10061_v53 = vpop.f32.mrb[59].mxu0 }
 0x4ee   : > { %v12708_v59 = vadd.f32 %v6087_v42, %v12594_v3  ;;  %v9943_v43 = vpop.f32.mrb[131].mxu1  ;;  %v6871_v3 = vsel %vm14134_vm9, %v6861_v19, %v6870_v14  ;;  %v6878_v50 = vrot.slane %v6876_v37, 3  ;;  %v12759_v37 = vpop.f32.mrb[60].mxu0  ;;  %vm14245_vm9 = vmmov %vm14236_vm5 }
 0x4f0   : > { %10093 = vmatmul.mubr.msk.bf16.vlgmr.msra.gmra.mrb[236].mxu1 %vm5491_vm15, %v6862_v17  ;;  %v6879_v28 = vor.u32 %v6878_v50, %v6875_v31  ;;  %v6893_v17 = vrot.slane %v6891_v0, 2  ;;  %v6914_v0 = vrot.slane %v6912_v46, 3 }
 0x4f1   : > { %10096 = vmatprep.mubr.msk.bf16.mxu1 %vm10642_vm8, %v10641_v7 }
 0x4f2   : > { %v6880_v9 = vsel %vm14135_vm1, %v6870_v14, %v6879_v28  ;;  %v6900_v14 = vshrl.u32 %v12389_v6, 16  ;;  %vm14249_vm1 = vmmov %vm14236_vm5 }
 0x4f3   : > { %v6092_v32 = vpop.f32.mrb[132].mxu1 }
 0x4f4   : > { %v12716_v57 = vadd.f32 %v6092_v32, %v12608_v23  ;;  %v9946_v54 = vpop.f32.mrb[133].mxu1  ;;  %v6885_v23 = vshll.u32 %v12353_v10, 16 }
 0x4f5   : > { %v6095_v11 = vpop.f32.mrb[134].mxu1  ;;  %v10064_v54 = vpop.f32.mrb[61].mxu0 }
 0x4f6   : > { %v12720_v60 = vadd.f32 %v6095_v11, %v12613_v35  ;;  %v9947_v27 = vpop.f32.mrb[135].mxu1  ;;  %v6887_v48 = vrot.slane %v6885_v23, 3 }
 0x4f7   : > { %v6902_v27 = vrot.slane %v6900_v14, 2  ;;  %v6920_v14 = vrot.slane %v6918_v62, 2 }
 0x4f8   : > { %10097 = vmatmul.mubr.msk.bf16.gmra.mrb[240].mxu1 %vm5491_vm15, %v6871_v3  ;;  %v12764_v3 = vpop.f32.mrb[62].mxu0 }
 0x4f9   : > { %10100 = vmatprep.mubr.msk.bf16.mxu1 %vm10642_vm8, %v10641_v7  ;;  %v10065_v18 = vpop.f32.mrb[63].mxu0 }
 0x4fb   : > { %v6100_v39 = vpop.f32.mrb[136].mxu1 }
 0x4fc   : > { %v12730_v29 = vadd.f32 %v6100_v39, %v12622_v52  ;;  %v9950_v35 = vpop.f32.mrb[137].mxu1  ;;  %v6888_v52 = vor.u32 %v6887_v48, %v6884_v36  ;;  %v6909_v39 = vshrl.u32 %v12408_v56, 16 }
 0x4fd   : > { %v6103_v45 = vpop.f32.mrb[138].mxu1  ;;  %v12775_v35 = vpop.f32.mrb[64].mxu0 }
 0x4fe   : > { %v12736_v41 = vadd.f32 %v6103_v45, %v12626_v24  ;;  %v9951_v10 = vpop.f32.mrb[139].mxu1  ;;  %v6889_v42 = vsel %vm14136_vm7, %v6879_v28, %v6888_v52  ;;  %v6905_v28 = vrot.slane %v6903_v44, 3  ;;  %vm14258_vm7 = vmmov %vm14249_vm1 }
 0x500   : > { %10101 = vmatmul.mubr.msk.bf16.gmra.mrb[244].mxu1 %vm5491_vm15, %v6880_v9  ;;  %v10068_v9 = vpop.f32.mrb[65].mxu0 }
 0x501   : > { %10104 = vmatprep.mubr.msk.bf16.mxu1 %vm10642_vm8, %v10641_v7  ;;  %v12780_v48 = vpop.f32.mrb[66].mxu0 }
 0x502   : > { %v10069_v16 = vpop.f32.mrb[67].mxu0 }
 0x503   : > { %v6108_v19 = vpop.f32.mrb[140].mxu1 }
 0x504   : > { %v12746_v47 = vadd.f32 %v6108_v19, %v12633_v63  ;;  %v9954_v24 = vpop.f32.mrb[141].mxu1  ;;  %v6897_v63 = vor.u32 %v6896_v34, %v6893_v17 }
 0x505   : > { %v6111_v26 = vpop.f32.mrb[142].mxu1  ;;  %v6921_v24 = vshll.u32 %v12425_v58, 16 }
 0x506   : > { %v12752_v43 = vadd.f32 %v6111_v26, %v12637_v51  ;;  %v9955_v12 = vpop.f32.mrb[143].mxu1  ;;  %v6898_v50 = vsel %vm14137_vm3, %v6888_v52, %v6897_v63  ;;  %v6911_v52 = vrot.slane %v6909_v39, 2  ;;  %v12791_v26 = vpop.f32.mrb[68].mxu0  ;;  %vm14265_vm3 = vmmov %vm14249_vm1 }
 0x507   : > { %v10072_v17 = vpop.f32.mrb[69].mxu0  ;;  %v6923_v44 = vrot.slane %v6921_v24, 3 }
 0x508   : > { %10105 = vmatmul.mubr.msk.bf16.gmra.mrb[248].mxu1 %vm5491_vm15, %v6889_v42  ;;  %v12796_v53 = vpop.f32.mrb[70].mxu0 }
 0x509   : > { %10108 = vmatprep.mubr.msk.bf16.mxu1 %vm10642_vm8, %v10641_v7 }
 0x50b   : > { %v6116_v32 = vpop.f32.mrb[144].mxu1 }
 0x50c   : > { %v12762_v11 = vadd.f32 %v6116_v32, %v12644_v55  ;;  %v9958_v51 = vpop.f32.mrb[145].mxu1  ;;  %v6906_v55 = vor.u32 %v6905_v28, %v6902_v27  ;;  %v10073_v32 = vpop.f32.mrb[71].mxu0 }
 0x50d   : > { %v6119_v31 = vpop.f32.mrb[146].mxu1  ;;  %v6927_v51 = vshrl.u32 %v12605_v1, 16 }
 0x50e   : > { %v12768_v23 = vadd.f32 %v6119_v31, %v12648_v25  ;;  %v9959_v6 = vpop.f32.mrb[147].mxu1  ;;  %v6907_v10 = vsel %vm14138_vm14, %v6897_v63, %v6906_v55  ;;  %v6930_v31 = vshll.u32 %v12605_v1, 16  ;;  %vm14278_vm14 = vmmov %vm14249_vm1 }
 0x50f   : > { %v6929_v46 = vrot.slane %v6927_v51, 2 }
 0x510   : > { %10109 = vmatmul.mubr.msk.bf16.gmra.mrb[252].mxu1 %vm5491_vm15, %v6898_v50  ;;  %v12807_v50 = vpop.f32.mrb[72].mxu0 }
 0x511   : > { %10112 = vmatprep.mubr.msk.bf16.mxu1 %vm10642_vm8, %v10641_v7  ;;  %v10076_v28 = vpop.f32.mrb[73].mxu0 }
 0x512   : > { %v12812_v6 = vpop.f32.mrb[74].mxu0 }
 0x513   : > { %v6124_v45 = vpop.f32.mrb[148].mxu1  ;;  %v10077_v9 = vpop.f32.mrb[75].mxu0 }
 0x514   : > { %v12778_v36 = vadd.f32 %v6124_v45, %v12655_v2  ;;  %v9962_v25 = vpop.f32.mrb[149].mxu1  ;;  %v6915_v2 = vor.u32 %v6914_v0, %v6911_v52  ;;  %v6932_v45 = vrot.slane %v6930_v31, 3 }
 0x515   : > { %v6127_v40 = vpop.f32.mrb[150].mxu1 }
 0x516   : > { %v12784_v19 = vadd.f32 %v6127_v40, %v12659_v4  ;;  %v9963_v56 = vpop.f32.mrb[151].mxu1  ;;  %v6916_v63 = vsel %vm14139_vm0, %v6906_v55, %v6915_v2  ;;  %v12821_v40 = vpop.f32.mrb[76].mxu0  ;;  %vm14281_vm0 = vmmov %vm14249_vm1 }
 0x517   : > { %v10080_v52 = vpop.f32.mrb[77].mxu0 }
 0x518   : > { %10113 = vmatmul.mubr.msk.bf16.gmra.mrb[16].mxu1 %vm5491_vm15, %v6907_v10  ;;  %v12826_v56 = vpop.f32.mrb[78].mxu0 }
 0x519   : > { %10116 = vmatprep.mubr.msk.bf16.mxu1 %vm10642_vm8, %v10641_v7  ;;  %v10081_v62 = vpop.f32.mrb[79].mxu0 }
 0x51b   : > { %v6132_v42 = vpop.f32.mrb[152].mxu1 }
 0x51c   : > { %v12794_v34 = vadd.f32 %v6132_v42, %v12666_v61  ;;  %v9966_v4 = vpop.f32.mrb[153].mxu1  ;;  %v6924_v61 = vor.u32 %v6923_v44, %v6920_v14 }
 0x51d   : > { %v6135_v12 = vpop.f32.mrb[154].mxu1 }
 0x51e   : > { %v12800_v54 = vadd.f32 %v6135_v12, %v12670_v15  ;;  %v9967_v58 = vpop.f32.mrb[155].mxu1  ;;  %v6925_v39 = vsel %vm14140_vm4, %v6915_v2, %v6924_v61  ;;  %vm14295_vm4 = vmmov %vm14281_vm0 }
 0x520   : > { %10117 = vmatmul.mubr.msk.bf16.gmra.mrb[0].mxu1 %vm5491_vm15, %v6916_v63 }
 0x521   : > { %10120 = vmatprep.mubr.msk.bf16.mxu1 %vm10642_vm8, %v10641_v7 }
 0x523   : > { %v6140_v27 = vpop.f32.mrb[156].mxu1 }
 0x524   : > { %v12810_v18 = vadd.f32 %v6140_v27, %v12677_v13  ;;  %v9970_v15 = vpop.f32.mrb[157].mxu1  ;;  %v6933_v13 = vor.u32 %v6932_v45, %v6929_v46 }
 0x525   : > { %v6143_v55 = vpop.f32.mrb[158].mxu1 }
 0x526   : > { %v12816_v25 = vadd.f32 %v6143_v55, %v12681_v38  ;;  %v9971_v1 = vpop.f32.mrb[159].mxu1  ;;  %v6934_v38 = vsel %vm14141_vm6, %v6924_v61, %v6933_v13  ;;  %vm14308_vm6 = vmmov %vm14281_vm0 }
 0x528   : > { %10121 = vmatmul.mubr.msk.bf16.gmra.mrb[4].mxu1 %vm5491_vm15, %v6925_v39 }
 0x529   : > { %10124 = vmatprep.mubr.msk.bf16.mxu1 %vm10642_vm8, %v10641_v7  ;;  %v12833_v7 = vpop.f32.mrb[80].mxu0  ;;  %vm8180_vm8 = vcmask 1042434  }
 0x52a   : > { %v10084_v4 = vpop.f32.mrb[81].mxu0 }
 0x52b   : > { %v6148_v10 = vpop.f32.mrb[160].mxu1  ;;  %v12838_v63 = vpop.f32.mrb[82].mxu0 }
 0x52c   : > { %v12824_v0 = vadd.f32 %v6148_v10, %v12692_v22  ;;  %v9974_v16 = vpop.f32.mrb[161].mxu1  ;;  %v10085_v44 = vpop.f32.mrb[83].mxu0 }
 0x52d   : > { %v6151_v2 = vpop.f32.mrb[162].mxu1 }
 0x52e   : > { %v12830_v24 = vadd.f32 %v6151_v2, %v12696_v30  ;;  %v9975_v42 = vpop.f32.mrb[163].mxu1 }
 0x530   : > { %10125 = vmatmul.mubr.msk.bf16.gmra.mrb[8].mxu1 %vm5491_vm15, %v6934_v38  ;;  %vm8181_vm15 = vmor %vm5519_vm13, %vm8180_vm8 }
 0x531   : > { %v12843_v58 = vpop.f32.mrb[84].mxu0  ;;  %vm8183_vm13 = vmor %vm8181_vm15, %vm8182_vm2 }
 0x532   : > { %v10088_v51 = vpop.f32.mrb[85].mxu0  ;;  %vm12987_vm12 = vmor %vm8183_vm13, %vm8184_vm10 }
 0x533   : > { %v6332_v17 = vpop.f32.mrb[164].mxu1  ;;  %v12848_v28 = vpop.f32.mrb[86].mxu0  ;;  %vm14315_vm8 = vmmov %vm14281_vm0 }
 0x534   : > { %v12836_v22 = vadd.f32 %v6332_v17, %v12704_v20  ;;  %v9980_v12 = vpop.f32.mrb[165].mxu1  ;;  %v10089_v15 = vpop.f32.mrb[87].mxu0  ;;  %vm14323_vm15 = vmmov %vm14281_vm0 }
 0x535   : > { %v6335_v14 = vpop.f32.mrb[166].mxu1  ;;  %vm14324_vm2 = vmmov %vm14281_vm0 }
 0x536   : > { %v12841_v32 = vadd.f32 %v6335_v14, %v12708_v59  ;;  %v9981_v30 = vpop.f32.mrb[167].mxu1  ;;  %vm14325_vm13 = vmmov %vm14281_vm0 }
 0x537   : > { %vm14326_vm10 = vmmov %vm14281_vm0 }
 0x53b   : > { %v6340_v61 = vpop.f32.mrb[168].mxu1 }
 0x53c   : > { %v12846_v31 = vadd.f32 %v6340_v61, %v12716_v57  ;;  %v9984_v27 = vpop.f32.mrb[169].mxu1 }
 0x53d   : > { %v6343_v20 = vpop.f32.mrb[170].mxu1 }
 0x53e   : > { %v12851_v55 = vadd.f32 %v6343_v20, %v12720_v60  ;;  %v9985_v39 = vpop.f32.mrb[171].mxu1 }
 0x53f   : > { %v12853_v46 = vpop.f32.mrb[88].mxu0 }
 0x540   : > { %v10132_v45 = vpop.f32.mrb[89].mxu0 }
 0x541   : > { %v12858_v13 = vpop.f32.mrb[90].mxu0 }
 0x542   : > { %v10133_v10 = vpop.f32.mrb[91].mxu0 }
 0x543   : > { %v6348_v59 = vpop.f32.mrb[172].mxu1 }
 0x544   : > { %v12856_v9 = vadd.f32 %v6348_v59, %v12730_v29  ;;  %v9988_v1 = vpop.f32.mrb[173].mxu1 }
 0x545   : > { %v6351_v57 = vpop.f32.mrb[174].mxu1 }
 0x546   : > { %v12861_v52 = vadd.f32 %v6351_v57, %v12736_v41  ;;  %v9989_v16 = vpop.f32.mrb[175].mxu1 }
 0x547   : > { %v12863_v60 = vpop.f32.mrb[92].mxu0 }
 0x548   : > { %v10136_v42 = vpop.f32.mrb[93].mxu0 }
 0x549   : > { %v12868_v29 = vpop.f32.mrb[94].mxu0 }
 0x54a   : > { %v10137_v14 = vpop.f32.mrb[95].mxu0 }
 0x54b   : > { %v6356_v2 = vpop.f32.mrb[176].mxu1 }
 0x54c   : > { %v12866_v38 = vadd.f32 %v6356_v2, %v12746_v47  ;;  %v9992_v62 = vpop.f32.mrb[177].mxu1 }
 0x54d   : > { %v6359_v17 = vpop.f32.mrb[178].mxu1 }
 0x54e   : > { %v12871_v4 = vadd.f32 %v6359_v17, %v12752_v43  ;;  %v9993_v12 = vpop.f32.mrb[179].mxu1 }
 0x54f   : > { %v12873_v41 = vpop.f32.mrb[96].mxu0 }
 0x550   : > { %v10140_v51 = vpop.f32.mrb[97].mxu0 }
 0x551   : > { %v12878_v27 = vpop.f32.mrb[98].mxu0 }
 0x552   : > { %v10141_v39 = vpop.f32.mrb[99].mxu0 }
 0x553   : > { %v6364_v44 = vpop.f32.mrb[180].mxu1 }
 0x554   : > { %v12876_v30 = vadd.f32 %v6364_v44, %v12762_v11  ;;  %v9996_v61 = vpop.f32.mrb[181].mxu1 }
 0x555   : > { %v6367_v47 = vpop.f32.mrb[182].mxu1 }
 0x556   : > { %v12881_v20 = vadd.f32 %v6367_v47, %v12768_v23  ;;  %v9997_v15 = vpop.f32.mrb[183].mxu1 }
 0x557   : > { %v12883_v59 = vpop.f32.mrb[100].mxu0 }
 0x558   : > { %v10144_v57 = vpop.f32.mrb[101].mxu0 }
 0x559   : > { %v12888_v10 = vpop.f32.mrb[102].mxu0 }
 0x55a   : > { %14142 = vst [vmem:[#allocation4_spill] sm:$0xff] %v12888_v10  ;;  %v10145_v62 = vpop.f32.mrb[103].mxu0 }
 0x55b   : > { %v6372_v43 = vpop.f32.mrb[184].mxu1 }
 0x55c   : > { %v12886_v45 = vadd.f32 %v6372_v43, %v12778_v36  ;;  %v10000_v1 = vpop.f32.mrb[185].mxu1 }
 0x55d   : > { %v6375_v11 = vpop.f32.mrb[186].mxu1 }
 0x55e   : > { %v12891_v16 = vadd.f32 %v6375_v11, %v12784_v19  ;;  %v10001_v2 = vpop.f32.mrb[187].mxu1 }
 0x55f   : > { %v12899_v44 = vpop.f32.mrb[104].mxu0 }
 0x560   : > { %14143 = vst [vmem:[#allocation5_spill] sm:$0xff] %v12899_v44  ;;  %v10148_v61 = vpop.f32.mrb[105].mxu0 }
 0x561   : > { %v12901_v51 = vpop.f32.mrb[106].mxu0 }
 0x562   : > { %14144 = vst [vmem:[#allocation6_spill] sm:$0xff] %v12901_v51  ;;  %v10149_v47 = vpop.f32.mrb[107].mxu0 }
 0x563   : > { %v6380_v23 = vpop.f32.mrb[188].mxu1 }
 0x564   : > { %v12894_v42 = vadd.f32 %v6380_v23, %v12794_v34  ;;  %v10004_v17 = vpop.f32.mrb[189].mxu1 }
 0x565   : > { %v6383_v12 = vpop.f32.mrb[190].mxu1 }
 0x566   : > { %v12897_v14 = vadd.f32 %v6383_v12, %v12800_v54  ;;  %v10005_v36 = vpop.f32.mrb[191].mxu1 }
 0x567   : > { %v12915_v12 = vpop.f32.mrb[108].mxu0 }
 0x568   : > { %14145 = vst [vmem:[#allocation7_spill] sm:$0xff] %v12915_v12  ;;  %v10152_v61 = vpop.f32.mrb[109].mxu0 }
 0x56b   : > { %v6388_v19 = vpop.f32.mrb[192].mxu1 }
 0x56c   : > { %v12904_v15 = vadd.f32 %v6388_v19, %v12810_v18  ;;  %v10008_v39 = vpop.f32.mrb[193].mxu1 }
 0x56d   : > { %v6391_v43 = vpop.f32.mrb[194].mxu1  ;;  %v12922_v39 = vpop.f32.mrb[110].mxu0 }
 0x56e   : > { %v12907_v34 = vadd.f32 %v6391_v43, %v12816_v25  ;;  %v10009_v1 = vpop.f32.mrb[195].mxu1  ;;  %14146 = vst [vmem:[#allocation8_spill] sm:$0xff] %v12922_v39  ;;  %v10153_v43 = vpop.f32.mrb[111].mxu0 }
 0x573   : > { %v6396_v57 = vpop.f32.mrb[196].mxu1 }
 0x574   : > { %v12910_v54 = vadd.f32 %v6396_v57, %v12824_v0  ;;  %v10012_v11 = vpop.f32.mrb[197].mxu1 }
 0x575   : > { %v6399_v2 = vpop.f32.mrb[198].mxu1 }
 0x576   : > { %v12913_v62 = vadd.f32 %v6399_v2, %v12830_v24  ;;  %v10013_v23 = vpop.f32.mrb[199].mxu1 }
 0x57b   : > { %v6510_v17 = vpop.f32.mrb[200].mxu1 }
 0x57c   : > { %v6581_v18 = vadd.f32 %v6510_v17, %v12836_v22  ;;  %v10018_v36 = vpop.f32.mrb[201].mxu1 }
 0x57d   : > { %v6513_v25 = vpop.f32.mrb[202].mxu1 }
 0x57e   : > { %v6582_v47 = vadd.f32 %v6513_v25, %v12841_v32  ;;  %v10019_v19 = vpop.f32.mrb[203].mxu1  ;;  %v12920_v0 = vadd.f32 %v12727_v33, %v6581_v18  ;;  %v12932_v33 = vpop.f32.mrb[112].mxu0 }
 0x57f   : > { %14147 = vst [vmem:[#allocation9_spill] sm:$0xff] %v12932_v33  ;;  %v10156_v17 = vpop.f32.mrb[113].mxu0 }
 0x580   : > { %v12925_v24 = vadd.f32 %v12732_v8, %v6582_v47  ;;  %v12937_v8 = vpop.f32.mrb[114].mxu0 }
 0x581   : > { %14148 = vst [vmem:[#allocation10_spill] sm:$0xff] %v12937_v8  ;;  %v10157_v36 = vpop.f32.mrb[115].mxu0 }
 0x583   : > { %v6518_v1 = vpop.f32.mrb[204].mxu1 }
 0x584   : > { %v6583_v57 = vadd.f32 %v6518_v1, %v12846_v31  ;;  %v10022_v22 = vpop.f32.mrb[205].mxu1  ;;  %v9321_v31 = vld [vmem:[%s10726_s15 + $0x30] sm:$0xff] }
 0x585   : > { %v6521_v11 = vpop.f32.mrb[206].mxu1  ;;  %v7852_v43 = vcombine.high %v9321_v31, %v9321_v31  ;;  %v9322_v22 = vld [vmem:[%s10726_s15 + $0x38] sm:$0xff] }
 0x586   : > { %v6584_v2 = vadd.f32 %v6521_v11, %v12851_v55  ;;  %v10023_v23 = vpop.f32.mrb[207].mxu1  ;;  %v12930_v32 = vadd.f32 %v12743_v5, %v6583_v57  ;;  %v12945_v57 = vpop.f32.mrb[116].mxu0  ;;  %v7859_v11 = vrot.slane %v9321_v31, %v11616_v49 }
 0x587   : > { %14149 = vst [vmem:[#allocation11_spill] sm:$0xff] %v12945_v57  ;;  %v7866_v17 = vrot.slane %v7852_v43, %v11616_v49 }
 0x588   : > { %v12935_v18 = vadd.f32 %v12748_v21, %v6584_v2  ;;  %v10160_v21 = vpop.f32.mrb[117].mxu0 }
 0x589   : > { %v12952_v23 = vpop.f32.mrb[118].mxu0  ;;  %v7868_v43 = vcombine.high %v7866_v17, %v7866_v17 }
 0x58a   : > { %14150 = vst [vmem:[#allocation12_spill] sm:$0xff] %v12952_v23  ;;  %v8191_v23 = vrot.slane %v7866_v17, 7  ;;  %v9353_v17 = vrot.slane %v7859_v11, 9 }
 0x58b   : > { %v6526_v61 = vpop.f32.mrb[208].mxu1 }
 0x58c   : > { %v6585_v25 = vadd.f32 %v6526_v61, %v12856_v9  ;;  %v10026_v55 = vpop.f32.mrb[209].mxu1  ;;  %v10161_v9 = vpop.f32.mrb[119].mxu0  ;;  %v7869_v61 = vcombine.high %v9322_v22, %v9322_v22 }
 0x58d   : > { %v6529_v47 = vpop.f32.mrb[210].mxu1  ;;  %v12965_v9 = vpop.f32.mrb[120].mxu0 }
 0x58e   : > { %v6586_v5 = vadd.f32 %v6529_v47, %v12861_v52  ;;  %v10027_v19 = vpop.f32.mrb[211].mxu1  ;;  %v12943_v1 = vadd.f32 %v12759_v37, %v6585_v25  ;;  %v9324_v52 = vld [vmem:[%s10726_s15 + $0x48] sm:$0xff]  ;;  %v12957_v37 = vrot.slane %v9322_v22, %v11616_v49  ;;  %v7867_v47 = vcombine.high %v7859_v11, %v7859_v11  ;;  %14151 = vst [vmem:[#allocation13_spill] sm:$0xff] %v12965_v9 }
 0x58f   : > { %v7893_v19 = vcombine.high %v9324_v52, %v9324_v52  ;;  %v7883_v22 = vrot.slane %v7869_v61, %v11616_v49 }
 0x590   : > { %v12950_v2 = vadd.f32 %v12764_v3, %v6586_v5 }
 0x591   : > { %v12980_v61 = vrot.slane %v7893_v19, %v11616_v49  ;;  %v12992_v19 = vrot.slane %v8191_v23, 2  ;;  %v8203_v11 = vrot.slane %v7883_v22, 7 }
 0x593   : > { %v6534_v36 = vpop.f32.mrb[212].mxu1  ;;  %14157 = vst [vmem:[#allocation17_spill] sm:$0xff] %v12992_v19  ;;  %v7909_v33 = vcombine.high %v12980_v61, %v12980_v61 }
 0x594   : > { %v6587_v25 = vadd.f32 %v6534_v36, %v12866_v38  ;;  %v10030_v55 = vpop.f32.mrb[213].mxu1  ;;  %v7884_v38 = vcombine.high %v12957_v37, %v12957_v37  ;;  %v10164_v36 = vpop.f32.mrb[121].mxu0 }
 0x595   : > { %v6537_v31 = vpop.f32.mrb[214].mxu1  ;;  %v8188_v55 = vrot.slane %v7867_v47, 7  ;;  %v7885_v36 = vcombine.high %v7883_v22, %v7883_v22 }
 0x596   : > { %v6588_v3 = vadd.f32 %v6537_v31, %v12871_v4  ;;  %v10031_v5 = vpop.f32.mrb[215].mxu1  ;;  %v12963_v21 = vadd.f32 %v12775_v35, %v6587_v25  ;;  %v12973_v4 = vpop.f32.mrb[122].mxu0  ;;  %v8197_v35 = vrot.slane %v12957_v37, 7  ;;  %v12977_v25 = vrot.slane %v9324_v52, %v11616_v49 }
 0x597   : > { %14152 = vst [vmem:[#allocation14_spill] sm:$0xff] %v12973_v4  ;;  %v10165_v31 = vpop.f32.mrb[123].mxu0  ;;  %v12982_v5 = vrot.slane %v7868_v43, 7  ;;  %v8190_v9 = vrot.slane %v8188_v55, 2  ;;  %v13009_v22 = vsel %vm12987_vm12, %v9353_v17, %v8188_v55  ;;  %v13012_v10 = vrot.slane %v7885_v36, 7 }
 0x598   : > { %v12971_v57 = vadd.f32 %v12780_v48, %v6588_v3  ;;  %v12984_v48 = vrot.slane %v7884_v38, 7  ;;  %v9325_v3 = vld [vmem:[%s10726_s15 + $0x50] sm:$0xff]  ;;  %v12994_v8 = vrot.slane %v8197_v35, 2  ;;  %v7908_v38 = vcombine.high %v12977_v25, %v12977_v25 }
 0x599   : > { %14153 = vst [vmem:[#allocation15_spill] sm:$0xff] %v12982_v5  ;;  %v7910_v31 = vcombine.high %v9325_v3, %v9325_v3 }
 0x59a   : > { %14154 = vst [vmem:[#allocation16_spill] sm:$0xff] %v12984_v48  ;;  %14158 = vst [vmem:[#allocation18_spill] sm:$0xff] %v12994_v8  ;;  %v8202_v44 = vrot.slane %v12984_v48, 2  ;;  %v8213_v17 = vrot.slane %v7908_v38, 7  ;;  %v8208_v38 = vrot.slane %v13012_v10, 2  ;;  %v9328_v8 = vld [vmem:[%s10726_s15 + $0x68] sm:$0xff] }
 0x59b   : > { %v6542_v47 = vpop.f32.mrb[216].mxu1 }
 0x59c   : > { %v6589_v52 = vadd.f32 %v6542_v47, %v12876_v30  ;;  %v10034_v37 = vpop.f32.mrb[217].mxu1  ;;  %v8196_v30 = vrot.slane %v12982_v5, 2  ;;  %v7917_v47 = vrot.slane %v9325_v3, %v11616_v49  ;;  %v9345_v3 = vld.sshfl [vmem:[%s10726_s15 + $0x40] sm:$0x3 pattern:$0x76325410] }
 0x59d   : > { %v6545_v43 = vpop.f32.mrb[218].mxu1  ;;  %v9327_v37 = vld [vmem:[%s10726_s15 + $0x60] sm:$0xff]  ;;  %v8215_v19 = vrot.slane %v8213_v17, 2 }
 0x59e   : > { %v6590_v39 = vadd.f32 %v6545_v43, %v12881_v20  ;;  %v10035_v12 = vpop.f32.mrb[219].mxu1  ;;  %v13005_v51 = vadd.f32 %v12791_v26, %v6589_v52  ;;  %v13016_v20 = vsel %vm12987_vm12, %v8190_v9, %v8191_v23  ;;  %v13024_v26 = vrot.slane %v7910_v31, %v11616_v49 }
 0x59f   : > { %v13029_v52 = vrot.slane %v7909_v33, 7  ;;  %v7934_v36 = vcombine.high %v9327_v37, %v9327_v37  ;;  %v13032_v23 = vrot.slane %v9327_v37, %v11616_v49  ;;  %v13036_v9 = vsel %vm12987_vm12, %v8196_v30, %v8197_v35 }
 0x5a0   : > { %v13027_v55 = vadd.f32 %v12796_v53, %v6590_v39  ;;  %14160 = vst [vmem:[#allocation20_spill] sm:$0xff] %v13036_v9  ;;  %v13042_v43 = vrot.slane %v8203_v11, 2  ;;  %v7925_v53 = vcombine.high %v7917_v47, %v7917_v47  ;;  %v13046_v33 = vsel %vm12987_vm12, %v8202_v44, %v8203_v11 }
 0x5a1   : > { %14159 = vst [vmem:[#allocation19_spill] sm:$0xff] %v13029_v52  ;;  %14161 = vst [vmem:[#allocation21_spill] sm:$0xff] %v13046_v33  ;;  %v8209_v37 = vrot.slane %v9345_v3, 7  ;;  %v8216_v12 = vrot.slane %v12980_v61, 7  ;;  %v9354_v9 = vrot.slane %v12977_v25, 9  ;;  %v7926_v31 = vcombine.high %v13024_v26, %v13024_v26 }
 0x5a2   : > { %v8222_v48 = vrot.slane %v7917_v47, 7  ;;  %v8221_v44 = vrot.slane %v13029_v52, 2  ;;  %v7948_v11 = vrot.slane %v7934_v36, %v11616_v49  ;;  %v7949_v61 = vcombine.high %v13032_v23, %v13032_v23 }
 0x5a3   : > { %v6550_v39 = vpop.f32.mrb[220].mxu1  ;;  %v7951_v25 = vcombine.high %v9328_v8, %v9328_v8  ;;  %v13071_v36 = vsel %vm12987_vm12, %v8208_v38, %v8209_v37  ;;  %v13073_v33 = vrot.slane %v8216_v12, 2  ;;  %v13091_v38 = vsel %vm12987_vm12, %v8215_v19, %v8216_v12 }
 0x5a4   : > { %v6591_v35 = vadd.f32 %v6550_v39, %v12886_v45  ;;  %v10038_v30 = vpop.f32.mrb[221].mxu1  ;;  %v13060_v39 = vrot.slane %v7925_v53, 7  ;;  %14163 = vst [vmem:[#allocation23_spill] sm:$0xff] %v13071_v36  ;;  %v13083_v53 = vrot.slane %v7926_v31, 7  ;;  %14167 = vst [vmem:[#allocation27_spill] sm:$0xff] %v13091_v38  ;;  %v13093_v37 = vrot.slane %v8222_v48, 2 }
 0x5a5   : > { %v6553_v5 = vpop.f32.mrb[222].mxu1  ;;  %14164 = vst [vmem:[#allocation24_spill] sm:$0xff] %v13073_v33  ;;  %v8241_v47 = vrot.slane %v7948_v11, 7  ;;  %v7950_v31 = vcombine.high %v7948_v11, %v7948_v11  ;;  %v9355_v19 = vrot.slane %v13032_v23, 9 }
 0x5a6   : > { %v6592_v45 = vadd.f32 %v6553_v5, %v12891_v16  ;;  %v10039_v3 = vpop.f32.mrb[223].mxu1  ;;  %v13063_v30 = vadd.f32 %v12807_v50, %v6591_v35  ;;  %v13076_v16 = vrot.slane %v9328_v8, %v11616_v49  ;;  %v13080_v5 = vsel %vm12987_vm12, %v9354_v9, %v8213_v17  ;;  %v9330_v35 = vld [vmem:[%s10726_s15 + $0x78] sm:$0xff] }
 0x5a7   : > { %14165 = vst [vmem:[#allocation25_spill] sm:$0xff] %v13080_v5  ;;  %v8228_v50 = vrot.slane %v13024_v26, 7  ;;  %v8238_v8 = vrot.slane %v7949_v61, 7  ;;  %v13097_v17 = vsel %vm12987_vm12, %v8221_v44, %v8222_v48  ;;  %v8227_v26 = vrot.slane %v13060_v39, 2 }
 0x5a8   : > { %14162 = vst [vmem:[#allocation22_spill] sm:$0xff] %v13063_v30  ;;  %v13087_v3 = vadd.f32 %v12812_v6, %v6592_v45  ;;  %14168 = vst [vmem:[#allocation28_spill] sm:$0xff] %v13097_v17  ;;  %v9346_v9 = vld.sshfl [vmem:[%s10726_s15 + $0x58] sm:$0x3 pattern:$0x76325410]  ;;  %v13102_v30 = vrot.slane %v7951_v25, %v11616_v49  ;;  %v7966_v12 = vcombine.high %v13076_v16, %v13076_v16 }
 0x5a9   : > { %v8247_v48 = vrot.slane %v13076_v16, 7  ;;  %v7975_v44 = vcombine.high %v9330_v35, %v9330_v35  ;;  %v13112_v11 = vrot.slane %v8228_v50, 2  ;;  %v8233_v25 = vrot.slane %v13083_v53, 2  ;;  %v9331_v16 = vld [vmem:[%s10726_s15 + $0x80] sm:$0xff] }
 0x5aa   : > { %14166 = vst [vmem:[#allocation26_spill] sm:$0xff] %v13087_v3  ;;  %v13116_v3 = vrot.slane %v9330_v35, %v11616_v49  ;;  %v8234_v38 = vrot.slane %v9346_v9, 7  ;;  %v8240_v52 = vrot.slane %v8238_v8, 2  ;;  %v13119_v33 = vrot.slane %v8241_v47, 2 }
 0x5ab   : > { %v6558_v6 = vpop.f32.mrb[224].mxu1  ;;  %v13134_v9 = vrot.slane %v8247_v48, 2  ;;  %v13136_v36 = vrot.slane %v7966_v12, 7  ;;  %v13163_v23 = vsel %vm12987_vm12, %v9355_v19, %v8238_v8 }
 0x5ac   : > { %v6593_v61 = vadd.f32 %v6558_v6, %v12894_v42  ;;  %v10042_v45 = vpop.f32.mrb[225].mxu1  ;;  %14169 = vst [vmem:[#allocation29_spill] sm:$0xff] %v13119_v33  ;;  %v13123_v6 = vrot.slane %v7950_v31, 7  ;;  %v7992_v31 = vcombine.high %v9331_v16, %v9331_v16  ;;  %14175 = vst [vmem:[#allocation35_spill] sm:$0xff] %v13163_v23  ;;  %v9334_v33 = vld [vmem:[%s10726_s15 + $0x98] sm:$0xff] }
 0x5ad   : > { %v6561_v17 = vpop.f32.mrb[226].mxu1  ;;  %v7967_v45 = vcombine.high %v13102_v30, %v13102_v30  ;;  %14172 = vst [vmem:[#allocation32_spill] sm:$0xff] %v13134_v9  ;;  %14173 = vst [vmem:[#allocation33_spill] sm:$0xff] %v13136_v36 }
 0x5ae   : > { %v6594_v5 = vadd.f32 %v6561_v17, %v12897_v14  ;;  %v10043_v42 = vpop.f32.mrb[227].mxu1  ;;  %14170 = vst [vmem:[#allocation30_spill] sm:$0xff] %v13123_v6  ;;  %v13128_v35 = vadd.f32 %v12821_v40, %v6593_v61  ;;  %v7989_v14 = vrot.slane %v7975_v44, %v11616_v49  ;;  %v13141_v17 = vsel %vm12987_vm12, %v8227_v26, %v8228_v50  ;;  %v9333_v61 = vld [vmem:[%s10726_s15 + $0x90] sm:$0xff] }
 0x5af   : > { %v7990_v40 = vcombine.high %v13116_v3, %v13116_v3  ;;  %v13155_v44 = vsel %vm12987_vm12, %v8233_v25, %v8234_v38  ;;  %v8253_v50 = vrot.slane %v13102_v30, 7  ;;  %v13159_v26 = vrot.slane %v9331_v16, %v11616_v49  ;;  %v9347_v19 = vld.sshfl [vmem:[%s10726_s15 + $0x70] sm:$0x3 pattern:$0x76325410] }
 0x5b0   : > { %14171 = vst [vmem:[#allocation31_spill] sm:$0xff] %v13128_v35  ;;  %v13147_v42 = vadd.f32 %v12826_v56, %v6594_v5  ;;  %v13167_v56 = vsel %vm12987_vm12, %v8240_v52, %v8241_v47  ;;  %v13173_v38 = vrot.slane %v7967_v45, 7  ;;  %v8246_v30 = vrot.slane %v13123_v6, 2 }
 0x5b1   : > { %14176 = vst [vmem:[#allocation36_spill] sm:$0xff] %v13167_v56  ;;  %v7991_v16 = vcombine.high %v7989_v14, %v7989_v14  ;;  %v8016_v12 = vcombine.high %v9333_v61, %v9333_v61  ;;  %v8266_v35 = vrot.slane %v7989_v14, 7  ;;  %v13183_v45 = vrot.slane %v7992_v31, %v11616_v49 }
 0x5b2   : > { %14174 = vst [vmem:[#allocation34_spill] sm:$0xff] %v13147_v42  ;;  %v8263_v42 = vrot.slane %v7990_v40, 7  ;;  %v8252_v56 = vrot.slane %v13136_v36, 2  ;;  %v13186_v23 = vrot.slane %v8253_v50, 2  ;;  %v8007_v8 = vcombine.high %v13159_v26, %v13159_v26 }
 0x5b3   : > { %v6566_v25 = vpop.f32.mrb[228].mxu1  ;;  %v13191_v9 = vrot.slane %v9333_v61, %v11616_v49  ;;  %v8258_v40 = vrot.slane %v13173_v38, 2  ;;  %v8259_v14 = vrot.slane %v9347_v19, 7  ;;  %v9356_v36 = vrot.slane %v13116_v3, 9 }
 0x5b4   : > { %v6595_v52 = vadd.f32 %v6566_v25, %v12904_v15  ;;  %v10046_v47 = vpop.f32.mrb[229].mxu1  ;;  %v13203_v6 = vrot.slane %v7991_v16, 7  ;;  %v13207_v61 = vrot.slane %v8016_v12, %v11616_v49  ;;  %v8008_v19 = vcombine.high %v13183_v45, %v13183_v45 }
 0x5b5   : > { %v6569_v5 = vpop.f32.mrb[230].mxu1  ;;  %v13200_v47 = vsel %vm12987_vm12, %v8246_v30, %v8247_v48  ;;  %v8272_v48 = vrot.slane %v13159_v26, 7  ;;  %v13217_v30 = vrot.slane %v8007_v8, 7  ;;  %v8278_v3 = vrot.slane %v13183_v45, 7 }
 0x5b6   : > { %v6596_v15 = vadd.f32 %v6569_v5, %v12907_v34  ;;  %v10047_v25 = vpop.f32.mrb[231].mxu1  ;;  %v13196_v31 = vadd.f32 %v12833_v7, %v6595_v52  ;;  %14178 = vst [vmem:[#allocation38_spill] sm:$0xff] %v13203_v6  ;;  %v8265_v34 = vrot.slane %v8263_v42, 2  ;;  %v13209_v5 = vrot.slane %v8266_v35, 2 }
 0x5b7   : > { %v8031_v12 = vcombine.high %v13191_v9, %v13191_v9  ;;  %v13224_v16 = vsel %vm12987_vm12, %v8252_v56, %v8253_v50  ;;  %v13232_v26 = vsel %vm12987_vm12, %v8258_v40, %v8259_v14  ;;  %v13235_v8 = vrot.slane %v9334_v33, %v11616_v49 }
 0x5b8   : > { %14177 = vst [vmem:[#allocation37_spill] sm:$0xff] %v13196_v31  ;;  %14179 = vst [vmem:[#allocation39_spill] sm:$0xff] %v13209_v5  ;;  %v13214_v7 = vadd.f32 %v12838_v63, %v6596_v15  ;;  %v13239_v45 = vsel %vm12987_vm12, %v9356_v36, %v8263_v42  ;;  %v8271_v50 = vrot.slane %v13203_v6, 2  ;;  %v8032_v56 = vcombine.high %v13207_v61, %v13207_v61 }
 0x5b9   : > { %14181 = vst [vmem:[#allocation41_spill] sm:$0xff] %v13232_v26  ;;  %14182 = vst [vmem:[#allocation42_spill] sm:$0xff] %v13239_v45  ;;  %v8033_v15 = vcombine.high %v9334_v33, %v9334_v33  ;;  %v13247_v40 = vsel %vm12987_vm12, %v8265_v34, %v8266_v35  ;;  %v9348_v36 = vld.sshfl [vmem:[%s10726_s15 + $0x88] sm:$0x3 pattern:$0x76325410] }
 0x5ba   : > { %14180 = vst [vmem:[#allocation40_spill] sm:$0xff] %v13214_v7  ;;  %14183 = vst [vmem:[#allocation43_spill] sm:$0xff] %v13247_v40  ;;  %v13254_v42 = vrot.slane %v8008_v19, 7  ;;  %v13256_v31 = vrot.slane %v8272_v48, 2  ;;  %v8277_v33 = vrot.slane %v13217_v30, 2  ;;  %v13259_v45 = vrot.slane %v8278_v3, 2 }
 0x5bb   : > { %v6574_v52 = vpop.f32.mrb[232].mxu1  ;;  %v8291_v19 = vrot.slane %v13207_v61, 7  ;;  %v13269_v6 = vrot.slane %v8032_v56, 7  ;;  %v8297_v5 = vrot.slane %v13235_v8, 7 }
 0x5bc   : > { %v6597_v25 = vadd.f32 %v6574_v52, %v12910_v54  ;;  %v10050_v63 = vpop.f32.mrb[233].mxu1  ;;  %14184 = vst [vmem:[#allocation44_spill] sm:$0xff] %v13254_v42  ;;  %14185 = vst [vmem:[#allocation45_spill] sm:$0xff] %v13259_v45  ;;  %v8288_v54 = vrot.slane %v8031_v12, 7  ;;  %v8048_v52 = vcombine.high %v13235_v8, %v13235_v8  ;;  %v8047_v12 = vrot.slane %v8033_v15, %v11616_v49 }
 0x5bd   : > { %v6577_v7 = vpop.f32.mrb[234].mxu1  ;;  %v9336_v63 = vld [vmem:[%s10726_s15 + $0xa8] sm:$0xff]  ;;  %14187 = vst [vmem:[#allocation47_spill] sm:$0xff] %v13269_v6  ;;  %v8283_v26 = vrot.slane %v13254_v42, 2  ;;  %v9357_v8 = vrot.slane %v13191_v9, 9  ;;  %v13291_v15 = vsel %vm12987_vm12, %v8277_v33, %v8278_v3  ;;  %v8296_v9 = vrot.slane %v13269_v6, 2 }
 0x5be   : > { %v6598_v35 = vadd.f32 %v6577_v7, %v12913_v62  ;;  %v10051_v34 = vpop.f32.mrb[235].mxu1  ;;  %v8057_v40 = vcombine.high %v9336_v63, %v9336_v63  ;;  %v13266_v14 = vadd.f32 %v12843_v58, %v6597_v25  ;;  %v8284_v62 = vrot.slane %v9348_v36, 7  ;;  %14189 = vst [vmem:[#allocation49_spill] sm:$0xff] %v13291_v15 }
 0x5bf   : > { %v13275_v7 = vrot.slane %v9336_v63, %v11616_v49  ;;  %v13282_v58 = vsel %vm12987_vm12, %v8271_v50, %v8272_v48  ;;  %v8290_v56 = vrot.slane %v8288_v54, 2  ;;  %v13297_v25 = vrot.slane %v8048_v52, 7  ;;  %v9337_v50 = vld [vmem:[%s10726_s15 + $0xb0] sm:$0xff] }
 0x5c0   : > { %14186 = vst [vmem:[#allocation46_spill] sm:$0xff] %v13266_v14  ;;  %v13278_v34 = vadd.f32 %v12848_v28, %v6598_v35  ;;  %v13300_v48 = vrot.slane %v8057_v40, %v11616_v49  ;;  %v13303_v63 = vrot.slane %v8291_v19, 2  ;;  %v8049_v35 = vcombine.high %v8047_v12, %v8047_v12 }
 0x5c1   : > { %14190 = vst [vmem:[#allocation50_spill] sm:$0xff] %v13297_v25  ;;  %v13306_v3 = vrot.slane %v8297_v5, 2  ;;  %v13311_v52 = vsel %vm12987_vm12, %v8283_v26, %v8284_v62  ;;  %v8303_v28 = vrot.slane %v8047_v12, 7  ;;  %v8072_v40 = vcombine.high %v13275_v7, %v13275_v7 }
 0x5c2   : > { %14188 = vst [vmem:[#allocation48_spill] sm:$0xff] %v13278_v34  ;;  %14192 = vst [vmem:[#allocation52_spill] sm:$0xff] %v13311_v52  ;;  %v13318_v34 = vld [vmem:[%s13998_s4] ss:$0 sm:$0xff]  ;;  %v13322_v42 = vsel %vm12987_vm12, %v9357_v8, %v8288_v54  ;;  %v8074_v26 = vcombine.high %v9337_v50, %v9337_v50  ;;  %v8081_v12 = vrot.slane %v9337_v50, %v11616_v49  ;;  %v8302_v45 = vrot.slane %v13297_v25, 2 }
 0x5c3   : > { %v6999_v36 = vpop.f32.mrb[236].mxu1  ;;  %14191 = vst [vmem:[#allocation51_spill] sm:$0xff] %v13306_v3  ;;  %v9349_v52 = vld.sshfl [vmem:[%s10726_s15 + $0xa0] sm:$0x3 pattern:$0x76325410]  ;;  %v8073_v15 = vcombine.high %v13300_v48, %v13300_v48 }
 0x5c4   : > { %v7070_v33 = vadd.f32 %v6999_v36, %v12920_v0  ;;  %v10094_v61 = vpop.f32.mrb[237].mxu1  ;;  %v13326_v0 = vsel %vm12987_vm12, %v8290_v56, %v8291_v19  ;;  %v13341_v19 = vsel %vm12987_vm12, %v8296_v9, %v8297_v5  ;;  %v13353_v56 = vrot.slane %v8303_v28, 2 }
 0x5c5   : > { %v7002_v14 = vpop.f32.mrb[238].mxu1  ;;  %14193 = vst [vmem:[#allocation53_spill] sm:$0xff] %v13341_v19  ;;  %v8313_v50 = vrot.slane %v8072_v40, 7  ;;  %v8088_v5 = vrot.slane %v8074_v26, %v11616_v49  ;;  %v8089_v9 = vcombine.high %v8081_v12, %v8081_v12  ;;  %v8322_v40 = vrot.slane %v8081_v12, 7 }
 0x5c6   : > { %v7248_v62 = vadd.f32 %v12853_v46, %v7070_v33  ;;  %v7071_v61 = vadd.f32 %v7002_v14, %v12925_v24  ;;  %v10095_v36 = vpop.f32.mrb[239].mxu1  ;;  %v13347_v24 = vrot.slane %v8049_v35, 7  ;;  %v8309_v33 = vrot.slane %v9349_v52, 7 }
 0x5c7   : > { %v8316_v36 = vrot.slane %v13300_v48, 7  ;;  %v13363_v35 = vsel %vm12987_vm12, %v8302_v45, %v8303_v28  ;;  %v9358_v48 = vrot.slane %v13275_v7, 9  ;;  %v8315_v19 = vrot.slane %v8313_v50, 2 }
 0x5c8   : > { %v13350_v14 = vadd.f32 %v13318_v34, %v7248_v62  ;;  %v7249_v8 = vadd.f32 %v12858_v13, %v7071_v61  ;;  %14194 = vst [vmem:[#allocation54_spill] sm:$0xff] %v13363_v35  ;;  %v13365_v62 = vrot.slane %v8073_v15, 7  ;;  %v9339_v13 = vld [vmem:[%s10726_s15 + $0xc0] sm:$0xff]  ;;  %v8308_v52 = vrot.slane %v13347_v24, 2 }
 0x5c9   : > { %v8098_v26 = vcombine.high %v9339_v13, %v9339_v13  ;;  %v13372_v45 = vrot.slane %v8316_v36, 2  ;;  %v8090_v15 = vcombine.high %v8088_v5, %v8088_v5  ;;  %v13374_v28 = vrot.slane %v8089_v9, 7 }
 0x5ca   : > { %v9301_v54 = vmul.f32 -1.442695, %v13350_v14  ;;  %v13359_v46 = vadd.f32 %v13318_v34, %v7249_v8  ;;  %14195 = vst [vmem:[#allocation55_spill] sm:$0xff] %v13365_v62  ;;  %v13377_v35 = vrot.slane %v9339_v13, %v11616_v49  ;;  %v13388_v9 = vsel %vm12987_vm12, %v8308_v52, %v8309_v33 }
 0x5cb   : > { %v7007_v61 = vpop.f32.mrb[240].mxu1  ;;  %14196 = vst [vmem:[#allocation56_spill] sm:$0xff] %v13372_v45  ;;  %14197 = vst [vmem:[#allocation57_spill] sm:$0xff] %v13374_v28  ;;  %v13390_v13 = vrot.slane %v8322_v40, 2  ;;  %v13406_v33 = vsel %vm12987_vm12, %v8315_v19, %v8316_v36  ;;  %v8327_v52 = vrot.slane %v13374_v28, 2 }
 0x5cc   : > { %10524 = vpow2.f32 %v9301_v54  ;;  %v9302_v25 = vmul.f32 -1.442695, %v13359_v46  ;;  %v7072_v8 = vadd.f32 %v7007_v61, %v12930_v32  ;;  %v10098_v3 = vpop.f32.mrb[241].mxu1  ;;  %v8321_v32 = vrot.slane %v13365_v62, 2  ;;  %14198 = vst [vmem:[#allocation58_spill] sm:$0xff] %v13388_v9  ;;  %14201 = vst [vmem:[#allocation61_spill] sm:$0xff] %v13406_v33 }
 0x5cd   : > { %v7010_v6 = vpop.f32.mrb[242].mxu1  ;;  %14199 = vst [vmem:[#allocation59_spill] sm:$0xff] %v13390_v13  ;;  %v8328_v61 = vrot.slane %v8088_v5, 7 }
 0x5ce   : > { %10526 = vpow2.f32 %v9302_v25  ;;  %v7250_v7 = vadd.f32 %v12863_v60, %v7072_v8  ;;  %v7073_v12 = vadd.f32 %v7010_v6, %v12935_v18  ;;  %v10099_v54 = vpop.f32.mrb[243].mxu1  ;;  %v13393_v25 = vrot.slane %v8098_v26, %v11616_v49  ;;  %v9340_v8 = vld [vmem:[%s10726_s15 + $0xc8] sm:$0xff]  ;;  %v9350_v36 = vld.sshfl [vmem:[%s10726_s15 + $0xb8] sm:$0x3 pattern:$0x76325410] }
 0x5cf   : > { %v13401_v6 = vsel %vm12987_vm12, %v9358_v48, %v8313_v50  ;;  %v13409_v54 = vrot.slane %v8090_v15, 7  ;;  %v8113_v26 = vcombine.high %v13377_v35, %v13377_v35  ;;  %v13423_v19 = vsel %vm12987_vm12, %v8321_v32, %v8322_v40 }
 0x5d0   : > { %v13396_v60 = vadd.f32 %v13318_v34, %v7250_v7  ;;  %v7251_v18 = vadd.f32 %v12868_v29, %v7073_v12  ;;  %14200 = vst [vmem:[#allocation60_spill] sm:$0xff] %v13401_v6  ;;  %14203 = vst [vmem:[#allocation63_spill] sm:$0xff] %v13423_v19  ;;  %v8114_v15 = vcombine.high %v13393_v25, %v13393_v25  ;;  %v13435_v32 = vrot.slane %v8328_v61, 2 }
 0x5d1   : > { %14202 = vst [vmem:[#allocation62_spill] sm:$0xff] %v13409_v54  ;;  %v8115_v12 = vcombine.high %v9340_v8, %v9340_v8  ;;  %v13439_v45 = vsel %vm12987_vm12, %v8327_v52, %v8328_v61  ;;  %v8333_v48 = vrot.slane %v13409_v54, 2  ;;  %v8334_v28 = vrot.slane %v9350_v36, 7  ;;  %v13449_v61 = vld [vmem:[%s10726_s15 + $0xd8] sm:$0xff] }
 0x5d2   : > { %v9303_v7 = vmul.f32 -1.442695, %v13396_v60  ;;  %v13415_v29 = vadd.f32 %v13318_v34, %v7251_v18  ;;  %v8122_v18 = vrot.slane %v9340_v8, %v11616_v49  ;;  %14204 = vst [vmem:[#allocation64_spill] sm:$0xff] %v13435_v32  ;;  %v8338_v13 = vrot.slane %v8113_v26, 7 }
 0x5d3   : > { %v7015_v5 = vpop.f32.mrb[244].mxu1  ;;  %v8129_v33 = vrot.slane %v8115_v12, %v11616_v49  ;;  %v13446_v9 = vrot.slane %v8114_v15, 7 }
 0x5d4   : > { %10528 = vpow2.f32 %v9303_v7  ;;  %v9304_v50 = vmul.f32 -1.442695, %v13415_v29  ;;  %v7074_v3 = vadd.f32 %v7015_v5, %v12943_v1  ;;  %v10102_v40 = vpop.f32.mrb[245].mxu1  ;;  %v8341_v5 = vrot.slane %v13393_v25, 7 }
 0x5d5   : > { %v7018_v62 = vpop.f32.mrb[246].mxu1  ;;  %v8130_v6 = vcombine.high %v8122_v18, %v8122_v18  ;;  %14205 = vst [vmem:[#allocation65_spill] sm:$0xff] %v13446_v9  ;;  %v8340_v25 = vrot.slane %v8338_v13, 2 }
 0x5d6   : > { %v10525_v19 = vpop.eup %10524  ;;  %10530 = vpow2.f32 %v9304_v50  ;;  %v7252_v8 = vadd.f32 %v12873_v41, %v7074_v3  ;;  %v7075_v7 = vadd.f32 %v7018_v62, %v12950_v2  ;;  %v10103_v1 = vpop.f32.mrb[247].mxu1  ;;  %v8347_v2 = vrot.slane %v8122_v18, 7 }
 0x5d7   : > { %v7345_v40 = vadd.f32 1.0, %v10525_v19  ;;  %v9359_v3 = vrot.slane %v13377_v35, 9  ;;  %v13464_v15 = vrot.slane %v8341_v5, 2  ;;  %v8346_v18 = vrot.slane %v13446_v9, 2 }
 0x5d8   : > { %v10527_v52 = vpop.eup %10526  ;;  %v13452_v26 = vadd.f32 %v13318_v34, %v7252_v8  ;;  %v7253_v50 = vadd.f32 %v12878_v27, %v7075_v7  ;;  %v13468_v27 = vrot.slane %v13449_v61, %v11616_v49  ;;  %v13471_v8 = vrot.slane %v8130_v6, 7 }
 0x5d9   : > { %10532 = vrcp.f32 %v7345_v40  ;;  %v7346_v62 = vadd.f32 1.0, %v10527_v52  ;;  %14206 = vst [vmem:[#allocation66_spill] sm:$0xff] %v13464_v15  ;;  %v8353_v7 = vrot.slane %v8129_v33, 7  ;;  %v13475_v52 = vrot.slane %v8347_v2, 2 }
 0x5da   : > { %v9305_v19 = vmul.f32 -1.442695, %v13452_v26  ;;  %v13462_v36 = vadd.f32 %v13318_v34, %v7253_v50  ;;  %14207 = vst [vmem:[#allocation67_spill] sm:$0xff] %v13471_v8  ;;  %v13483_v6 = vsel %vm12987_vm12, %v9359_v3, %v8338_v13  ;;  %v8131_v41 = vcombine.high %v8129_v33, %v8129_v33 }
 0x5db   : > { %10534 = vrcp.f32 %v7346_v62  ;;  %v7023_v12 = vpop.f32.mrb[248].mxu1  ;;  %14208 = vst [vmem:[#allocation68_spill] sm:$0xff] %v13475_v52  ;;  %v13479_v62 = vsel %vm12987_vm12, %v8333_v48, %v8334_v28  ;;  %14210 = vst [vmem:[#allocation70_spill] sm:$0xff] %v13483_v6  ;;  %v13496_v48 = vld [vmem:[%s10726_s15 + $0xe0] sm:$0xff]  ;;  %v8352_v33 = vrot.slane %v13471_v8, 2 }
 0x5dc   : > { %10536 = vpow2.f32 %v9305_v19  ;;  %v9306_v35 = vmul.f32 -1.442695, %v13462_v36  ;;  %v7076_v1 = vadd.f32 %v7023_v12, %v12963_v21  ;;  %v10106_v40 = vpop.f32.mrb[249].mxu1  ;;  %14209 = vst [vmem:[#allocation69_spill] sm:$0xff] %v13479_v62  ;;  %v13487_v19 = vsel %vm12987_vm12, %v8340_v25, %v8341_v5  ;;  %v14225_v62 = vld [vmem:[#allocation21_spill] sm:$0xff] }
 0x5dd   : > { %v7026_v50 = vpop.f32.mrb[250].mxu1  ;;  %14211 = vst [vmem:[#allocation71_spill] sm:$0xff] %v13487_v19  ;;  %v13500_v5 = vsel %vm12987_vm12, %v8346_v18, %v8347_v2  ;;  %v13504_v3 = vld.sshfl [vmem:[%s10726_s15 + $0xd0] sm:$0x3 pattern:$0x76325410] }
 0x5de   : > { %v10529_v54 = vpop.eup %10528  ;;  %10538 = vpow2.f32 %v9306_v35  ;;  %v7254_v21 = vadd.f32 %v12883_v59, %v7076_v1  ;;  %v7077_v12 = vadd.f32 %v7026_v50, %v12971_v57  ;;  %v10107_v40 = vpop.f32.mrb[251].mxu1  ;;  %14212 = vst [vmem:[#allocation72_spill] sm:$0xff] %v13500_v5  ;;  %v8154_v59 = vcombine.high %v13468_v27, %v13468_v27  ;;  %v14213_v35 = vld [vmem:[#allocation4_spill] sm:$0xff] }
 0x5df   : > { %v7347_v13 = vadd.f32 1.0, %v10529_v54  ;;  %v13516_v2 = vrot.slane %v8353_v7, 2  ;;  %v13518_v50 = vrot.slane %v8131_v41, 7  ;;  %v8139_v40 = vcombine.high %v13449_v61, %v13449_v61 }
 0x5e0   : > { %v10531_v57 = vpop.eup %10530  ;;  %v13509_v25 = vadd.f32 %v13318_v34, %v7254_v21  ;;  %v7255_v1 = vadd.f32 %v14213_v35, %v7077_v12  ;;  %v13529_v35 = vrot.slane %v13496_v48, %v11616_v49  ;;  %v13533_v41 = vsel %vm12987_vm12, %v8352_v33, %v8353_v7  ;;  %v14216_v7 = vld [vmem:[#allocation5_spill] sm:$0xff] }
 0x5e1   : > { %14214 = vst [vmem:[#allocation4_spill] sm:$0xff] %v13516_v2  ;;  %10540 = vrcp.f32 %v7347_v13  ;;  %v7348_v18 = vadd.f32 1.0, %v10531_v57  ;;  %14215 = vst [vmem:[#allocation73_spill] sm:$0xff] %v13533_v41  ;;  %v13536_v57 = vrot.slane %v8154_v59, 7  ;;  %v13547_v59 = vrot.slane %v8139_v40, %v11616_v49 }
 0x5e2   : > { %v9307_v28 = vmul.f32 -1.442695, %v13509_v25  ;;  %v13524_v21 = vadd.f32 %v13318_v34, %v7255_v1 }
 0x5e3   : > { %v10533_v54 = vpop.eup %10532  ;;  %10542 = vrcp.f32 %v7348_v18  ;;  %v7031_v13 = vpop.f32.mrb[252].mxu1 }
 0x5e4   : > { %v7399_v1 = vmul.f32 %v10533_v54, %v13350_v14  ;;  %10544 = vpow2.f32 %v9307_v28  ;;  %v9308_v12 = vmul.f32 -1.442695, %v13524_v21  ;;  %v7078_v8 = vadd.f32 %v7031_v13, %v13005_v51  ;;  %v10110_v52 = vpop.f32.mrb[253].mxu1 }
 0x5e5   : > { %v10535_v5 = vpop.eup %10534  ;;  %v7034_v9 = vpop.f32.mrb[254].mxu1 }
 0x5e6   : > { %v10537_v28 = vpop.eup %10536  ;;  %v7435_v54 = vcombine.high %v7399_v1, %v7399_v1  ;;  %v7442_v51 = vrot.slane %v7399_v1, %v11616_v49  ;;  %v7400_v52 = vmul.f32 %v10535_v5, %v13359_v46  ;;  %v10111_v18 = vpop.f32.mrb[255].mxu1  ;;  %10546 = vpow2.f32 %v9308_v12 }
 0x5e7   : > { %v7349_v61 = vadd.f32 1.0, %v10537_v28  ;;  %v7256_v33 = vadd.f32 %v14216_v7, %v7078_v8  ;;  %v7079_v40 = vadd.f32 %v7034_v9, %v13027_v55  ;;  %v14217_v55 = vld [vmem:[#allocation17_spill] sm:$0xff]  ;;  %v14218_v9 = vld [vmem:[#allocation15_spill] sm:$0xff] }
 0x5e8   : > { %v10539_v2 = vpop.eup %10538  ;;  %v7449_v41 = vrot.slane %v7435_v54, %v11616_v49  ;;  %v7450_v14 = vcombine.high %v7442_v51, %v7442_v51  ;;  %v8450_v15 = vadd.f32 %v13009_v22, %v7442_v51  ;;  %v7452_v19 = vcombine.high %v7400_v52, %v7400_v52 }
 0x5e9   : > { %v7459_v1 = vrot.slane %v7400_v52, %v11616_v49  ;;  %10548 = vrcp.f32 %v7349_v61  ;;  %v7350_v46 = vadd.f32 1.0, %v10539_v2  ;;  %v13561_v5 = vadd.f32 %v13318_v34, %v7256_v33  ;;  %v14220_v61 = vld [vmem:[#allocation18_spill] sm:$0xff]  ;;  %v14221_v2 = vld [vmem:[#allocation16_spill] sm:$0xff] }
 0x5ea   : > { %v7451_v28 = vcombine.high %v7449_v41, %v7449_v41  ;;  %v8451_v12 = vadd.f32 %v13016_v20, %v7450_v14  ;;  %v14219_v8 = vsel %vm12987_vm12, %v14217_v55, %v14218_v9  ;;  %v7466_v54 = vrot.slane %v7452_v19, %v11616_v49  ;;  %v14223_v14 = vld [vmem:[#allocation20_spill] sm:$0xff] }
 0x5eb   : > { %v8452_v7 = vadd.f32 %v14219_v8, %v7449_v41  ;;  %v10541_v22 = vpop.eup %10540  ;;  %v7467_v51 = vcombine.high %v7459_v1, %v7459_v1  ;;  %v14222_v52 = vsel %vm12987_vm12, %v14220_v61, %v14221_v2  ;;  %10550 = vrcp.f32 %v7350_v46  ;;  %v13576_v20 = vpop.f32.mrb[16].mxu1  ;;  %v14226_v46 = vld [vmem:[#allocation6_spill] sm:$0xff] }
 0x5ec   : > { %v8454_v33 = vadd.f32 %v14222_v52, %v7459_v1  ;;  %v9309_v18 = vmul.f32 -1.442695, %v13561_v5  ;;  %v8453_v13 = vadd.f32 %v14223_v14, %v7451_v28  ;;  %v8578_v6 = vcombine.low %v8450_v15, %v8451_v12  ;;  %v10114_v9 = vpop.f32.mrb[17].mxu1  ;;  %v14227_v14 = vld [vmem:[#allocation23_spill] sm:$0xff] }
 0x5ed   : > { %v7468_v55 = vcombine.high %v7466_v54, %v7466_v54  ;;  %v14224_v19 = vsel %vm12987_vm12, %v13042_v43, %v13012_v10  ;;  %v10543_v8 = vpop.eup %10542  ;;  %v8455_v61 = vadd.f32 %v14225_v62, %v7467_v51  ;;  %v7401_v1 = vmul.f32 %v10541_v22, %v13396_v60  ;;  %v13587_v52 = vpop.f32.mrb[18].mxu1 }
 0x5ee   : > { %v8456_v41 = vadd.f32 %v14224_v19, %v7466_v54  ;;  %10552 = vpow2.f32 %v9309_v18  ;;  %v7257_v2 = vadd.f32 %v14226_v46, %v7079_v40  ;;  %v10545_v28 = vpop.eup %10544  ;;  %v8579_v15 = vcombine.low %v8452_v7, %v8453_v13  ;;  %v10115_v43 = vpop.f32.mrb[19].mxu1  ;;  %v14229_v46 = vld [vmem:[#allocation27_spill] sm:$0xff] }
 0x5ef   : > { %v8586_v12 = vrot.slane %v8578_v6, %v11616_v49  ;;  %v8457_v32 = vadd.f32 %v14227_v14, %v7468_v55  ;;  %v7402_v10 = vmul.f32 %v10543_v8, %v13415_v29  ;;  %v8595_v54 = vcombine.low %v8454_v33, %v8455_v61 }
 0x5f0   : > { %v7469_v19 = vcombine.high %v7401_v1, %v7401_v1  ;;  %v7476_v62 = vrot.slane %v7401_v1, %v11616_v49  ;;  %v7351_v51 = vadd.f32 1.0, %v10545_v28  ;;  %v8593_v60 = vrot.slane %v8579_v15, %v11616_v49  ;;  %v10547_v13 = vpop.eup %10546  ;;  %v14230_v15 = vld [vmem:[#allocation28_spill] sm:$0xff] }
 0x5f1   : > { %v8596_v22 = vcombine.low %v8456_v41, %v8457_v32  ;;  %v7486_v40 = vcombine.high %v7402_v10, %v7402_v10  ;;  %v7493_v18 = vrot.slane %v7402_v10, %v11616_v49  ;;  %v8603_v6 = vrot.slane %v8595_v54, %v11616_v49  ;;  %v14228_v32 = vld [vmem:[#allocation25_spill] sm:$0xff] }
 0x5f2   : > { %v7483_v7 = vrot.slane %v7469_v19, %v11616_v49  ;;  %v7484_v55 = vcombine.high %v7476_v62, %v7476_v62  ;;  %10554 = vrcp.f32 %v7351_v51  ;;  %v8594_v29 = vcombine.low %v8586_v12, %v8593_v60 }
 0x5f3   : > { %v8610_v33 = vrot.slane %v8596_v22, %v11616_v49  ;;  %v7500_v9 = vrot.slane %v7486_v40, %v11616_v49  ;;  %v7501_v8 = vcombine.high %v7493_v18, %v7493_v18  ;;  %v10549_v61 = vpop.eup %10548  ;;  %v8461_v14 = vadd.f32 %v14230_v15, %v7493_v18  ;;  %v13602_v10 = vpop.f32.mrb[0].mxu1  ;;  %v14233_v22 = vld [vmem:[#allocation24_spill] sm:$0xff]  ;;  %v14234_v40 = vld [vmem:[#allocation19_spill] sm:$0xff] }
 0x5f4   : > { %v7485_v1 = vcombine.high %v7483_v7, %v7483_v7  ;;  %v8458_v41 = vadd.f32 %v14228_v32, %v7484_v55  ;;  %v8459_v28 = vadd.f32 %v14229_v46, %v7483_v7  ;;  %8866 = vst.msk [vmem:[%s10734_s18] sm:$0xff] %vm14231_vm11, %v8594_v29  ;;  %v14232_v54 = vsel %vm12987_vm12, %v13093_v37, %v13060_v39  ;;  %v10118_v51 = vpop.f32.mrb[1].mxu1 }
 0x5f5   : > { %v8611_v43 = vcombine.low %v8603_v6, %v8610_v33  ;;  %v7502_v12 = vcombine.high %v7500_v9, %v7500_v9  ;;  %v8462_v19 = vadd.f32 %v14232_v54, %v7501_v8  ;;  %v8463_v62 = vadd.f32 %v13141_v17, %v7500_v9  ;;  %v10551_v60 = vpop.eup %10550  ;;  %v13618_v33 = vpop.f32.mrb[2].mxu1  ;;  %v14239_v54 = vld [vmem:[#allocation30_spill] sm:$0xff] }
 0x5f6   : > { %v14235_v18 = vsel %vm12987_vm12, %v14233_v22, %v14234_v40  ;;  %v8612_v55 = vcombine.low %v8458_v41, %v8459_v28  ;;  %v7403_v6 = vmul.f32 %v10549_v61, %v13452_v26  ;;  %v7352_v29 = vadd.f32 1.0, %v10547_v13 }
 0x5f7   : > { %v8460_v7 = vadd.f32 %v14235_v18, %v7485_v1  ;;  %8867 = vst.msk [vmem:[%s10734_s18 + $0x8] sm:$0xff] %vm14236_vm5, %v8611_v43  ;;  %v14237_v39 = vsel %vm12987_vm12, %v13112_v11, %v13083_v53  ;;  %v8629_v17 = vcombine.low %v8462_v19, %v8463_v62  ;;  %v7404_v9 = vmul.f32 %v10551_v60, %v13462_v36  ;;  %v10119_v1 = vpop.f32.mrb[3].mxu1  ;;  %v14241_v18 = vld [vmem:[#allocation35_spill] sm:$0xff] }
 0x5f8   : > { %v8464_v37 = vadd.f32 %v14237_v39, %v7502_v12  ;;  %v13629_v8 = vadd.f32 %v13318_v34, %v7257_v2  ;;  %v10553_v32 = vpop.eup %10552  ;;  %v8620_v26 = vrot.slane %v8612_v55, %v11616_v49  ;;  %v7503_v61 = vcombine.high %v7403_v6, %v7403_v6  ;;  %v14238_v12 = vld [vmem:[#allocation29_spill] sm:$0xff]  ;;  %v14242_v39 = vld [vmem:[#allocation32_spill] sm:$0xff] }
 0x5f9   : > { %v8613_v13 = vcombine.low %v8460_v7, %v8461_v14  ;;  %v7510_v41 = vrot.slane %v7403_v6, %v11616_v49  ;;  %v8637_v46 = vrot.slane %v8629_v17, %v11616_v49  ;;  %v7519_v28 = vcombine.high %v7404_v9, %v7404_v9  ;;  %v14243_v17 = vld [vmem:[#allocation33_spill] sm:$0xff] }
 0x5fa   : > { %v7526_v53 = vrot.slane %v7404_v9, %v11616_v49  ;;  %10556 = vrcp.f32 %v7352_v29  ;;  %v7517_v36 = vrot.slane %v7503_v61, %v11616_v49  ;;  %v7353_v15 = vadd.f32 1.0, %v10553_v32 }
 0x5fb   : > { %v8627_v11 = vrot.slane %v8613_v13, %v11616_v49  ;;  %v8465_v2 = vadd.f32 %v13155_v44, %v7510_v41  ;;  %v7533_v43 = vrot.slane %v7519_v28, %v11616_v49  ;;  %v14240_v19 = vsel %vm12987_vm12, %v14238_v12, %v14239_v54  ;;  %v7055_v44 = vpop.f32.mrb[4].mxu1  ;;  %v14248_v12 = vld [vmem:[#allocation7_spill] sm:$0xff] }
 0x5fc   : > { %v7534_v14 = vcombine.high %v7526_v53, %v7526_v53  ;;  %v8468_v62 = vadd.f32 %v14240_v19, %v7526_v53  ;;  %v9310_v51 = vmul.f32 -1.442695, %v13629_v8  ;;  %v10555_v60 = vpop.eup %10554  ;;  %v7518_v40 = vcombine.high %v7517_v36, %v7517_v36  ;;  %v10122_v13 = vpop.f32.mrb[5].mxu1 }
 0x5fd   : > { %v8628_v22 = vcombine.low %v8620_v26, %v8627_v11  ;;  %v8466_v7 = vadd.f32 %v14241_v18, %v7517_v36  ;;  %v8630_v55 = vcombine.low %v8464_v37, %v8465_v2  ;;  %v7535_v6 = vcombine.high %v7533_v43, %v7533_v43  ;;  %v14246_v26 = vld [vmem:[#allocation36_spill] sm:$0xff]  ;;  %v14247_v37 = vld [vmem:[#allocation22_spill] sm:$0xff] }
 0x5fe   : > { %v8469_v29 = vadd.f32 %v13200_v47, %v7534_v14  ;;  %v14244_v9 = vsel %vm12987_vm12, %v14242_v39, %v14243_v17  ;;  %v7405_v32 = vmul.f32 %v10555_v60, %v13509_v25  ;;  %v8467_v61 = vadd.f32 %v14246_v26, %v7518_v40  ;;  %v13659_v47 = vpop.f32.mrb[6].mxu1  ;;  %v14253_v39 = vld [vmem:[#allocation31_spill] sm:$0xff]  ;;  %v14255_v26 = vld [vmem:[#allocation42_spill] sm:$0xff] }
 0x5ff   : > { %v8470_v1 = vadd.f32 %v14244_v9, %v7533_v43  ;;  %8868 = vst.msk [vmem:[%s10734_s18 + $0x10] sm:$0xff] %vm14245_vm9, %v8628_v22  ;;  %v8644_v41 = vrot.slane %v8630_v55, %v11616_v49  ;;  %10558 = vrcp.f32 %v7353_v15  ;;  %v7080_v28 = vadd.f32 %v13576_v20, %v14247_v37  ;;  %v10123_v2 = vpop.f32.mrb[7].mxu1 }
 0x600   : > { %v8471_v53 = vadd.f32 %v13224_v16, %v7535_v6  ;;  %v8647_v11 = vcombine.low %v8468_v62, %v8469_v29  ;;  %v7536_v36 = vcombine.high %v7405_v32, %v7405_v32  ;;  %v7543_v25 = vrot.slane %v7405_v32, %v11616_v49  ;;  %v14252_v6 = vld [vmem:[#allocation41_spill] sm:$0xff] }
 0x601   : > { %v8645_v43 = vcombine.low %v8637_v46, %v8644_v41  ;;  %v8646_v14 = vcombine.low %v8466_v7, %v8467_v61  ;;  %10560 = vpow2.f32 %v9310_v51  ;;  %v7258_v54 = vadd.f32 %v14248_v12, %v7080_v28  ;;  %v14251_v51 = vld [vmem:[#allocation26_spill] sm:$0xff]  ;;  %v14256_v41 = vld [vmem:[#allocation9_spill] sm:$0xff] }
 0x602   : > { %v8661_v15 = vrot.slane %v8647_v11, %v11616_v49  ;;  %v8663_v19 = vcombine.low %v8470_v1, %v8471_v53  ;;  %v7550_v20 = vrot.slane %v7536_v36, %v11616_v49  ;;  %v7551_v60 = vcombine.high %v7543_v25, %v7543_v25  ;;  %v14254_v1 = vld [vmem:[#allocation8_spill] sm:$0xff]  ;;  %v14257_v28 = vld [vmem:[#allocation34_spill] sm:$0xff] }
 0x603   : > { %v8654_v22 = vrot.slane %v8646_v14, %v11616_v49  ;;  %8869 = vst.msk [vmem:[%s10734_s18 + $0x18] sm:$0xff] %vm14249_vm1, %v8645_v43  ;;  %v14250_v16 = vsel %vm12987_vm12, %v13186_v23, %v13173_v38  ;;  %v13675_v62 = vadd.f32 %v13318_v34, %v7258_v54  ;;  %v7081_v40 = vadd.f32 %v13587_v52, %v14251_v51  ;;  %v7063_v13 = vpop.f32.mrb[8].mxu1  ;;  %v14259_v14 = vld [vmem:[#allocation10_spill] sm:$0xff]  ;;  %v14260_v54 = vld [vmem:[#allocation37_spill] sm:$0xff] }
 0x604   : > { %v8472_v46 = vadd.f32 %v14250_v16, %v7543_v25  ;;  %v10557_v18 = vpop.eup %10556  ;;  %v8671_v7 = vrot.slane %v8663_v19, %v11616_v49  ;;  %v7552_v55 = vcombine.high %v7550_v20, %v7550_v20  ;;  %v8473_v29 = vadd.f32 %v14252_v6, %v7551_v60  ;;  %v10126_v11 = vpop.f32.mrb[9].mxu1 }
 0x605   : > { %v7082_v17 = vadd.f32 %v13602_v10, %v14253_v39  ;;  %v8662_v9 = vcombine.low %v8654_v22, %v8661_v15  ;;  %v7406_v23 = vmul.f32 %v10557_v18, %v13524_v21  ;;  %v9311_v38 = vmul.f32 -1.442695, %v13675_v62  ;;  %v7066_v25 = vpop.f32.mrb[10].mxu1  ;;  %v14261_v22 = vld [vmem:[#allocation43_spill] sm:$0xff]  ;;  %v14263_v39 = vld [vmem:[#allocation38_spill] sm:$0xff] }
 0x606   : > { %v7259_v32 = vadd.f32 %v14254_v1, %v7081_v40  ;;  %v8474_v52 = vadd.f32 %v14255_v26, %v7552_v55  ;;  %v8664_v61 = vcombine.low %v8472_v46, %v8473_v29  ;;  %v7083_v53 = vadd.f32 %v13618_v33, %v14257_v28  ;;  %v10127_v15 = vpop.f32.mrb[11].mxu1  ;;  %v14262_v29 = vld [vmem:[#allocation39_spill] sm:$0xff] }
 0x607   : > { %v7260_v37 = vadd.f32 %v14256_v41, %v7082_v17  ;;  %8870 = vst.msk [vmem:[%s10734_s18 + $0x20] sm:$0xff] %vm14258_vm7, %v8662_v9  ;;  %v7553_v10 = vcombine.high %v7406_v23, %v7406_v23  ;;  %v7560_v36 = vrot.slane %v7406_v23, %v11616_v49  ;;  %10562 = vpow2.f32 %v9311_v38  ;;  %v14273_v15 = vld [vmem:[#allocation52_spill] sm:$0xff] }
 0x608   : > { %v13694_v21 = vadd.f32 %v13318_v34, %v7259_v32  ;;  %v8678_v2 = vrot.slane %v8664_v61, %v11616_v49  ;;  %v7261_v12 = vadd.f32 %v14259_v14, %v7083_v53  ;;  %v7084_v33 = vadd.f32 %v7055_v44, %v14260_v54  ;;  %v14271_v14 = vld [vmem:[#allocation44_spill] sm:$0xff] }
 0x609   : > { %v13698_v43 = vadd.f32 %v13318_v34, %v7260_v37  ;;  %v10559_v19 = vpop.eup %10558  ;;  %v7567_v20 = vrot.slane %v7553_v10, %v11616_v49  ;;  %v7568_v60 = vcombine.high %v7560_v36, %v7560_v36  ;;  %v8475_v16 = vadd.f32 %v14261_v22, %v7560_v36  ;;  %v14267_v37 = vld [vmem:[#allocation49_spill] sm:$0xff]  ;;  %v14268_v10 = vld [vmem:[#allocation11_spill] sm:$0xff] }
 0x60a   : > { %v9312_v46 = vmul.f32 -1.442695, %v13694_v21  ;;  %v8679_v51 = vcombine.low %v8671_v7, %v8678_v2  ;;  %v7407_v40 = vmul.f32 %v10559_v19, %v13561_v5  ;;  %v13708_v55 = vadd.f32 %v13318_v34, %v7261_v12  ;;  %v14269_v2 = vld [vmem:[#allocation40_spill] sm:$0xff] }
 0x60b   : > { %v9313_v18 = vmul.f32 -1.442695, %v13698_v43  ;;  %v10561_v6 = vpop.eup %10560  ;;  %v7569_v44 = vcombine.high %v7567_v20, %v7567_v20  ;;  %v14264_v17 = vsel %vm12987_vm12, %v14262_v29, %v14263_v39  ;;  %v8477_v23 = vadd.f32 %v13282_v58, %v7567_v20 }
 0x60c   : > { %v8476_v9 = vadd.f32 %v14264_v17, %v7568_v60  ;;  %v8680_v38 = vcombine.low %v8474_v52, %v8475_v16  ;;  %8871 = vst.msk [vmem:[%s10734_s18 + $0x28] sm:$0xff] %vm14265_vm3, %v8679_v51  ;;  %v7570_v7 = vcombine.high %v7407_v40, %v7407_v40  ;;  %v7577_v5 = vrot.slane %v7407_v40, %v11616_v49  ;;  %v14274_v60 = vld [vmem:[#allocation46_spill] sm:$0xff] }
 0x60d   : > { %v7354_v1 = vadd.f32 1.0, %v10561_v6  ;;  %10564 = vpow2.f32 %v9312_v46  ;;  %v14266_v32 = vsel %vm12987_vm12, %v13256_v31, %v13217_v30  ;;  %v9314_v11 = vmul.f32 -1.442695, %v13708_v55  ;;  %v14270_v30 = vld [vmem:[#allocation45_spill] sm:$0xff] }
 0x60e   : > { %v8478_v26 = vadd.f32 %v14266_v32, %v7569_v44  ;;  %v8681_v61 = vcombine.low %v8476_v9, %v8477_v23  ;;  %v8688_v41 = vrot.slane %v8680_v38, %v11616_v49  ;;  %10566 = vpow2.f32 %v9313_v18  ;;  %v14276_v6 = vld [vmem:[#allocation13_spill] sm:$0xff]  ;;  %v14279_v23 = vld [vmem:[#allocation48_spill] sm:$0xff] }
 0x60f   : > { %v7584_v58 = vrot.slane %v7570_v7, %v11616_v49  ;;  %v7585_v52 = vcombine.high %v7577_v5, %v7577_v5  ;;  %v8479_v28 = vadd.f32 %v14267_v37, %v7577_v5  ;;  %10568 = vrcp.f32 %v7354_v1 }
 0x610   : > { %v8695_v53 = vrot.slane %v8681_v61, %v11616_v49  ;;  %v7262_v36 = vadd.f32 %v14268_v10, %v7084_v33  ;;  %v7085_v31 = vadd.f32 %v13659_v47, %v14269_v2  ;;  %v14272_v12 = vsel %vm12987_vm12, %v14270_v30, %v14271_v14  ;;  %v14275_v33 = vld [vmem:[#allocation12_spill] sm:$0xff] }
 0x611   : > { %v8480_v54 = vadd.f32 %v14272_v12, %v7585_v52  ;;  %v8481_v19 = vadd.f32 %v14273_v15, %v7584_v58  ;;  %v8697_v20 = vcombine.low %v8478_v26, %v8479_v28  ;;  %v7086_v22 = vadd.f32 %v7063_v13, %v14274_v60  ;;  %v10563_v16 = vpop.eup %10562  ;;  %v14280_v26 = vld [vmem:[#allocation14_spill] sm:$0xff]  ;;  %v9352_v12 = vld.sshfl [vmem:[%s10726_s15 + $0xe8] sm:$0x3 pattern:$0x76325410] }
 0x612   : > { %v8696_v46 = vcombine.low %v8688_v41, %v8695_v53  ;;  %10570 = vpow2.f32 %v9314_v11  ;;  %v13740_v51 = vadd.f32 %v13318_v34, %v7262_v36  ;;  %v7263_v40 = vadd.f32 %v14275_v33, %v7085_v31 }
 0x613   : > { %v8698_v47 = vcombine.low %v8480_v54, %v8481_v19  ;;  %v7355_v18 = vadd.f32 1.0, %v10563_v16  ;;  %v7264_v44 = vadd.f32 %v14276_v6, %v7086_v22  ;;  %v14277_v29 = vcombine.high %v13496_v48, %v13496_v48 }
 0x614   : > { %8872 = vst.msk [vmem:[%s10734_s18 + $0x30] sm:$0xff] %vm14278_vm14, %v8696_v46  ;;  %v9315_v13 = vmul.f32 -1.442695, %v13740_v51  ;;  %v13754_v17 = vadd.f32 %v13318_v34, %v7263_v40  ;;  %v8372_v9 = vrot.slane %v13529_v35, 7  ;;  %v7087_v38 = vadd.f32 %v7066_v25, %v14279_v23 }
 0x615   : > { %v13748_v39 = vrot.slane %v14277_v29, %v11616_v49  ;;  %v8705_v7 = vrot.slane %v8697_v20, %v11616_v49  ;;  %v8712_v5 = vrot.slane %v8698_v47, %v11616_v49  ;;  %10572 = vrcp.f32 %v7355_v18 }
 0x616   : > { %v13761_v48 = vadd.f32 %v13318_v34, %v7264_v44  ;;  %10574 = vpow2.f32 %v9315_v13  ;;  %v9316_v1 = vmul.f32 -1.442695, %v13754_v17  ;;  %v8155_v32 = vcombine.high %v13547_v59, %v13547_v59 }
 0x617   : > { %v7265_v61 = vadd.f32 %v14280_v26, %v7087_v38  ;;  %v10565_v41 = vpop.eup %10564  ;;  %v8713_v25 = vcombine.low %v8705_v7, %v8712_v5  ;;  %v8366_v52 = vrot.slane %v13547_v59, 7  ;;  %v8172_v37 = vcombine.high %v13748_v39, %v13748_v39 }
 0x618   : > { %v9317_v58 = vmul.f32 -1.442695, %v13761_v48  ;;  %v10567_v28 = vpop.eup %10566  ;;  %v7356_v53 = vadd.f32 1.0, %v10565_v41  ;;  %10576 = vpow2.f32 %v9316_v1  ;;  %v8365_v11 = vrot.slane %v13536_v57, 2 }
 0x619   : > { %v13773_v10 = vadd.f32 %v13318_v34, %v7265_v61  ;;  %v10569_v36 = vpop.eup %10568  ;;  %8873 = vst.msk [vmem:[%s10734_s18 + $0x38] sm:$0xff] %vm14281_vm0, %v8713_v25  ;;  %v7357_v2 = vadd.f32 1.0, %v10567_v28  ;;  %v14282_v31 = vrot.slane %v13468_v27, 9  ;;  %v14283_v30 = vcombine.high %v13529_v35, %v13529_v35  ;;  %v14286_v61 = vld [vmem:[#allocation47_spill] sm:$0xff]  ;;  %v14290_v35 = vld [vmem:[#allocation50_spill] sm:$0xff] }
 0x61a   : > { %10578 = vpow2.f32 %v9317_v58  ;;  %v7408_v34 = vmul.f32 %v10569_v36, %v13629_v8  ;;  %v13793_v54 = vrot.slane %v8372_v9, 2  ;;  %v13796_v15 = vrot.slane %v8366_v52, 2 }
 0x61b   : > { %v13782_v59 = vsel %vm12987_vm12, %v14282_v31, %v13536_v57  ;;  %v13787_v14 = vrot.slane %v14283_v30, 7  ;;  %10580 = vrcp.f32 %v7356_v53  ;;  %v9318_v27 = vmul.f32 -1.442695, %v13773_v10  ;;  %v14288_v53 = vld [vmem:[#allocation53_spill] sm:$0xff] }
 0x61c   : > { %10582 = vrcp.f32 %v7357_v2  ;;  %v13798_v57 = vrot.slane %v8155_v32, 7  ;;  %v13800_v19 = vrot.slane %v8172_v37, 7  ;;  %v10571_v20 = vpop.eup %10570  ;;  %v7586_v60 = vcombine.high %v7408_v34, %v7408_v34 }
 0x61d   : > { %v7593_v22 = vrot.slane %v7408_v34, %v11616_v49  ;;  %v14284_v8 = vrot.slane %v13504_v3, 7  ;;  %v14285_v16 = vrot.slane %v13518_v50, 2  ;;  %10584 = vpow2.f32 %v9318_v27 }
 0x61e   : > { %v7358_v33 = vadd.f32 1.0, %v10571_v20  ;;  %v8377_v40 = vrot.slane %v13787_v14, 2  ;;  %v8378_v47 = vrot.slane %v13748_v39, 7  ;;  %v8384_v18 = vrot.slane %v9352_v12, 7 }
 0x61f   : > { %v13809_v46 = vsel %vm12987_vm12, %v14285_v16, %v14284_v8  ;;  %v7600_v6 = vrot.slane %v7586_v60, %v11616_v49  ;;  %v7601_v44 = vcombine.high %v7593_v22, %v7593_v22  ;;  %v13816_v29 = vsel %vm12987_vm12, %v8365_v11, %v8366_v52  ;;  %v10573_v13 = vpop.eup %10572 }
 0x620   : > { %v8376_v3 = vsel %vm12987_vm12, %v13793_v54, %v13787_v14  ;;  %10586 = vrcp.f32 %v7358_v33  ;;  %v8370_v39 = vsel %vm12987_vm12, %v13796_v15, %v13798_v57  ;;  %v8371_v23 = vrot.slane %v13798_v57, 2  ;;  %v10575_v7 = vpop.eup %10574 }
 0x621   : > { %v8383_v38 = vrot.slane %v13800_v19, 2  ;;  %v7602_v5 = vcombine.high %v7600_v6, %v7600_v6  ;;  %v8482_v1 = vadd.f32 %v13322_v42, %v7593_v22  ;;  %v8483_v32 = vadd.f32 %v13326_v0, %v7601_v44  ;;  %v14289_v22 = vld [vmem:[#allocation51_spill] sm:$0xff] }
 0x622   : > { %v7409_v26 = vmul.f32 %v10573_v13, %v13675_v62  ;;  %v14287_v41 = vsel %vm12987_vm12, %v13303_v63, %v14286_v61  ;;  %v7359_v58 = vadd.f32 1.0, %v10575_v7  ;;  %v13838_v52 = vsel %vm12987_vm12, %v8377_v40, %v8378_v47  ;;  %v10577_v28 = vpop.eup %10576 }
 0x623   : > { %v8484_v25 = vadd.f32 %v14287_v41, %v7600_v6  ;;  %v13840_v37 = vrot.slane %v8378_v47, 2  ;;  %v8485_v42 = vadd.f32 %v14288_v53, %v7602_v5  ;;  %v8714_v11 = vcombine.low %v8482_v1, %v8483_v32  ;;  %v14292_v6 = vld [vmem:[#allocation54_spill] sm:$0xff] }
 0x624   : > { %v7603_v0 = vcombine.high %v7409_v26, %v7409_v26  ;;  %v7610_v62 = vrot.slane %v7409_v26, %v11616_v49  ;;  %v10579_v36 = vpop.eup %10578  ;;  %10588 = vrcp.f32 %v7359_v58  ;;  %v7360_v2 = vadd.f32 1.0, %v10577_v28  ;;  %v14294_v1 = vld [vmem:[#allocation58_spill] sm:$0xff] }
 0x625   : > { %v13848_v63 = vsel %vm12987_vm12, %v8371_v23, %v8372_v9  ;;  %v13852_v31 = vsel %vm12987_vm12, %v8383_v38, %v8384_v18  ;;  %v10581_v30 = vpop.eup %10580  ;;  %v8715_v12 = vcombine.low %v8484_v25, %v8485_v42  ;;  %v8722_v34 = vrot.slane %v8714_v11, %v11616_v49  ;;  %v14296_v11 = vld [vmem:[#allocation60_spill] sm:$0xff] }
 0x626   : > { %v7617_v27 = vrot.slane %v7603_v0, %v11616_v49  ;;  %v7618_v20 = vcombine.high %v7610_v62, %v7610_v62  ;;  %v10583_v60 = vpop.eup %10582  ;;  %v14291_v8 = vsel %vm12987_vm12, %v14289_v22, %v14290_v35  ;;  %v7410_v9 = vmul.f32 %v10581_v30, %v13694_v21  ;;  %v14299_v22 = vld [vmem:[#allocation56_spill] sm:$0xff] }
 0x627   : > { %v8486_v16 = vadd.f32 %v14291_v8, %v7610_v62  ;;  %10590 = vrcp.f32 %v7360_v2  ;;  %v7361_v33 = vadd.f32 1.0, %v10579_v36  ;;  %v10585_v40 = vpop.eup %10584  ;;  %v8729_v47 = vrot.slane %v8715_v12, %v11616_v49  ;;  %v14297_v62 = vld [vmem:[#allocation61_spill] sm:$0xff] }
 0x628   : > { %v7619_v18 = vcombine.high %v7617_v27, %v7617_v27  ;;  %v8487_v44 = vadd.f32 %v14292_v6, %v7618_v20  ;;  %v14293_v13 = vsel %vm12987_vm12, %v13353_v56, %v13347_v24  ;;  %v7620_v38 = vcombine.high %v7410_v9, %v7410_v9 }
 0x629   : > { %v8488_v23 = vadd.f32 %v14293_v13, %v7617_v27  ;;  %v7627_v7 = vrot.slane %v7410_v9, %v11616_v49  ;;  %v7411_v21 = vmul.f32 %v10583_v60, %v13698_v43  ;;  %10592 = vrcp.f32 %v7361_v33 }
 0x62a   : > { %v8730_v5 = vcombine.low %v8722_v34, %v8729_v47  ;;  %v8489_v32 = vadd.f32 %v14294_v1, %v7619_v18  ;;  %v8731_v26 = vcombine.low %v8486_v16, %v8487_v44  ;;  %v7362_v61 = vadd.f32 1.0, %v10585_v40  ;;  %v10587_v41 = vpop.eup %10586  ;;  %v14298_v34 = vld [vmem:[#allocation63_spill] sm:$0xff]  ;;  %v14303_v18 = vld [vmem:[#allocation57_spill] sm:$0xff] }
 0x62b   : > { %v7634_v25 = vrot.slane %v7620_v38, %v11616_v49  ;;  %v7635_v58 = vcombine.high %v7627_v7, %v7627_v7  ;;  %v7637_v28 = vcombine.high %v7411_v21, %v7411_v21  ;;  %v7644_v53 = vrot.slane %v7411_v21, %v11616_v49  ;;  %v14302_v47 = vld [vmem:[#allocation59_spill] sm:$0xff]  ;;  %v14305_v21 = vld [vmem:[#allocation64_spill] sm:$0xff] }
 0x62c   : > { %8874 = vst.msk [vmem:[%s10734_s18 + $0x40] sm:$0xff] %vm14295_vm4, %v8730_v5  ;;  %v8732_v24 = vcombine.low %v8488_v23, %v8489_v32  ;;  %v8739_v56 = vrot.slane %v8731_v26, %v11616_v49  ;;  %v7412_v43 = vmul.f32 %v10587_v41, %v13708_v55  ;;  %10594 = vrcp.f32 %v7362_v61  ;;  %v14300_v55 = vld [vmem:[#allocation55_spill] sm:$0xff]  ;;  %v14306_v5 = vld [vmem:[#allocation62_spill] sm:$0xff] }
 0x62d   : > { %v7636_v42 = vcombine.high %v7634_v25, %v7634_v25  ;;  %v8490_v0 = vadd.f32 %v14296_v11, %v7635_v58  ;;  %v8491_v36 = vadd.f32 %v14297_v62, %v7634_v25  ;;  %v7651_v2 = vrot.slane %v7637_v28, %v11616_v49  ;;  %v14309_v25 = vld [vmem:[#allocation69_spill] sm:$0xff]  ;;  %v14310_v28 = vld [vmem:[#allocation70_spill] sm:$0xff] }
 0x62e   : > { %v8746_v30 = vrot.slane %v8732_v24, %v11616_v49  ;;  %v7652_v12 = vcombine.high %v7644_v53, %v7644_v53  ;;  %v8493_v27 = vadd.f32 %v14298_v34, %v7644_v53  ;;  %v7654_v20 = vcombine.high %v7412_v43, %v7412_v43  ;;  %v10589_v60 = vpop.eup %10588 }
 0x62f   : > { %v14301_v35 = vsel %vm12987_vm12, %v14299_v22, %v14300_v55  ;;  %v8748_v16 = vcombine.low %v8490_v0, %v8491_v36  ;;  %v7653_v9 = vcombine.high %v7651_v2, %v7651_v2  ;;  %v8495_v33 = vadd.f32 %v13439_v45, %v7651_v2 }
 0x630   : > { %v8492_v8 = vadd.f32 %v14301_v35, %v7636_v42  ;;  %v8747_v40 = vcombine.low %v8739_v56, %v8746_v30  ;;  %v14304_v6 = vsel %vm12987_vm12, %v14302_v47, %v14303_v18  ;;  %v7661_v13 = vrot.slane %v7412_v43, %v11616_v49  ;;  %v14318_v47 = vld [vmem:[#allocation67_spill] sm:$0xff] }
 0x631   : > { %v8494_v44 = vadd.f32 %v14304_v6, %v7652_v12  ;;  %v7668_v23 = vrot.slane %v7654_v20, %v11616_v49  ;;  %v10591_v38 = vpop.eup %10590  ;;  %v8756_v7 = vrot.slane %v8748_v16, %v11616_v49  ;;  %v14307_v1 = vsel %vm12987_vm12, %v14305_v21, %v14306_v5  ;;  %v14313_v20 = vld [vmem:[#allocation65_spill] sm:$0xff] }
 0x632   : > { %v8496_v45 = vadd.f32 %v14307_v1, %v7653_v9  ;;  %v8749_v32 = vcombine.low %v8492_v8, %v8493_v27  ;;  %v7413_v26 = vmul.f32 %v10589_v60, %v13740_v51  ;;  %8875 = vst.msk [vmem:[%s10734_s18 + $0x48] sm:$0xff] %vm14308_vm6, %v8747_v40  ;;  %v8497_v58 = vadd.f32 %v14309_v25, %v7661_v13  ;;  %v14311_v51 = vld [vmem:[#allocation71_spill] sm:$0xff]  ;;  %v14312_v27 = vld [vmem:[#allocation66_spill] sm:$0xff]  ;;  %v14316_v9 = vld [vmem:[#allocation72_spill] sm:$0xff] }
 0x633   : > { %v8765_v61 = vcombine.low %v8494_v44, %v8495_v33  ;;  %v7669_v41 = vcombine.high %v7668_v23, %v7668_v23  ;;  %v8498_v53 = vadd.f32 %v14310_v28, %v7668_v23  ;;  %v10593_v24 = vpop.eup %10592  ;;  %v7414_v11 = vmul.f32 %v10591_v38, %v13754_v17  ;;  %v14317_v40 = vld [vmem:[#allocation68_spill] sm:$0xff]  ;;  %v14320_v21 = vld [vmem:[#allocation73_spill] sm:$0xff] }
 0x634   : > { %v8763_v56 = vrot.slane %v8749_v32, %v11616_v49  ;;  %v7670_v43 = vcombine.high %v7413_v26, %v7413_v26  ;;  %v7677_v42 = vrot.slane %v7413_v26, %v11616_v49  ;;  %v8766_v36 = vcombine.low %v8496_v45, %v8497_v58  ;;  %v14321_v45 = vld [vmem:[#allocation4_spill] sm:$0xff] }
 0x635   : > { %v8773_v0 = vrot.slane %v8765_v61, %v11616_v49  ;;  %v8499_v62 = vadd.f32 %v14311_v51, %v7669_v41  ;;  %v7415_v2 = vmul.f32 %v10593_v24, %v13761_v48  ;;  %v14314_v60 = vsel %vm12987_vm12, %v14312_v27, %v14313_v20 }
 0x636   : > { %v8764_v30 = vcombine.low %v8756_v7, %v8763_v56  ;;  %v7684_v12 = vrot.slane %v7670_v43, %v11616_v49  ;;  %v7685_v34 = vcombine.high %v7677_v42, %v7677_v42  ;;  %v8500_v22 = vadd.f32 %v14314_v60, %v7677_v42  ;;  %v10595_v55 = vpop.eup %10594 }
 0x637   : > { %v8780_v17 = vrot.slane %v8766_v36, %v11616_v49  ;;  %v8782_v35 = vcombine.low %v8498_v53, %v8499_v62  ;;  %v7687_v8 = vcombine.high %v7414_v11, %v7414_v11  ;;  %v7694_v16 = vrot.slane %v7414_v11, %v11616_v49 }
 0x638   : > { %8876 = vst.msk [vmem:[%s10734_s18 + $0x50] sm:$0xff] %vm14315_vm8, %v8764_v30  ;;  %v7686_v48 = vcombine.high %v7684_v12, %v7684_v12  ;;  %v8501_v33 = vadd.f32 %v14316_v9, %v7685_v34  ;;  %v14319_v18 = vsel %vm12987_vm12, %v14317_v40, %v14318_v47  ;;  %v7704_v44 = vcombine.high %v7415_v2, %v7415_v2 }
 0x639   : > { %v8502_v6 = vadd.f32 %v14319_v18, %v7684_v12  ;;  %v8781_v13 = vcombine.low %v8773_v0, %v8780_v17  ;;  %v8790_v23 = vrot.slane %v8782_v35, %v11616_v49  ;;  %v7701_v38 = vrot.slane %v7687_v8, %v11616_v49 }
 0x63a   : > { %v7702_v7 = vcombine.high %v7694_v16, %v7694_v16  ;;  %v8503_v5 = vadd.f32 %v14320_v21, %v7686_v48  ;;  %v8783_v1 = vcombine.low %v8500_v22, %v8501_v33  ;;  %v14322_v32 = vsel %vm12987_vm12, %v14321_v45, %v13518_v50 }
 0x63b   : > { %v8504_v26 = vadd.f32 %v14322_v32, %v7694_v16  ;;  %v7711_v61 = vrot.slane %v7415_v2, %v11616_v49  ;;  %8877 = vst.msk [vmem:[%s10734_s18 + $0x58] sm:$0xff] %vm14323_vm15, %v8781_v13  ;;  %v7703_v41 = vcombine.high %v7701_v38, %v7701_v38  ;;  %v7718_v58 = vrot.slane %v7704_v44, %v11616_v49 }
 0x63c   : > { %v8505_v25 = vadd.f32 %v13809_v46, %v7702_v7  ;;  %v7416_v28 = vmul.f32 %v10595_v55, %v13773_v10  ;;  %v8797_v53 = vrot.slane %v8783_v1, %v11616_v49  ;;  %v8799_v24 = vcombine.low %v8502_v6, %v8503_v5 }
 0x63d   : > { %v7719_v56 = vcombine.high %v7711_v61, %v7711_v61  ;;  %v8507_v43 = vadd.f32 %v13816_v29, %v7711_v61  ;;  %v8506_v50 = vadd.f32 %v13782_v59, %v7703_v41  ;;  %v7720_v11 = vcombine.high %v7718_v58, %v7718_v58 }
 0x63e   : > { %v8800_v42 = vcombine.low %v8504_v26, %v8505_v25  ;;  %v8509_v0 = vadd.f32 %v13848_v63, %v7718_v58  ;;  %v8798_v51 = vcombine.low %v8790_v23, %v8797_v53  ;;  %v8807_v46 = vrot.slane %v8799_v24, %v11616_v49 }
 0x63f   : > { %v8508_v10 = vadd.f32 %v8370_v39, %v7719_v56  ;;  %v7721_v62 = vcombine.high %v7416_v28, %v7416_v28  ;;  %v8510_v59 = vadd.f32 %v8376_v3, %v7720_v11  ;;  %v8816_v29 = vcombine.low %v8506_v50, %v8507_v43 }
 0x640   : > { %v8814_v36 = vrot.slane %v8800_v42, %v11616_v49  ;;  %v7728_v63 = vrot.slane %v7416_v28, %v11616_v49  ;;  %8878 = vst.msk [vmem:[%s10734_s18 + $0x60] sm:$0xff] %vm14324_vm2, %v8798_v51  ;;  %v8382_v57 = vsel %vm12987_vm12, %v13840_v37, %v13800_v19  ;;  %vm14327_vm12 = vmmov %vm14281_vm0 }
 0x641   : > { %v8817_v2 = vcombine.low %v8508_v10, %v8509_v0  ;;  %v7735_v15 = vrot.slane %v7721_v62, %v11616_v49  ;;  %v8824_v54 = vrot.slane %v8816_v29, %v11616_v49 }
 0x642   : > { %v8815_v39 = vcombine.low %v8807_v46, %v8814_v36  ;;  %v7736_v30 = vcombine.high %v7728_v63, %v7728_v63  ;;  %v8511_v14 = vadd.f32 %v13838_v52, %v7728_v63 }
 0x643   : > { %v8831_v3 = vrot.slane %v8817_v2, %v11616_v49  ;;  %v8513_v12 = vadd.f32 %v13852_v31, %v7735_v15 }
 0x644   : > { %8879 = vst.msk [vmem:[%s10734_s18 + $0x68] sm:$0xff] %vm14325_vm13, %v8815_v39  ;;  %v8512_v34 = vadd.f32 %v8382_v57, %v7736_v30  ;;  %v8833_v27 = vcombine.low %v8510_v59, %v8511_v14 }
 0x645   : > { %v8832_v20 = vcombine.low %v8824_v54, %v8831_v3 }
 0x646   : > { %v8834_v60 = vcombine.low %v8512_v34, %v8513_v12  ;;  %v8841_v4 = vrot.slane %v8833_v27, %v11616_v49 }
 0x647   : > { %8880 = vst.msk [vmem:[%s10734_s18 + $0x70] sm:$0xff] %vm14326_vm10, %v8832_v20 }
 0x648   : > { %v8848_v19 = vrot.slane %v8834_v60, %v11616_v49 }
 0x64a   : > { %v8849_v37 = vcombine.low %v8841_v4, %v8848_v19 }
 0x64c   : > { %8881 = vst.msk [vmem:[%s10734_s18 + $0x78] sm:$0xff] %vm14327_vm12, %v8849_v37 }
 0x64d PF: > { %s15_s22 = sadd.s32 1, %s10634_s22   ;;  %s14328_s18 = smov %s10626_s20 }
 0x64e   : > { %p12_p9 = scmp.ge.s32.totalorder %s15_s22, 6   ;;  %s14329_s19 = smov %s10630_s21 }
 0x64f   : > { %s14330_s20 = smov %s14333_s23  ;;  %s14331_s21 = smov %s14337_s24 }
 0x650   :  { %14 = sbr.rel (!%p12_p9) target bundleno = 3 (0x3), region = 96 }

</bundles_post_ra>
